<compile_context>
chip_gen: v5e
topology: v5e:2x2
jax: 0.10.0
libtpu: 0.0.40
codegen_flags: <defaults>
</compile_context>

<pallas_src>
import functools

import jax
import jax.numpy as jnp
from jax import lax
from jax.experimental import pallas as pl
from jax.experimental.pallas import tpu as pltpu

configs = {"topk_c": 4, "topk_f": 4}

CDIM = 32    # coarse token feature dim
FDIM = 16    # fine token feature dim (fine input tokens carry 8*FDIM features)
N_HEAD = 2
LN_EPS = 1e-12  # reference "from scratch" LayerNorm eps


# --------------------------------------------------------------------------
# One EncoderLayer on a VMEM-resident (S, D) activation.  `refs` is the
# packed 12-tuple of weight refs for that layer.  Returns (y, cls_attn_row)
# where cls_attn_row is (n_head, S) (row 0 of the per-head attention) or None.
# --------------------------------------------------------------------------
def _one_layer(x, refs, n_head, want_cls_attn):
    (wqkv, bqkv, wo, bo, g1, be1, w1, bf1, w2, bf2, g2, be2) = refs
    S, D = x.shape
    dh = D // n_head
    scale = 1.0 / float(dh) ** 0.5

    # fused QKV projection: one (S, D) @ (D, 3D) MXU push
    qkv = jnp.dot(x, wqkv[...], preferred_element_type=jnp.float32) + bqkv[...]
    q = qkv[:, 0 * D:1 * D]
    k = qkv[:, 1 * D:2 * D]
    v = qkv[:, 2 * D:3 * D]

    ctx_parts = []
    cls_rows = []
    for h in range(n_head):                      # static python loop over heads
        qh = q[:, h * dh:(h + 1) * dh]
        kh = k[:, h * dh:(h + 1) * dh]
        vh = v[:, h * dh:(h + 1) * dh]
        scores = lax.dot_general(
            qh, kh, (((1,), (1,)), ((), ())),
            preferred_element_type=jnp.float32) * scale          # (S, S)
        scores = scores - jnp.max(scores, axis=-1, keepdims=True)
        e = jnp.exp(scores)
        attn = e * pl.reciprocal(jnp.sum(e, axis=-1, keepdims=True), approx=True)
        if want_cls_attn:
            cls_rows.append(attn[0:1, :])        # (1, S) -- only row consumed later
        ctx_parts.append(jnp.dot(attn, vh, preferred_element_type=jnp.float32))

    # lane-concat head contexts -> single full-width output projection
    ctx = jnp.concatenate(ctx_parts, axis=-1)                      # (S, D)
    a_out = jnp.dot(ctx, wo[...], preferred_element_type=jnp.float32) + bo[...]

    # residual + LayerNorm 1
    h1 = x + a_out
    mu1 = jnp.mean(h1, axis=-1, keepdims=True)
    var1 = jnp.mean((h1 - mu1) ** 2, axis=-1, keepdims=True)
    n1 = (h1 - mu1) * lax.rsqrt(var1 + LN_EPS) * g1[...] + be1[...]

    # FFN (Linear -> ReLU -> Linear), dropout = identity (eval)
    f1 = jnp.maximum(
        jnp.dot(n1, w1[...], preferred_element_type=jnp.float32) + bf1[...], 0.0)
    f2 = jnp.dot(f1, w2[...], preferred_element_type=jnp.float32) + bf2[...]

    # residual + LayerNorm 2
    h2 = n1 + f2
    mu2 = jnp.mean(h2, axis=-1, keepdims=True)
    var2 = jnp.mean((h2 - mu2) ** 2, axis=-1, keepdims=True)
    y = (h2 - mu2) * lax.rsqrt(var2 + LN_EPS) * g2[...] + be2[...]

    if want_cls_attn:
        return y, jnp.concatenate(cls_rows, axis=0)                # (n_head, S)
    return y, None


# --------------------------------------------------------------------------
# Fused two-layer kernel: layer1 -> layer2 on the same VMEM slab, emits the
# final tokens and head_score_row = attn1[cls] * attn2[cls] per head.
# --------------------------------------------------------------------------
def encoder2_kernel(*args, n_head):
    x_ref = args[0]
    l1 = args[1:13]
    l2 = args[13:25]
    out_ref = args[25]
    hs_ref = args[26]

    x = x_ref[0]                                  # (S, D)
    y1, cls1 = _one_layer(x, l1, n_head, True)
    y2, cls2 = _one_layer(y1, l2, n_head, True)
    out_ref[0] = y2
    hs_ref[0] = cls1 * cls2                       # (n_head, S)


# Single-layer kernel (classification encoder layers; no attention output).
def encoder1_kernel(*args, n_head):
    x_ref = args[0]
    l1 = args[1:13]
    out_ref = args[13]
    x = x_ref[0]
    y, _ = _one_layer(x, l1, n_head, False)
    out_ref[0] = y


# --------------------------------------------------------------------------
# pallas_call wrappers
# --------------------------------------------------------------------------
def _wspec(a):
    nd = a.ndim
    return pl.BlockSpec(a.shape, lambda b, _nd=nd: (0,) * _nd)


def encoder_pair(x, flat1, flat2, n_head=N_HEAD):
    """x: (B, S, D) -> (tokens (B, S, D), head_score_row (B, n_head, S))."""
    B, S, D = x.shape
    in_specs = ([pl.BlockSpec((1, S, D), lambda b: (b, 0, 0))]
                + [_wspec(a) for a in flat1]
                + [_wspec(a) for a in flat2])
    out_specs = (pl.BlockSpec((1, S, D), lambda b: (b, 0, 0)),
                 pl.BlockSpec((1, n_head, S), lambda b: (b, 0, 0)))
    out_shape = (jax.ShapeDtypeStruct((B, S, D), jnp.float32),
                 jax.ShapeDtypeStruct((B, n_head, S), jnp.float32))
    return pl.pallas_call(
        functools.partial(encoder2_kernel, n_head=n_head),
        grid=(B,),
        in_specs=in_specs,
        out_specs=out_specs,
        out_shape=out_shape,
        compiler_params=pltpu.CompilerParams(dimension_semantics=("parallel",)),
    )(x, *flat1, *flat2)


def encoder_single(x, flat1, n_head=N_HEAD):
    """x: (B, S, D) -> tokens (B, S, D)."""
    B, S, D = x.shape
    in_specs = ([pl.BlockSpec((1, S, D), lambda b: (b, 0, 0))]
                + [_wspec(a) for a in flat1])
    out_specs = pl.BlockSpec((1, S, D), lambda b: (b, 0, 0))
    out_shape = jax.ShapeDtypeStruct((B, S, D), jnp.float32)
    return pl.pallas_call(
        functools.partial(encoder1_kernel, n_head=n_head),
        grid=(B,),
        in_specs=in_specs,
        out_specs=out_specs,
        out_shape=out_shape,
        compiler_params=pltpu.CompilerParams(dimension_semantics=("parallel",)),
    )(x, *flat1)


# --------------------------------------------------------------------------
# Device-side, jittable top-k token selection (mirrors torch.topk + python
# dedup-preserving-order + ascending sort of the chosen indices).
# --------------------------------------------------------------------------
def get_topk_tokens(tokens, head_score, topk):
    """tokens: (B, N, dim), head_score: (B, H, N) -> (B, topk, dim)."""
    bs, hn, num = head_score.shape
    K = hn * topk
    hs_flat = head_score.reshape(bs, hn * num)
    _, sel = lax.top_k(hs_flat, K)                    # (B, K), descending values
    idx = sel % num                                   # token index per selection

    # dedup preserving selection order: keep first occurrence of each token
    pos = jnp.arange(K)
    earlier_mask = pos[None, :] < pos[:, None]        # (K, K): col strictly before row
    eq = idx[:, :, None] == idx[:, None, :]           # (B, K, K)
    dup_earlier = jnp.any(eq & earlier_mask[None], axis=2)
    is_first = ~dup_earlier
    rank = jnp.cumsum(is_first.astype(jnp.int32), axis=1) - 1
    keep = is_first & (rank < topk)                   # first `topk` unique tokens

    # kept indices -> ascending order (non-kept pushed to the end via sentinel)
    cand = jnp.where(keep, idx, num)
    sorted_idx = jnp.sort(cand, axis=1)[:, :topk]     # (B, topk), ascending

    return jnp.take_along_axis(tokens, sorted_idx[:, :, None], axis=1)


def process_fine_tokens(tokens, fdim):
    bs, topk = tokens.shape[0], tokens.shape[1]
    bftp = tokens[:, :, : fdim * 6].reshape(bs, topk * 6, fdim)
    va = tokens[:, 0, fdim * 6:].reshape(bs, 2, fdim)
    return jnp.concatenate([bftp, va], axis=1)


# --------------------------------------------------------------------------
# Parameter init (deterministic, synthetic) + host-side packing (QKV fusion)
# --------------------------------------------------------------------------
def init_encoder_params(key, d):
    ks = jax.random.split(key, 6)
    w = lambda k, shp: jax.random.normal(k, shp, jnp.float32) * 0.02
    z = lambda: jnp.zeros((1, d), jnp.float32)
    return dict(
        wq=w(ks[0], (d, d)), bq=z(),
        wk=w(ks[1], (d, d)), bk=z(),
        wv=w(ks[2], (d, d)), bv=z(),
        wo=w(ks[3], (d, d)), bo=z(),
        g1=jnp.ones((1, d), jnp.float32), be1=z(),
        w1=w(ks[4], (d, d)), bf1=z(),          # ffn_hidden == d_model
        w2=w(ks[5], (d, d)), bf2=z(),
        g2=jnp.ones((1, d), jnp.float32), be2=z(),
    )


def init_model_params(key, cdim, fdim):
    ks = jax.random.split(key, 12)
    return dict(
        cls_token_c=jax.random.normal(ks[0], (1, 1, cdim), jnp.float32),
        cls_token_f=jax.random.normal(ks[1], (1, 1, fdim), jnp.float32),
        coarse_1=init_encoder_params(ks[2], cdim),
        coarse_2=init_encoder_params(ks[3], cdim),
        coarse_cls=init_encoder_params(ks[4], cdim),
        fine_1=init_encoder_params(ks[5], fdim),
        fine_2=init_encoder_params(ks[6], fdim),
        fine_cls=init_encoder_params(ks[7], fdim),
        clf_c_w=jax.random.normal(ks[8], (cdim, 8), jnp.float32) * 0.02,
        clf_c_b=jnp.zeros((8,), jnp.float32),
        clf_f_w=jax.random.normal(ks[9], (fdim, 8), jnp.float32) * 0.02,
        clf_f_b=jnp.zeros((8,), jnp.float32),
    )


def pack_encoder_params(p):
    """Pack per-layer weights for the kernel: fused QKV weight/bias + the rest."""
    return [
        jnp.concatenate([p["wq"], p["wk"], p["wv"]], axis=1),   # (D, 3D)
        jnp.concatenate([p["bq"], p["bk"], p["bv"]], axis=1),   # (1, 3D)
        p["wo"], p["bo"], p["g1"], p["be1"],
        p["w1"], p["bf1"], p["w2"], p["bf2"], p["g2"], p["be2"],
    ]


def prepare_params(params):
    prep = {
        "cls_token_c": params["cls_token_c"],
        "cls_token_f": params["cls_token_f"],
        "clf_c_w": params["clf_c_w"], "clf_c_b": params["clf_c_b"],
        "clf_f_w": params["clf_f_w"], "clf_f_b": params["clf_f_b"],
    }
    for name in ("coarse_1", "coarse_2", "coarse_cls",
                 "fine_1", "fine_2", "fine_cls"):
        prep[name] = pack_encoder_params(params[name])
    return prep


# --------------------------------------------------------------------------
# Full Model_Select forward (end-to-end jitted; no host round-trips)
# --------------------------------------------------------------------------
@jax.jit
def model_select_forward(p, c_tokens, f_tokens):
    topk_c = configs["topk_c"]
    topk_f = configs["topk_f"]
    B = c_tokens.shape[0]

    # ---- coarse branch ----
    cls_c = jnp.broadcast_to(p["cls_token_c"], (B, 1, CDIM))
    c = jnp.concatenate([cls_c, c_tokens], axis=1)                  # (B, 1+Nc, CDIM)
    c, hs_row_c = encoder_pair(c, p["coarse_1"], p["coarse_2"])     # hs_row_c: (B, H, S)
    cls_c = c[:, 0:1, :]
    c_body = c[:, 1:, :]
    head_score_c = hs_row_c[:, :, 1:]                               # (B, H, Nc)

    sc_tokens = get_topk_tokens(c_body, head_score_c, topk_c)
    cfeatures = sc_tokens
    sc_tokens = jnp.concatenate([cls_c, sc_tokens], axis=1)
    sc_tokens = encoder_single(sc_tokens, p["coarse_cls"])
    relations_c = jnp.dot(sc_tokens[:, 0, :], p["clf_c_w"]) + p["clf_c_b"]   # (B, 8)

    # ---- fine branch ----
    cls_f = jnp.broadcast_to(p["cls_token_f"], (B, 1, FDIM))
    cr_tokens = get_topk_tokens(f_tokens, head_score_c, topk_c)     # (B, topk_c, 8*FDIM)
    fr_tokens = process_fine_tokens(cr_tokens, FDIM)                # (B, topk_c*6+2, FDIM)
    fine = jnp.concatenate([cls_f, fr_tokens], axis=1)
    fine, hs_row_f = encoder_pair(fine, p["fine_1"], p["fine_2"])
    cls_f = fine[:, 0:1, :]
    f_body = fine[:, 1:, :]
    head_score_f = hs_row_f[:, :, 1:]

    sf_tokens = get_topk_tokens(f_body, head_score_f, topk_f)
    ffeatures = sf_tokens
    sf_tokens = jnp.concatenate([cls_f, sf_tokens], axis=1)
    sf_tokens = encoder_single(sf_tokens, p["fine_cls"])
    relations_f = jnp.dot(sf_tokens[:, 0, :], p["clf_f_w"]) + p["clf_f_b"]   # (B, 8)

    relations = jnp.maximum(relations_c, relations_f)               # max over {coarse, fine}
    return relations, cfeatures, ffeatures


# --------------------------------------------------------------------------
if __name__ == "__main__":
    key = jax.random.PRNGKey(0)
    kc, kf, kp = jax.random.split(key, 3)

    B, NC = 2, 8
    c_tokens = jax.random.normal(kc, (B, NC, CDIM), jnp.float32)
    f_tokens = jax.random.normal(kf, (B, NC, 8 * FDIM), jnp.float32)

    params = init_model_params(kp, CDIM, FDIM)
    prep = prepare_params(params)

    relations, cfeatures, ffeatures = model_select_forward(prep, c_tokens, f_tokens)
    jax.block_until_ready(relations)
    jax.block_until_ready(cfeatures)
    jax.block_until_ready(ffeatures)

    assert relations.shape == (B, 8)
    assert cfeatures.shape == (B, configs["topk_c"], CDIM)
    assert ffeatures.shape == (B, configs["topk_f"], FDIM)
    assert bool(jnp.all(jnp.isfinite(relations)))
    assert bool(jnp.all(jnp.isfinite(cfeatures)))
    assert bool(jnp.all(jnp.isfinite(ffeatures)))

    print("KERNEL_OK")
</pallas_src>

<mosaic_0001>
module attributes {stable_mosaic.version = 11 : i64} {
  func.func @encoder2_kernel(%arg0: i32, %arg1: memref<1x9x32xf32, #tpu.memory_space<vmem>>, %arg2: memref<32x96xf32, #tpu.memory_space<vmem>>, %arg3: memref<1x96xf32, #tpu.memory_space<vmem>>, %arg4: memref<32x32xf32, #tpu.memory_space<vmem>>, %arg5: memref<1x32xf32, #tpu.memory_space<vmem>>, %arg6: memref<1x32xf32, #tpu.memory_space<vmem>>, %arg7: memref<1x32xf32, #tpu.memory_space<vmem>>, %arg8: memref<32x32xf32, #tpu.memory_space<vmem>>, %arg9: memref<1x32xf32, #tpu.memory_space<vmem>>, %arg10: memref<32x32xf32, #tpu.memory_space<vmem>>, %arg11: memref<1x32xf32, #tpu.memory_space<vmem>>, %arg12: memref<1x32xf32, #tpu.memory_space<vmem>>, %arg13: memref<1x32xf32, #tpu.memory_space<vmem>>, %arg14: memref<32x96xf32, #tpu.memory_space<vmem>>, %arg15: memref<1x96xf32, #tpu.memory_space<vmem>>, %arg16: memref<32x32xf32, #tpu.memory_space<vmem>>, %arg17: memref<1x32xf32, #tpu.memory_space<vmem>>, %arg18: memref<1x32xf32, #tpu.memory_space<vmem>>, %arg19: memref<1x32xf32, #tpu.memory_space<vmem>>, %arg20: memref<32x32xf32, #tpu.memory_space<vmem>>, %arg21: memref<1x32xf32, #tpu.memory_space<vmem>>, %arg22: memref<32x32xf32, #tpu.memory_space<vmem>>, %arg23: memref<1x32xf32, #tpu.memory_space<vmem>>, %arg24: memref<1x32xf32, #tpu.memory_space<vmem>>, %arg25: memref<1x32xf32, #tpu.memory_space<vmem>>, %arg26: memref<1x9x32xf32, #tpu.memory_space<vmem>>, %arg27: memref<1x2x9xf32, #tpu.memory_space<vmem>>) attributes {dimension_semantics = [#tpu.dimension_semantics<parallel>], iteration_bounds = array<i64: 2>, scalar_prefetch = 0 : i64, scratch_operands = 0 : i64, tpu.core_type = #tpu.core_type<tc>, window_params = [{transform_indices = @transform_0, window_bounds = array<i64: 1, 9, 32>}, {pipeline_mode = #tpu.pipeline_mode<synchronous>, transform_indices = @transform_1, window_bounds = array<i64: 32, 96>}, {pipeline_mode = #tpu.pipeline_mode<synchronous>, transform_indices = @transform_2, window_bounds = array<i64: 1, 96>}, {pipeline_mode = #tpu.pipeline_mode<synchronous>, transform_indices = @transform_3, window_bounds = array<i64: 32, 32>}, {pipeline_mode = #tpu.pipeline_mode<synchronous>, transform_indices = @transform_4, window_bounds = array<i64: 1, 32>}, {pipeline_mode = #tpu.pipeline_mode<synchronous>, transform_indices = @transform_5, window_bounds = array<i64: 1, 32>}, {pipeline_mode = #tpu.pipeline_mode<synchronous>, transform_indices = @transform_6, window_bounds = array<i64: 1, 32>}, {pipeline_mode = #tpu.pipeline_mode<synchronous>, transform_indices = @transform_7, window_bounds = array<i64: 32, 32>}, {pipeline_mode = #tpu.pipeline_mode<synchronous>, transform_indices = @transform_8, window_bounds = array<i64: 1, 32>}, {pipeline_mode = #tpu.pipeline_mode<synchronous>, transform_indices = @transform_9, window_bounds = array<i64: 32, 32>}, {pipeline_mode = #tpu.pipeline_mode<synchronous>, transform_indices = @transform_10, window_bounds = array<i64: 1, 32>}, {pipeline_mode = #tpu.pipeline_mode<synchronous>, transform_indices = @transform_11, window_bounds = array<i64: 1, 32>}, {pipeline_mode = #tpu.pipeline_mode<synchronous>, transform_indices = @transform_12, window_bounds = array<i64: 1, 32>}, {pipeline_mode = #tpu.pipeline_mode<synchronous>, transform_indices = @transform_13, window_bounds = array<i64: 32, 96>}, {pipeline_mode = #tpu.pipeline_mode<synchronous>, transform_indices = @transform_14, window_bounds = array<i64: 1, 96>}, {pipeline_mode = #tpu.pipeline_mode<synchronous>, transform_indices = @transform_15, window_bounds = array<i64: 32, 32>}, {pipeline_mode = #tpu.pipeline_mode<synchronous>, transform_indices = @transform_16, window_bounds = array<i64: 1, 32>}, {pipeline_mode = #tpu.pipeline_mode<synchronous>, transform_indices = @transform_17, window_bounds = array<i64: 1, 32>}, {pipeline_mode = #tpu.pipeline_mode<synchronous>, transform_indices = @transform_18, window_bounds = array<i64: 1, 32>}, {pipeline_mode = #tpu.pipeline_mode<synchronous>, transform_indices = @transform_19, window_bounds = array<i64: 32, 32>}, {pipeline_mode = #tpu.pipeline_mode<synchronous>, transform_indices = @transform_20, window_bounds = array<i64: 1, 32>}, {pipeline_mode = #tpu.pipeline_mode<synchronous>, transform_indices = @transform_21, window_bounds = array<i64: 32, 32>}, {pipeline_mode = #tpu.pipeline_mode<synchronous>, transform_indices = @transform_22, window_bounds = array<i64: 1, 32>}, {pipeline_mode = #tpu.pipeline_mode<synchronous>, transform_indices = @transform_23, window_bounds = array<i64: 1, 32>}, {pipeline_mode = #tpu.pipeline_mode<synchronous>, transform_indices = @transform_24, window_bounds = array<i64: 1, 32>}, {transform_indices = @transform_25, window_bounds = array<i64: 1, 9, 32>}, {transform_indices = @transform_26, window_bounds = array<i64: 1, 2, 9>}]} {
    %c0 = arith.constant 0 : index
    %c0_0 = arith.constant 0 : index
    %c0_1 = arith.constant 0 : index
    %0 = vector.load %arg1[%c0, %c0_0, %c0_1] : memref<1x9x32xf32, #tpu.memory_space<vmem>>, vector<1x9x32xf32>
    %1 = vector.shape_cast %0 : vector<1x9x32xf32> to vector<9x32xf32>
    %c0_2 = arith.constant 0 : index
    %c0_3 = arith.constant 0 : index
    %2 = vector.load %arg2[%c0_2, %c0_3] : memref<32x96xf32, #tpu.memory_space<vmem>>, vector<32x96xf32>
    %cst = arith.constant dense<0.000000e+00> : vector<9x96xf32>
    %3 = tpu.matmul %1, %2, %cst {dimension_numbers = #tpu.dot_dimension_numbers<[1], [0], [0], [1], [0, 0, 1, 1], [], []>} : vector<9x32xf32>, vector<32x96xf32>, vector<9x96xf32> -> vector<9x96xf32>
    %c0_4 = arith.constant 0 : index
    %c0_5 = arith.constant 0 : index
    %4 = vector.load %arg3[%c0_4, %c0_5] : memref<1x96xf32, #tpu.memory_space<vmem>>, vector<1x96xf32>
    %5 = vector.broadcast %4 : vector<1x96xf32> to vector<9x96xf32>
    %6 = arith.addf %3, %5 : vector<9x96xf32>
    %7 = vector.extract_strided_slice %6 {offsets = [0, 0], sizes = [9, 32], strides = [1, 1]} : vector<9x96xf32> to vector<9x32xf32>
    %8 = vector.extract_strided_slice %6 {offsets = [0, 32], sizes = [9, 32], strides = [1, 1]} : vector<9x96xf32> to vector<9x32xf32>
    %9 = vector.extract_strided_slice %6 {offsets = [0, 64], sizes = [9, 32], strides = [1, 1]} : vector<9x96xf32> to vector<9x32xf32>
    %10 = vector.extract_strided_slice %7 {offsets = [0, 0], sizes = [9, 16], strides = [1, 1]} : vector<9x32xf32> to vector<9x16xf32>
    %11 = vector.extract_strided_slice %8 {offsets = [0, 0], sizes = [9, 16], strides = [1, 1]} : vector<9x32xf32> to vector<9x16xf32>
    %12 = vector.extract_strided_slice %9 {offsets = [0, 0], sizes = [9, 16], strides = [1, 1]} : vector<9x32xf32> to vector<9x16xf32>
    %cst_6 = arith.constant dense<0.000000e+00> : vector<9x9xf32>
    %13 = tpu.matmul %10, %11, %cst_6 {dimension_numbers = #tpu.dot_dimension_numbers<[1], [1], [0], [0], [0, 0, 1, 0], [], []>} : vector<9x16xf32>, vector<9x16xf32>, vector<9x9xf32> -> vector<9x9xf32>
    %cst_7 = arith.constant 2.500000e-01 : f32
    %14 = vector.broadcast %cst_7 : f32 to vector<9x9xf32>
    %15 = arith.mulf %13, %14 : vector<9x9xf32>
    %cst_8 = arith.constant dense<0xFF800000> : vector<9xf32>
    %16 = vector.multi_reduction <maximumf>, %15, %cst_8 [1] : vector<9x9xf32> to vector<9xf32>
    %17 = vector.shape_cast %16 : vector<9xf32> to vector<9x1xf32>
    %18 = vector.broadcast %17 : vector<9x1xf32> to vector<9x9xf32>
    %19 = arith.subf %15, %18 : vector<9x9xf32>
    %20 = math.exp %19 : vector<9x9xf32>
    %cst_9 = arith.constant dense<0.000000e+00> : vector<9xf32>
    %21 = vector.multi_reduction <add>, %20, %cst_9 [1] : vector<9x9xf32> to vector<9xf32>
    %22 = vector.shape_cast %21 : vector<9xf32> to vector<9x1xf32>
    %23 = tpu.reciprocal %22 {approx = true} : vector<9x1xf32> -> vector<9x1xf32>
    %24 = vector.broadcast %23 : vector<9x1xf32> to vector<9x9xf32>
    %25 = arith.mulf %20, %24 : vector<9x9xf32>
    %26 = vector.extract_strided_slice %25 {offsets = [0, 0], sizes = [1, 9], strides = [1, 1]} : vector<9x9xf32> to vector<1x9xf32>
    %cst_10 = arith.constant dense<0.000000e+00> : vector<9x16xf32>
    %27 = tpu.matmul %25, %12, %cst_10 {dimension_numbers = #tpu.dot_dimension_numbers<[1], [0], [0], [1], [0, 0, 1, 1], [], []>} : vector<9x9xf32>, vector<9x16xf32>, vector<9x16xf32> -> vector<9x16xf32>
    %28 = vector.extract_strided_slice %7 {offsets = [0, 16], sizes = [9, 16], strides = [1, 1]} : vector<9x32xf32> to vector<9x16xf32>
    %29 = vector.extract_strided_slice %8 {offsets = [0, 16], sizes = [9, 16], strides = [1, 1]} : vector<9x32xf32> to vector<9x16xf32>
    %30 = vector.extract_strided_slice %9 {offsets = [0, 16], sizes = [9, 16], strides = [1, 1]} : vector<9x32xf32> to vector<9x16xf32>
    %cst_11 = arith.constant dense<0.000000e+00> : vector<9x9xf32>
    %31 = tpu.matmul %28, %29, %cst_11 {dimension_numbers = #tpu.dot_dimension_numbers<[1], [1], [0], [0], [0, 0, 1, 0], [], []>} : vector<9x16xf32>, vector<9x16xf32>, vector<9x9xf32> -> vector<9x9xf32>
    %cst_12 = arith.constant 2.500000e-01 : f32
    %32 = vector.broadcast %cst_12 : f32 to vector<9x9xf32>
    %33 = arith.mulf %31, %32 : vector<9x9xf32>
    %cst_13 = arith.constant dense<0xFF800000> : vector<9xf32>
    %34 = vector.multi_reduction <maximumf>, %33, %cst_13 [1] : vector<9x9xf32> to vector<9xf32>
    %35 = vector.shape_cast %34 : vector<9xf32> to vector<9x1xf32>
    %36 = vector.broadcast %35 : vector<9x1xf32> to vector<9x9xf32>
    %37 = arith.subf %33, %36 : vector<9x9xf32>
    %38 = math.exp %37 : vector<9x9xf32>
    %cst_14 = arith.constant dense<0.000000e+00> : vector<9xf32>
    %39 = vector.multi_reduction <add>, %38, %cst_14 [1] : vector<9x9xf32> to vector<9xf32>
    %40 = vector.shape_cast %39 : vector<9xf32> to vector<9x1xf32>
    %41 = tpu.reciprocal %40 {approx = true} : vector<9x1xf32> -> vector<9x1xf32>
    %42 = vector.broadcast %41 : vector<9x1xf32> to vector<9x9xf32>
    %43 = arith.mulf %38, %42 : vector<9x9xf32>
    %44 = vector.extract_strided_slice %43 {offsets = [0, 0], sizes = [1, 9], strides = [1, 1]} : vector<9x9xf32> to vector<1x9xf32>
    %cst_15 = arith.constant dense<0.000000e+00> : vector<9x16xf32>
    %45 = tpu.matmul %43, %30, %cst_15 {dimension_numbers = #tpu.dot_dimension_numbers<[1], [0], [0], [1], [0, 0, 1, 1], [], []>} : vector<9x9xf32>, vector<9x16xf32>, vector<9x16xf32> -> vector<9x16xf32>
    %46 = tpu.concatenate %27, %45 in 1 : vector<9x16xf32>, vector<9x16xf32> -> vector<9x32xf32>
    %c0_16 = arith.constant 0 : index
    %c0_17 = arith.constant 0 : index
    %47 = vector.load %arg4[%c0_16, %c0_17] : memref<32x32xf32, #tpu.memory_space<vmem>>, vector<32x32xf32>
    %cst_18 = arith.constant dense<0.000000e+00> : vector<9x32xf32>
    %48 = tpu.matmul %46, %47, %cst_18 {dimension_numbers = #tpu.dot_dimension_numbers<[1], [0], [0], [1], [0, 0, 1, 1], [], []>} : vector<9x32xf32>, vector<32x32xf32>, vector<9x32xf32> -> vector<9x32xf32>
    %c0_19 = arith.constant 0 : index
    %c0_20 = arith.constant 0 : index
    %49 = vector.load %arg5[%c0_19, %c0_20] : memref<1x32xf32, #tpu.memory_space<vmem>>, vector<1x32xf32>
    %50 = vector.broadcast %49 : vector<1x32xf32> to vector<9x32xf32>
    %51 = arith.addf %48, %50 : vector<9x32xf32>
    %52 = arith.addf %1, %51 : vector<9x32xf32>
    %cst_21 = arith.constant dense<0.000000e+00> : vector<9xf32>
    %53 = vector.multi_reduction <add>, %52, %cst_21 [1] : vector<9x32xf32> to vector<9xf32>
    %54 = vector.shape_cast %53 : vector<9xf32> to vector<9x1xf32>
    %cst_22 = arith.constant 3.200000e+01 : f32
    %55 = vector.broadcast %cst_22 : f32 to vector<9x1xf32>
    %56 = arith.divf %54, %55 : vector<9x1xf32>
    %57 = vector.broadcast %56 : vector<9x1xf32> to vector<9x32xf32>
    %58 = arith.subf %52, %57 : vector<9x32xf32>
    %59 = arith.mulf %58, %58 : vector<9x32xf32>
    %cst_23 = arith.constant dense<0.000000e+00> : vector<9xf32>
    %60 = vector.multi_reduction <add>, %59, %cst_23 [1] : vector<9x32xf32> to vector<9xf32>
    %61 = vector.shape_cast %60 : vector<9xf32> to vector<9x1xf32>
    %cst_24 = arith.constant 3.200000e+01 : f32
    %62 = vector.broadcast %cst_24 : f32 to vector<9x1xf32>
    %63 = arith.divf %61, %62 : vector<9x1xf32>
    %64 = vector.broadcast %56 : vector<9x1xf32> to vector<9x32xf32>
    %65 = arith.subf %52, %64 : vector<9x32xf32>
    %cst_25 = arith.constant 9.99999996E-13 : f32
    %66 = vector.broadcast %cst_25 : f32 to vector<9x1xf32>
    %67 = arith.addf %63, %66 : vector<9x1xf32>
    %68 = math.rsqrt %67 : vector<9x1xf32>
    %69 = vector.broadcast %68 : vector<9x1xf32> to vector<9x32xf32>
    %70 = arith.mulf %65, %69 : vector<9x32xf32>
    %c0_26 = arith.constant 0 : index
    %c0_27 = arith.constant 0 : index
    %71 = vector.load %arg6[%c0_26, %c0_27] : memref<1x32xf32, #tpu.memory_space<vmem>>, vector<1x32xf32>
    %72 = vector.broadcast %71 : vector<1x32xf32> to vector<9x32xf32>
    %73 = arith.mulf %70, %72 : vector<9x32xf32>
    %c0_28 = arith.constant 0 : index
    %c0_29 = arith.constant 0 : index
    %74 = vector.load %arg7[%c0_28, %c0_29] : memref<1x32xf32, #tpu.memory_space<vmem>>, vector<1x32xf32>
    %75 = vector.broadcast %74 : vector<1x32xf32> to vector<9x32xf32>
    %76 = arith.addf %73, %75 : vector<9x32xf32>
    %c0_30 = arith.constant 0 : index
    %c0_31 = arith.constant 0 : index
    %77 = vector.load %arg8[%c0_30, %c0_31] : memref<32x32xf32, #tpu.memory_space<vmem>>, vector<32x32xf32>
    %cst_32 = arith.constant dense<0.000000e+00> : vector<9x32xf32>
    %78 = tpu.matmul %76, %77, %cst_32 {dimension_numbers = #tpu.dot_dimension_numbers<[1], [0], [0], [1], [0, 0, 1, 1], [], []>} : vector<9x32xf32>, vector<32x32xf32>, vector<9x32xf32> -> vector<9x32xf32>
    %c0_33 = arith.constant 0 : index
    %c0_34 = arith.constant 0 : index
    %79 = vector.load %arg9[%c0_33, %c0_34] : memref<1x32xf32, #tpu.memory_space<vmem>>, vector<1x32xf32>
    %80 = vector.broadcast %79 : vector<1x32xf32> to vector<9x32xf32>
    %81 = arith.addf %78, %80 : vector<9x32xf32>
    %cst_35 = arith.constant 0.000000e+00 : f32
    %82 = vector.broadcast %cst_35 : f32 to vector<9x32xf32>
    %83 = arith.maximumf %81, %82 : vector<9x32xf32>
    %c0_36 = arith.constant 0 : index
    %c0_37 = arith.constant 0 : index
    %84 = vector.load %arg10[%c0_36, %c0_37] : memref<32x32xf32, #tpu.memory_space<vmem>>, vector<32x32xf32>
    %cst_38 = arith.constant dense<0.000000e+00> : vector<9x32xf32>
    %85 = tpu.matmul %83, %84, %cst_38 {dimension_numbers = #tpu.dot_dimension_numbers<[1], [0], [0], [1], [0, 0, 1, 1], [], []>} : vector<9x32xf32>, vector<32x32xf32>, vector<9x32xf32> -> vector<9x32xf32>
    %c0_39 = arith.constant 0 : index
    %c0_40 = arith.constant 0 : index
    %86 = vector.load %arg11[%c0_39, %c0_40] : memref<1x32xf32, #tpu.memory_space<vmem>>, vector<1x32xf32>
    %87 = vector.broadcast %86 : vector<1x32xf32> to vector<9x32xf32>
    %88 = arith.addf %85, %87 : vector<9x32xf32>
    %89 = arith.addf %76, %88 : vector<9x32xf32>
    %cst_41 = arith.constant dense<0.000000e+00> : vector<9xf32>
    %90 = vector.multi_reduction <add>, %89, %cst_41 [1] : vector<9x32xf32> to vector<9xf32>
    %91 = vector.shape_cast %90 : vector<9xf32> to vector<9x1xf32>
    %cst_42 = arith.constant 3.200000e+01 : f32
    %92 = vector.broadcast %cst_42 : f32 to vector<9x1xf32>
    %93 = arith.divf %91, %92 : vector<9x1xf32>
    %94 = vector.broadcast %93 : vector<9x1xf32> to vector<9x32xf32>
    %95 = arith.subf %89, %94 : vector<9x32xf32>
    %96 = arith.mulf %95, %95 : vector<9x32xf32>
    %cst_43 = arith.constant dense<0.000000e+00> : vector<9xf32>
    %97 = vector.multi_reduction <add>, %96, %cst_43 [1] : vector<9x32xf32> to vector<9xf32>
    %98 = vector.shape_cast %97 : vector<9xf32> to vector<9x1xf32>
    %cst_44 = arith.constant 3.200000e+01 : f32
    %99 = vector.broadcast %cst_44 : f32 to vector<9x1xf32>
    %100 = arith.divf %98, %99 : vector<9x1xf32>
    %101 = vector.broadcast %93 : vector<9x1xf32> to vector<9x32xf32>
    %102 = arith.subf %89, %101 : vector<9x32xf32>
    %cst_45 = arith.constant 9.99999996E-13 : f32
    %103 = vector.broadcast %cst_45 : f32 to vector<9x1xf32>
    %104 = arith.addf %100, %103 : vector<9x1xf32>
    %105 = math.rsqrt %104 : vector<9x1xf32>
    %106 = vector.broadcast %105 : vector<9x1xf32> to vector<9x32xf32>
    %107 = arith.mulf %102, %106 : vector<9x32xf32>
    %c0_46 = arith.constant 0 : index
    %c0_47 = arith.constant 0 : index
    %108 = vector.load %arg12[%c0_46, %c0_47] : memref<1x32xf32, #tpu.memory_space<vmem>>, vector<1x32xf32>
    %109 = vector.broadcast %108 : vector<1x32xf32> to vector<9x32xf32>
    %110 = arith.mulf %107, %109 : vector<9x32xf32>
    %c0_48 = arith.constant 0 : index
    %c0_49 = arith.constant 0 : index
    %111 = vector.load %arg13[%c0_48, %c0_49] : memref<1x32xf32, #tpu.memory_space<vmem>>, vector<1x32xf32>
    %112 = vector.broadcast %111 : vector<1x32xf32> to vector<9x32xf32>
    %113 = arith.addf %110, %112 : vector<9x32xf32>
    %114 = tpu.concatenate %26, %44 in 0 : vector<1x9xf32>, vector<1x9xf32> -> vector<2x9xf32>
    %c0_50 = arith.constant 0 : index
    %c0_51 = arith.constant 0 : index
    %115 = vector.load %arg14[%c0_50, %c0_51] : memref<32x96xf32, #tpu.memory_space<vmem>>, vector<32x96xf32>
    %cst_52 = arith.constant dense<0.000000e+00> : vector<9x96xf32>
    %116 = tpu.matmul %113, %115, %cst_52 {dimension_numbers = #tpu.dot_dimension_numbers<[1], [0], [0], [1], [0, 0, 1, 1], [], []>} : vector<9x32xf32>, vector<32x96xf32>, vector<9x96xf32> -> vector<9x96xf32>
    %c0_53 = arith.constant 0 : index
    %c0_54 = arith.constant 0 : index
    %117 = vector.load %arg15[%c0_53, %c0_54] : memref<1x96xf32, #tpu.memory_space<vmem>>, vector<1x96xf32>
    %118 = vector.broadcast %117 : vector<1x96xf32> to vector<9x96xf32>
    %119 = arith.addf %116, %118 : vector<9x96xf32>
    %120 = vector.extract_strided_slice %119 {offsets = [0, 0], sizes = [9, 32], strides = [1, 1]} : vector<9x96xf32> to vector<9x32xf32>
    %121 = vector.extract_strided_slice %119 {offsets = [0, 32], sizes = [9, 32], strides = [1, 1]} : vector<9x96xf32> to vector<9x32xf32>
    %122 = vector.extract_strided_slice %119 {offsets = [0, 64], sizes = [9, 32], strides = [1, 1]} : vector<9x96xf32> to vector<9x32xf32>
    %123 = vector.extract_strided_slice %120 {offsets = [0, 0], sizes = [9, 16], strides = [1, 1]} : vector<9x32xf32> to vector<9x16xf32>
    %124 = vector.extract_strided_slice %121 {offsets = [0, 0], sizes = [9, 16], strides = [1, 1]} : vector<9x32xf32> to vector<9x16xf32>
    %125 = vector.extract_strided_slice %122 {offsets = [0, 0], sizes = [9, 16], strides = [1, 1]} : vector<9x32xf32> to vector<9x16xf32>
    %cst_55 = arith.constant dense<0.000000e+00> : vector<9x9xf32>
    %126 = tpu.matmul %123, %124, %cst_55 {dimension_numbers = #tpu.dot_dimension_numbers<[1], [1], [0], [0], [0, 0, 1, 0], [], []>} : vector<9x16xf32>, vector<9x16xf32>, vector<9x9xf32> -> vector<9x9xf32>
    %cst_56 = arith.constant 2.500000e-01 : f32
    %127 = vector.broadcast %cst_56 : f32 to vector<9x9xf32>
    %128 = arith.mulf %126, %127 : vector<9x9xf32>
    %cst_57 = arith.constant dense<0xFF800000> : vector<9xf32>
    %129 = vector.multi_reduction <maximumf>, %128, %cst_57 [1] : vector<9x9xf32> to vector<9xf32>
    %130 = vector.shape_cast %129 : vector<9xf32> to vector<9x1xf32>
    %131 = vector.broadcast %130 : vector<9x1xf32> to vector<9x9xf32>
    %132 = arith.subf %128, %131 : vector<9x9xf32>
    %133 = math.exp %132 : vector<9x9xf32>
    %cst_58 = arith.constant dense<0.000000e+00> : vector<9xf32>
    %134 = vector.multi_reduction <add>, %133, %cst_58 [1] : vector<9x9xf32> to vector<9xf32>
    %135 = vector.shape_cast %134 : vector<9xf32> to vector<9x1xf32>
    %136 = tpu.reciprocal %135 {approx = true} : vector<9x1xf32> -> vector<9x1xf32>
    %137 = vector.broadcast %136 : vector<9x1xf32> to vector<9x9xf32>
    %138 = arith.mulf %133, %137 : vector<9x9xf32>
    %139 = vector.extract_strided_slice %138 {offsets = [0, 0], sizes = [1, 9], strides = [1, 1]} : vector<9x9xf32> to vector<1x9xf32>
    %cst_59 = arith.constant dense<0.000000e+00> : vector<9x16xf32>
    %140 = tpu.matmul %138, %125, %cst_59 {dimension_numbers = #tpu.dot_dimension_numbers<[1], [0], [0], [1], [0, 0, 1, 1], [], []>} : vector<9x9xf32>, vector<9x16xf32>, vector<9x16xf32> -> vector<9x16xf32>
    %141 = vector.extract_strided_slice %120 {offsets = [0, 16], sizes = [9, 16], strides = [1, 1]} : vector<9x32xf32> to vector<9x16xf32>
    %142 = vector.extract_strided_slice %121 {offsets = [0, 16], sizes = [9, 16], strides = [1, 1]} : vector<9x32xf32> to vector<9x16xf32>
    %143 = vector.extract_strided_slice %122 {offsets = [0, 16], sizes = [9, 16], strides = [1, 1]} : vector<9x32xf32> to vector<9x16xf32>
    %cst_60 = arith.constant dense<0.000000e+00> : vector<9x9xf32>
    %144 = tpu.matmul %141, %142, %cst_60 {dimension_numbers = #tpu.dot_dimension_numbers<[1], [1], [0], [0], [0, 0, 1, 0], [], []>} : vector<9x16xf32>, vector<9x16xf32>, vector<9x9xf32> -> vector<9x9xf32>
    %cst_61 = arith.constant 2.500000e-01 : f32
    %145 = vector.broadcast %cst_61 : f32 to vector<9x9xf32>
    %146 = arith.mulf %144, %145 : vector<9x9xf32>
    %cst_62 = arith.constant dense<0xFF800000> : vector<9xf32>
    %147 = vector.multi_reduction <maximumf>, %146, %cst_62 [1] : vector<9x9xf32> to vector<9xf32>
    %148 = vector.shape_cast %147 : vector<9xf32> to vector<9x1xf32>
    %149 = vector.broadcast %148 : vector<9x1xf32> to vector<9x9xf32>
    %150 = arith.subf %146, %149 : vector<9x9xf32>
    %151 = math.exp %150 : vector<9x9xf32>
    %cst_63 = arith.constant dense<0.000000e+00> : vector<9xf32>
    %152 = vector.multi_reduction <add>, %151, %cst_63 [1] : vector<9x9xf32> to vector<9xf32>
    %153 = vector.shape_cast %152 : vector<9xf32> to vector<9x1xf32>
    %154 = tpu.reciprocal %153 {approx = true} : vector<9x1xf32> -> vector<9x1xf32>
    %155 = vector.broadcast %154 : vector<9x1xf32> to vector<9x9xf32>
    %156 = arith.mulf %151, %155 : vector<9x9xf32>
    %157 = vector.extract_strided_slice %156 {offsets = [0, 0], sizes = [1, 9], strides = [1, 1]} : vector<9x9xf32> to vector<1x9xf32>
    %cst_64 = arith.constant dense<0.000000e+00> : vector<9x16xf32>
    %158 = tpu.matmul %156, %143, %cst_64 {dimension_numbers = #tpu.dot_dimension_numbers<[1], [0], [0], [1], [0, 0, 1, 1], [], []>} : vector<9x9xf32>, vector<9x16xf32>, vector<9x16xf32> -> vector<9x16xf32>
    %159 = tpu.concatenate %140, %158 in 1 : vector<9x16xf32>, vector<9x16xf32> -> vector<9x32xf32>
    %c0_65 = arith.constant 0 : index
    %c0_66 = arith.constant 0 : index
    %160 = vector.load %arg16[%c0_65, %c0_66] : memref<32x32xf32, #tpu.memory_space<vmem>>, vector<32x32xf32>
    %cst_67 = arith.constant dense<0.000000e+00> : vector<9x32xf32>
    %161 = tpu.matmul %159, %160, %cst_67 {dimension_numbers = #tpu.dot_dimension_numbers<[1], [0], [0], [1], [0, 0, 1, 1], [], []>} : vector<9x32xf32>, vector<32x32xf32>, vector<9x32xf32> -> vector<9x32xf32>
    %c0_68 = arith.constant 0 : index
    %c0_69 = arith.constant 0 : index
    %162 = vector.load %arg17[%c0_68, %c0_69] : memref<1x32xf32, #tpu.memory_space<vmem>>, vector<1x32xf32>
    %163 = vector.broadcast %162 : vector<1x32xf32> to vector<9x32xf32>
    %164 = arith.addf %161, %163 : vector<9x32xf32>
    %165 = arith.addf %113, %164 : vector<9x32xf32>
    %cst_70 = arith.constant dense<0.000000e+00> : vector<9xf32>
    %166 = vector.multi_reduction <add>, %165, %cst_70 [1] : vector<9x32xf32> to vector<9xf32>
    %167 = vector.shape_cast %166 : vector<9xf32> to vector<9x1xf32>
    %cst_71 = arith.constant 3.200000e+01 : f32
    %168 = vector.broadcast %cst_71 : f32 to vector<9x1xf32>
    %169 = arith.divf %167, %168 : vector<9x1xf32>
    %170 = vector.broadcast %169 : vector<9x1xf32> to vector<9x32xf32>
    %171 = arith.subf %165, %170 : vector<9x32xf32>
    %172 = arith.mulf %171, %171 : vector<9x32xf32>
    %cst_72 = arith.constant dense<0.000000e+00> : vector<9xf32>
    %173 = vector.multi_reduction <add>, %172, %cst_72 [1] : vector<9x32xf32> to vector<9xf32>
    %174 = vector.shape_cast %173 : vector<9xf32> to vector<9x1xf32>
    %cst_73 = arith.constant 3.200000e+01 : f32
    %175 = vector.broadcast %cst_73 : f32 to vector<9x1xf32>
    %176 = arith.divf %174, %175 : vector<9x1xf32>
    %177 = vector.broadcast %169 : vector<9x1xf32> to vector<9x32xf32>
    %178 = arith.subf %165, %177 : vector<9x32xf32>
    %cst_74 = arith.constant 9.99999996E-13 : f32
    %179 = vector.broadcast %cst_74 : f32 to vector<9x1xf32>
    %180 = arith.addf %176, %179 : vector<9x1xf32>
    %181 = math.rsqrt %180 : vector<9x1xf32>
    %182 = vector.broadcast %181 : vector<9x1xf32> to vector<9x32xf32>
    %183 = arith.mulf %178, %182 : vector<9x32xf32>
    %c0_75 = arith.constant 0 : index
    %c0_76 = arith.constant 0 : index
    %184 = vector.load %arg18[%c0_75, %c0_76] : memref<1x32xf32, #tpu.memory_space<vmem>>, vector<1x32xf32>
    %185 = vector.broadcast %184 : vector<1x32xf32> to vector<9x32xf32>
    %186 = arith.mulf %183, %185 : vector<9x32xf32>
    %c0_77 = arith.constant 0 : index
    %c0_78 = arith.constant 0 : index
    %187 = vector.load %arg19[%c0_77, %c0_78] : memref<1x32xf32, #tpu.memory_space<vmem>>, vector<1x32xf32>
    %188 = vector.broadcast %187 : vector<1x32xf32> to vector<9x32xf32>
    %189 = arith.addf %186, %188 : vector<9x32xf32>
    %c0_79 = arith.constant 0 : index
    %c0_80 = arith.constant 0 : index
    %190 = vector.load %arg20[%c0_79, %c0_80] : memref<32x32xf32, #tpu.memory_space<vmem>>, vector<32x32xf32>
    %cst_81 = arith.constant dense<0.000000e+00> : vector<9x32xf32>
    %191 = tpu.matmul %189, %190, %cst_81 {dimension_numbers = #tpu.dot_dimension_numbers<[1], [0], [0], [1], [0, 0, 1, 1], [], []>} : vector<9x32xf32>, vector<32x32xf32>, vector<9x32xf32> -> vector<9x32xf32>
    %c0_82 = arith.constant 0 : index
    %c0_83 = arith.constant 0 : index
    %192 = vector.load %arg21[%c0_82, %c0_83] : memref<1x32xf32, #tpu.memory_space<vmem>>, vector<1x32xf32>
    %193 = vector.broadcast %192 : vector<1x32xf32> to vector<9x32xf32>
    %194 = arith.addf %191, %193 : vector<9x32xf32>
    %cst_84 = arith.constant 0.000000e+00 : f32
    %195 = vector.broadcast %cst_84 : f32 to vector<9x32xf32>
    %196 = arith.maximumf %194, %195 : vector<9x32xf32>
    %c0_85 = arith.constant 0 : index
    %c0_86 = arith.constant 0 : index
    %197 = vector.load %arg22[%c0_85, %c0_86] : memref<32x32xf32, #tpu.memory_space<vmem>>, vector<32x32xf32>
    %cst_87 = arith.constant dense<0.000000e+00> : vector<9x32xf32>
    %198 = tpu.matmul %196, %197, %cst_87 {dimension_numbers = #tpu.dot_dimension_numbers<[1], [0], [0], [1], [0, 0, 1, 1], [], []>} : vector<9x32xf32>, vector<32x32xf32>, vector<9x32xf32> -> vector<9x32xf32>
    %c0_88 = arith.constant 0 : index
    %c0_89 = arith.constant 0 : index
    %199 = vector.load %arg23[%c0_88, %c0_89] : memref<1x32xf32, #tpu.memory_space<vmem>>, vector<1x32xf32>
    %200 = vector.broadcast %199 : vector<1x32xf32> to vector<9x32xf32>
    %201 = arith.addf %198, %200 : vector<9x32xf32>
    %202 = arith.addf %189, %201 : vector<9x32xf32>
    %cst_90 = arith.constant dense<0.000000e+00> : vector<9xf32>
    %203 = vector.multi_reduction <add>, %202, %cst_90 [1] : vector<9x32xf32> to vector<9xf32>
    %204 = vector.shape_cast %203 : vector<9xf32> to vector<9x1xf32>
    %cst_91 = arith.constant 3.200000e+01 : f32
    %205 = vector.broadcast %cst_91 : f32 to vector<9x1xf32>
    %206 = arith.divf %204, %205 : vector<9x1xf32>
    %207 = vector.broadcast %206 : vector<9x1xf32> to vector<9x32xf32>
    %208 = arith.subf %202, %207 : vector<9x32xf32>
    %209 = arith.mulf %208, %208 : vector<9x32xf32>
    %cst_92 = arith.constant dense<0.000000e+00> : vector<9xf32>
    %210 = vector.multi_reduction <add>, %209, %cst_92 [1] : vector<9x32xf32> to vector<9xf32>
    %211 = vector.shape_cast %210 : vector<9xf32> to vector<9x1xf32>
    %cst_93 = arith.constant 3.200000e+01 : f32
    %212 = vector.broadcast %cst_93 : f32 to vector<9x1xf32>
    %213 = arith.divf %211, %212 : vector<9x1xf32>
    %214 = vector.broadcast %206 : vector<9x1xf32> to vector<9x32xf32>
    %215 = arith.subf %202, %214 : vector<9x32xf32>
    %cst_94 = arith.constant 9.99999996E-13 : f32
    %216 = vector.broadcast %cst_94 : f32 to vector<9x1xf32>
    %217 = arith.addf %213, %216 : vector<9x1xf32>
    %218 = math.rsqrt %217 : vector<9x1xf32>
    %219 = vector.broadcast %218 : vector<9x1xf32> to vector<9x32xf32>
    %220 = arith.mulf %215, %219 : vector<9x32xf32>
    %c0_95 = arith.constant 0 : index
    %c0_96 = arith.constant 0 : index
    %221 = vector.load %arg24[%c0_95, %c0_96] : memref<1x32xf32, #tpu.memory_space<vmem>>, vector<1x32xf32>
    %222 = vector.broadcast %221 : vector<1x32xf32> to vector<9x32xf32>
    %223 = arith.mulf %220, %222 : vector<9x32xf32>
    %c0_97 = arith.constant 0 : index
    %c0_98 = arith.constant 0 : index
    %224 = vector.load %arg25[%c0_97, %c0_98] : memref<1x32xf32, #tpu.memory_space<vmem>>, vector<1x32xf32>
    %225 = vector.broadcast %224 : vector<1x32xf32> to vector<9x32xf32>
    %226 = arith.addf %223, %225 : vector<9x32xf32>
    %227 = tpu.concatenate %139, %157 in 0 : vector<1x9xf32>, vector<1x9xf32> -> vector<2x9xf32>
    %c0_99 = arith.constant 0 : index
    %c0_100 = arith.constant 0 : index
    %c0_101 = arith.constant 0 : index
    %228 = vector.load %arg26[%c0_99, %c0_100, %c0_101] : memref<1x9x32xf32, #tpu.memory_space<vmem>>, vector<1x9x32xf32>
    %229 = vector.shape_cast %228 : vector<1x9x32xf32> to vector<9x32xf32>
    %230 = vector.shape_cast %226 : vector<9x32xf32> to vector<1x9x32xf32>
    tpu.vector_store %arg26[%c0_99, %c0_100, %c0_101], %230 {strides = array<i32>} : memref<1x9x32xf32, #tpu.memory_space<vmem>>, vector<1x9x32xf32>,
    %231 = arith.mulf %114, %227 : vector<2x9xf32>
    %c0_102 = arith.constant 0 : index
    %c0_103 = arith.constant 0 : index
    %c0_104 = arith.constant 0 : index
    %232 = vector.load %arg27[%c0_102, %c0_103, %c0_104] : memref<1x2x9xf32, #tpu.memory_space<vmem>>, vector<1x2x9xf32>
    %233 = vector.shape_cast %232 : vector<1x2x9xf32> to vector<2x9xf32>
    %234 = vector.shape_cast %231 : vector<2x9xf32> to vector<1x2x9xf32>
    tpu.vector_store %arg27[%c0_102, %c0_103, %c0_104], %234 {strides = array<i32>} : memref<1x2x9xf32, #tpu.memory_space<vmem>>, vector<1x2x9xf32>,
    return
  }
  func.func @transform_0(%arg0: i32) -> (i32, i32, i32) {
    %c0_i32 = arith.constant 0 : i32
    %c0_i32_0 = arith.constant 0 : i32
    %c0_i32_1 = arith.constant 0 : i32
    return %arg0, %c0_i32, %c0_i32_0 : i32, i32, i32
  }
  func.func @transform_1(%arg0: i32) -> (i32, i32) {
    %c0_i32 = arith.constant 0 : i32
    %c0_i32_0 = arith.constant 0 : i32
    %c0_i32_1 = arith.constant 0 : i32
    return %c0_i32, %c0_i32_0 : i32, i32
  }
  func.func @transform_2(%arg0: i32) -> (i32, i32) {
    %c0_i32 = arith.constant 0 : i32
    %c0_i32_0 = arith.constant 0 : i32
    %c0_i32_1 = arith.constant 0 : i32
    return %c0_i32, %c0_i32_0 : i32, i32
  }
  func.func @transform_3(%arg0: i32) -> (i32, i32) {
    %c0_i32 = arith.constant 0 : i32
    %c0_i32_0 = arith.constant 0 : i32
    %c0_i32_1 = arith.constant 0 : i32
    return %c0_i32, %c0_i32_0 : i32, i32
  }
  func.func @transform_4(%arg0: i32) -> (i32, i32) {
    %c0_i32 = arith.constant 0 : i32
    %c0_i32_0 = arith.constant 0 : i32
    %c0_i32_1 = arith.constant 0 : i32
    return %c0_i32, %c0_i32_0 : i32, i32
  }
  func.func @transform_5(%arg0: i32) -> (i32, i32) {
    %c0_i32 = arith.constant 0 : i32
    %c0_i32_0 = arith.constant 0 : i32
    %c0_i32_1 = arith.constant 0 : i32
    return %c0_i32, %c0_i32_0 : i32, i32
  }
  func.func @transform_6(%arg0: i32) -> (i32, i32) {
    %c0_i32 = arith.constant 0 : i32
    %c0_i32_0 = arith.constant 0 : i32
    %c0_i32_1 = arith.constant 0 : i32
    return %c0_i32, %c0_i32_0 : i32, i32
  }
  func.func @transform_7(%arg0: i32) -> (i32, i32) {
    %c0_i32 = arith.constant 0 : i32
    %c0_i32_0 = arith.constant 0 : i32
    %c0_i32_1 = arith.constant 0 : i32
    return %c0_i32, %c0_i32_0 : i32, i32
  }
  func.func @transform_8(%arg0: i32) -> (i32, i32) {
    %c0_i32 = arith.constant 0 : i32
    %c0_i32_0 = arith.constant 0 : i32
    %c0_i32_1 = arith.constant 0 : i32
    return %c0_i32, %c0_i32_0 : i32, i32
  }
  func.func @transform_9(%arg0: i32) -> (i32, i32) {
    %c0_i32 = arith.constant 0 : i32
    %c0_i32_0 = arith.constant 0 : i32
    %c0_i32_1 = arith.constant 0 : i32
    return %c0_i32, %c0_i32_0 : i32, i32
  }
  func.func @transform_10(%arg0: i32) -> (i32, i32) {
    %c0_i32 = arith.constant 0 : i32
    %c0_i32_0 = arith.constant 0 : i32
    %c0_i32_1 = arith.constant 0 : i32
    return %c0_i32, %c0_i32_0 : i32, i32
  }
  func.func @transform_11(%arg0: i32) -> (i32, i32) {
    %c0_i32 = arith.constant 0 : i32
    %c0_i32_0 = arith.constant 0 : i32
    %c0_i32_1 = arith.constant 0 : i32
    return %c0_i32, %c0_i32_0 : i32, i32
  }
  func.func @transform_12(%arg0: i32) -> (i32, i32) {
    %c0_i32 = arith.constant 0 : i32
    %c0_i32_0 = arith.constant 0 : i32
    %c0_i32_1 = arith.constant 0 : i32
    return %c0_i32, %c0_i32_0 : i32, i32
  }
  func.func @transform_13(%arg0: i32) -> (i32, i32) {
    %c0_i32 = arith.constant 0 : i32
    %c0_i32_0 = arith.constant 0 : i32
    %c0_i32_1 = arith.constant 0 : i32
    return %c0_i32, %c0_i32_0 : i32, i32
  }
  func.func @transform_14(%arg0: i32) -> (i32, i32) {
    %c0_i32 = arith.constant 0 : i32
    %c0_i32_0 = arith.constant 0 : i32
    %c0_i32_1 = arith.constant 0 : i32
    return %c0_i32, %c0_i32_0 : i32, i32
  }
  func.func @transform_15(%arg0: i32) -> (i32, i32) {
    %c0_i32 = arith.constant 0 : i32
    %c0_i32_0 = arith.constant 0 : i32
    %c0_i32_1 = arith.constant 0 : i32
    return %c0_i32, %c0_i32_0 : i32, i32
  }
  func.func @transform_16(%arg0: i32) -> (i32, i32) {
    %c0_i32 = arith.constant 0 : i32
    %c0_i32_0 = arith.constant 0 : i32
    %c0_i32_1 = arith.constant 0 : i32
    return %c0_i32, %c0_i32_0 : i32, i32
  }
  func.func @transform_17(%arg0: i32) -> (i32, i32) {
    %c0_i32 = arith.constant 0 : i32
    %c0_i32_0 = arith.constant 0 : i32
    %c0_i32_1 = arith.constant 0 : i32
    return %c0_i32, %c0_i32_0 : i32, i32
  }
  func.func @transform_18(%arg0: i32) -> (i32, i32) {
    %c0_i32 = arith.constant 0 : i32
    %c0_i32_0 = arith.constant 0 : i32
    %c0_i32_1 = arith.constant 0 : i32
    return %c0_i32, %c0_i32_0 : i32, i32
  }
  func.func @transform_19(%arg0: i32) -> (i32, i32) {
    %c0_i32 = arith.constant 0 : i32
    %c0_i32_0 = arith.constant 0 : i32
    %c0_i32_1 = arith.constant 0 : i32
    return %c0_i32, %c0_i32_0 : i32, i32
  }
  func.func @transform_20(%arg0: i32) -> (i32, i32) {
    %c0_i32 = arith.constant 0 : i32
    %c0_i32_0 = arith.constant 0 : i32
    %c0_i32_1 = arith.constant 0 : i32
    return %c0_i32, %c0_i32_0 : i32, i32
  }
  func.func @transform_21(%arg0: i32) -> (i32, i32) {
    %c0_i32 = arith.constant 0 : i32
    %c0_i32_0 = arith.constant 0 : i32
    %c0_i32_1 = arith.constant 0 : i32
    return %c0_i32, %c0_i32_0 : i32, i32
  }
  func.func @transform_22(%arg0: i32) -> (i32, i32) {
    %c0_i32 = arith.constant 0 : i32
    %c0_i32_0 = arith.constant 0 : i32
    %c0_i32_1 = arith.constant 0 : i32
    return %c0_i32, %c0_i32_0 : i32, i32
  }
  func.func @transform_23(%arg0: i32) -> (i32, i32) {
    %c0_i32 = arith.constant 0 : i32
    %c0_i32_0 = arith.constant 0 : i32
    %c0_i32_1 = arith.constant 0 : i32
    return %c0_i32, %c0_i32_0 : i32, i32
  }
  func.func @transform_24(%arg0: i32) -> (i32, i32) {
    %c0_i32 = arith.constant 0 : i32
    %c0_i32_0 = arith.constant 0 : i32
    %c0_i32_1 = arith.constant 0 : i32
    return %c0_i32, %c0_i32_0 : i32, i32
  }
  func.func @transform_25(%arg0: i32) -> (i32, i32, i32) {
    %c0_i32 = arith.constant 0 : i32
    %c0_i32_0 = arith.constant 0 : i32
    %c0_i32_1 = arith.constant 0 : i32
    return %arg0, %c0_i32, %c0_i32_0 : i32, i32, i32
  }
  func.func @transform_26(%arg0: i32) -> (i32, i32, i32) {
    %c0_i32 = arith.constant 0 : i32
    %c0_i32_0 = arith.constant 0 : i32
    %c0_i32_1 = arith.constant 0 : i32
    return %arg0, %c0_i32, %c0_i32_0 : i32, i32, i32
  }
}

module attributes {stable_mosaic.version = 11 : i64} {
  func.func @encoder1_kernel(%arg0: i32, %arg1: memref<1x5x32xf32, #tpu.memory_space<vmem>>, %arg2: memref<32x96xf32, #tpu.memory_space<vmem>>, %arg3: memref<1x96xf32, #tpu.memory_space<vmem>>, %arg4: memref<32x32xf32, #tpu.memory_space<vmem>>, %arg5: memref<1x32xf32, #tpu.memory_space<vmem>>, %arg6: memref<1x32xf32, #tpu.memory_space<vmem>>, %arg7: memref<1x32xf32, #tpu.memory_space<vmem>>, %arg8: memref<32x32xf32, #tpu.memory_space<vmem>>, %arg9: memref<1x32xf32, #tpu.memory_space<vmem>>, %arg10: memref<32x32xf32, #tpu.memory_space<vmem>>, %arg11: memref<1x32xf32, #tpu.memory_space<vmem>>, %arg12: memref<1x32xf32, #tpu.memory_space<vmem>>, %arg13: memref<1x32xf32, #tpu.memory_space<vmem>>, %arg14: memref<1x5x32xf32, #tpu.memory_space<vmem>>) attributes {dimension_semantics = [#tpu.dimension_semantics<parallel>], iteration_bounds = array<i64: 2>, scalar_prefetch = 0 : i64, scratch_operands = 0 : i64, tpu.core_type = #tpu.core_type<tc>, window_params = [{transform_indices = @transform_0, window_bounds = array<i64: 1, 5, 32>}, {pipeline_mode = #tpu.pipeline_mode<synchronous>, transform_indices = @transform_1, window_bounds = array<i64: 32, 96>}, {pipeline_mode = #tpu.pipeline_mode<synchronous>, transform_indices = @transform_2, window_bounds = array<i64: 1, 96>}, {pipeline_mode = #tpu.pipeline_mode<synchronous>, transform_indices = @transform_3, window_bounds = array<i64: 32, 32>}, {pipeline_mode = #tpu.pipeline_mode<synchronous>, transform_indices = @transform_4, window_bounds = array<i64: 1, 32>}, {pipeline_mode = #tpu.pipeline_mode<synchronous>, transform_indices = @transform_5, window_bounds = array<i64: 1, 32>}, {pipeline_mode = #tpu.pipeline_mode<synchronous>, transform_indices = @transform_6, window_bounds = array<i64: 1, 32>}, {pipeline_mode = #tpu.pipeline_mode<synchronous>, transform_indices = @transform_7, window_bounds = array<i64: 32, 32>}, {pipeline_mode = #tpu.pipeline_mode<synchronous>, transform_indices = @transform_8, window_bounds = array<i64: 1, 32>}, {pipeline_mode = #tpu.pipeline_mode<synchronous>, transform_indices = @transform_9, window_bounds = array<i64: 32, 32>}, {pipeline_mode = #tpu.pipeline_mode<synchronous>, transform_indices = @transform_10, window_bounds = array<i64: 1, 32>}, {pipeline_mode = #tpu.pipeline_mode<synchronous>, transform_indices = @transform_11, window_bounds = array<i64: 1, 32>}, {pipeline_mode = #tpu.pipeline_mode<synchronous>, transform_indices = @transform_12, window_bounds = array<i64: 1, 32>}, {transform_indices = @transform_13, window_bounds = array<i64: 1, 5, 32>}]} {
    %c0 = arith.constant 0 : index
    %c0_0 = arith.constant 0 : index
    %c0_1 = arith.constant 0 : index
    %0 = vector.load %arg1[%c0, %c0_0, %c0_1] : memref<1x5x32xf32, #tpu.memory_space<vmem>>, vector<1x5x32xf32>
    %1 = vector.shape_cast %0 : vector<1x5x32xf32> to vector<5x32xf32>
    %c0_2 = arith.constant 0 : index
    %c0_3 = arith.constant 0 : index
    %2 = vector.load %arg2[%c0_2, %c0_3] : memref<32x96xf32, #tpu.memory_space<vmem>>, vector<32x96xf32>
    %cst = arith.constant dense<0.000000e+00> : vector<5x96xf32>
    %3 = tpu.matmul %1, %2, %cst {dimension_numbers = #tpu.dot_dimension_numbers<[1], [0], [0], [1], [0, 0, 1, 1], [], []>} : vector<5x32xf32>, vector<32x96xf32>, vector<5x96xf32> -> vector<5x96xf32>
    %c0_4 = arith.constant 0 : index
    %c0_5 = arith.constant 0 : index
    %4 = vector.load %arg3[%c0_4, %c0_5] : memref<1x96xf32, #tpu.memory_space<vmem>>, vector<1x96xf32>
    %5 = vector.broadcast %4 : vector<1x96xf32> to vector<5x96xf32>
    %6 = arith.addf %3, %5 : vector<5x96xf32>
    %7 = vector.extract_strided_slice %6 {offsets = [0, 0], sizes = [5, 32], strides = [1, 1]} : vector<5x96xf32> to vector<5x32xf32>
    %8 = vector.extract_strided_slice %6 {offsets = [0, 32], sizes = [5, 32], strides = [1, 1]} : vector<5x96xf32> to vector<5x32xf32>
    %9 = vector.extract_strided_slice %6 {offsets = [0, 64], sizes = [5, 32], strides = [1, 1]} : vector<5x96xf32> to vector<5x32xf32>
    %10 = vector.extract_strided_slice %7 {offsets = [0, 0], sizes = [5, 16], strides = [1, 1]} : vector<5x32xf32> to vector<5x16xf32>
    %11 = vector.extract_strided_slice %8 {offsets = [0, 0], sizes = [5, 16], strides = [1, 1]} : vector<5x32xf32> to vector<5x16xf32>
    %12 = vector.extract_strided_slice %9 {offsets = [0, 0], sizes = [5, 16], strides = [1, 1]} : vector<5x32xf32> to vector<5x16xf32>
    %cst_6 = arith.constant dense<0.000000e+00> : vector<5x5xf32>
    %13 = tpu.matmul %10, %11, %cst_6 {dimension_numbers = #tpu.dot_dimension_numbers<[1], [1], [0], [0], [0, 0, 1, 0], [], []>} : vector<5x16xf32>, vector<5x16xf32>, vector<5x5xf32> -> vector<5x5xf32>
    %cst_7 = arith.constant 2.500000e-01 : f32
    %14 = vector.broadcast %cst_7 : f32 to vector<5x5xf32>
    %15 = arith.mulf %13, %14 : vector<5x5xf32>
    %cst_8 = arith.constant dense<0xFF800000> : vector<5xf32>
    %16 = vector.multi_reduction <maximumf>, %15, %cst_8 [1] : vector<5x5xf32> to vector<5xf32>
    %17 = vector.shape_cast %16 : vector<5xf32> to vector<5x1xf32>
    %18 = vector.broadcast %17 : vector<5x1xf32> to vector<5x5xf32>
    %19 = arith.subf %15, %18 : vector<5x5xf32>
    %20 = math.exp %19 : vector<5x5xf32>
    %cst_9 = arith.constant dense<0.000000e+00> : vector<5xf32>
    %21 = vector.multi_reduction <add>, %20, %cst_9 [1] : vector<5x5xf32> to vector<5xf32>
    %22 = vector.shape_cast %21 : vector<5xf32> to vector<5x1xf32>
    %23 = tpu.reciprocal %22 {approx = true} : vector<5x1xf32> -> vector<5x1xf32>
    %24 = vector.broadcast %23 : vector<5x1xf32> to vector<5x5xf32>
    %25 = arith.mulf %20, %24 : vector<5x5xf32>
    %cst_10 = arith.constant dense<0.000000e+00> : vector<5x16xf32>
    %26 = tpu.matmul %25, %12, %cst_10 {dimension_numbers = #tpu.dot_dimension_numbers<[1], [0], [0], [1], [0, 0, 1, 1], [], []>} : vector<5x5xf32>, vector<5x16xf32>, vector<5x16xf32> -> vector<5x16xf32>
    %27 = vector.extract_strided_slice %7 {offsets = [0, 16], sizes = [5, 16], strides = [1, 1]} : vector<5x32xf32> to vector<5x16xf32>
    %28 = vector.extract_strided_slice %8 {offsets = [0, 16], sizes = [5, 16], strides = [1, 1]} : vector<5x32xf32> to vector<5x16xf32>
    %29 = vector.extract_strided_slice %9 {offsets = [0, 16], sizes = [5, 16], strides = [1, 1]} : vector<5x32xf32> to vector<5x16xf32>
    %cst_11 = arith.constant dense<0.000000e+00> : vector<5x5xf32>
    %30 = tpu.matmul %27, %28, %cst_11 {dimension_numbers = #tpu.dot_dimension_numbers<[1], [1], [0], [0], [0, 0, 1, 0], [], []>} : vector<5x16xf32>, vector<5x16xf32>, vector<5x5xf32> -> vector<5x5xf32>
    %cst_12 = arith.constant 2.500000e-01 : f32
    %31 = vector.broadcast %cst_12 : f32 to vector<5x5xf32>
    %32 = arith.mulf %30, %31 : vector<5x5xf32>
    %cst_13 = arith.constant dense<0xFF800000> : vector<5xf32>
    %33 = vector.multi_reduction <maximumf>, %32, %cst_13 [1] : vector<5x5xf32> to vector<5xf32>
    %34 = vector.shape_cast %33 : vector<5xf32> to vector<5x1xf32>
    %35 = vector.broadcast %34 : vector<5x1xf32> to vector<5x5xf32>
    %36 = arith.subf %32, %35 : vector<5x5xf32>
    %37 = math.exp %36 : vector<5x5xf32>
    %cst_14 = arith.constant dense<0.000000e+00> : vector<5xf32>
    %38 = vector.multi_reduction <add>, %37, %cst_14 [1] : vector<5x5xf32> to vector<5xf32>
    %39 = vector.shape_cast %38 : vector<5xf32> to vector<5x1xf32>
    %40 = tpu.reciprocal %39 {approx = true} : vector<5x1xf32> -> vector<5x1xf32>
    %41 = vector.broadcast %40 : vector<5x1xf32> to vector<5x5xf32>
    %42 = arith.mulf %37, %41 : vector<5x5xf32>
    %cst_15 = arith.constant dense<0.000000e+00> : vector<5x16xf32>
    %43 = tpu.matmul %42, %29, %cst_15 {dimension_numbers = #tpu.dot_dimension_numbers<[1], [0], [0], [1], [0, 0, 1, 1], [], []>} : vector<5x5xf32>, vector<5x16xf32>, vector<5x16xf32> -> vector<5x16xf32>
    %44 = tpu.concatenate %26, %43 in 1 : vector<5x16xf32>, vector<5x16xf32> -> vector<5x32xf32>
    %c0_16 = arith.constant 0 : index
    %c0_17 = arith.constant 0 : index
    %45 = vector.load %arg4[%c0_16, %c0_17] : memref<32x32xf32, #tpu.memory_space<vmem>>, vector<32x32xf32>
    %cst_18 = arith.constant dense<0.000000e+00> : vector<5x32xf32>
    %46 = tpu.matmul %44, %45, %cst_18 {dimension_numbers = #tpu.dot_dimension_numbers<[1], [0], [0], [1], [0, 0, 1, 1], [], []>} : vector<5x32xf32>, vector<32x32xf32>, vector<5x32xf32> -> vector<5x32xf32>
    %c0_19 = arith.constant 0 : index
    %c0_20 = arith.constant 0 : index
    %47 = vector.load %arg5[%c0_19, %c0_20] : memref<1x32xf32, #tpu.memory_space<vmem>>, vector<1x32xf32>
    %48 = vector.broadcast %47 : vector<1x32xf32> to vector<5x32xf32>
    %49 = arith.addf %46, %48 : vector<5x32xf32>
    %50 = arith.addf %1, %49 : vector<5x32xf32>
    %cst_21 = arith.constant dense<0.000000e+00> : vector<5xf32>
    %51 = vector.multi_reduction <add>, %50, %cst_21 [1] : vector<5x32xf32> to vector<5xf32>
    %52 = vector.shape_cast %51 : vector<5xf32> to vector<5x1xf32>
    %cst_22 = arith.constant 3.200000e+01 : f32
    %53 = vector.broadcast %cst_22 : f32 to vector<5x1xf32>
    %54 = arith.divf %52, %53 : vector<5x1xf32>
    %55 = vector.broadcast %54 : vector<5x1xf32> to vector<5x32xf32>
    %56 = arith.subf %50, %55 : vector<5x32xf32>
    %57 = arith.mulf %56, %56 : vector<5x32xf32>
    %cst_23 = arith.constant dense<0.000000e+00> : vector<5xf32>
    %58 = vector.multi_reduction <add>, %57, %cst_23 [1] : vector<5x32xf32> to vector<5xf32>
    %59 = vector.shape_cast %58 : vector<5xf32> to vector<5x1xf32>
    %cst_24 = arith.constant 3.200000e+01 : f32
    %60 = vector.broadcast %cst_24 : f32 to vector<5x1xf32>
    %61 = arith.divf %59, %60 : vector<5x1xf32>
    %62 = vector.broadcast %54 : vector<5x1xf32> to vector<5x32xf32>
    %63 = arith.subf %50, %62 : vector<5x32xf32>
    %cst_25 = arith.constant 9.99999996E-13 : f32
    %64 = vector.broadcast %cst_25 : f32 to vector<5x1xf32>
    %65 = arith.addf %61, %64 : vector<5x1xf32>
    %66 = math.rsqrt %65 : vector<5x1xf32>
    %67 = vector.broadcast %66 : vector<5x1xf32> to vector<5x32xf32>
    %68 = arith.mulf %63, %67 : vector<5x32xf32>
    %c0_26 = arith.constant 0 : index
    %c0_27 = arith.constant 0 : index
    %69 = vector.load %arg6[%c0_26, %c0_27] : memref<1x32xf32, #tpu.memory_space<vmem>>, vector<1x32xf32>
    %70 = vector.broadcast %69 : vector<1x32xf32> to vector<5x32xf32>
    %71 = arith.mulf %68, %70 : vector<5x32xf32>
    %c0_28 = arith.constant 0 : index
    %c0_29 = arith.constant 0 : index
    %72 = vector.load %arg7[%c0_28, %c0_29] : memref<1x32xf32, #tpu.memory_space<vmem>>, vector<1x32xf32>
    %73 = vector.broadcast %72 : vector<1x32xf32> to vector<5x32xf32>
    %74 = arith.addf %71, %73 : vector<5x32xf32>
    %c0_30 = arith.constant 0 : index
    %c0_31 = arith.constant 0 : index
    %75 = vector.load %arg8[%c0_30, %c0_31] : memref<32x32xf32, #tpu.memory_space<vmem>>, vector<32x32xf32>
    %cst_32 = arith.constant dense<0.000000e+00> : vector<5x32xf32>
    %76 = tpu.matmul %74, %75, %cst_32 {dimension_numbers = #tpu.dot_dimension_numbers<[1], [0], [0], [1], [0, 0, 1, 1], [], []>} : vector<5x32xf32>, vector<32x32xf32>, vector<5x32xf32> -> vector<5x32xf32>
    %c0_33 = arith.constant 0 : index
    %c0_34 = arith.constant 0 : index
    %77 = vector.load %arg9[%c0_33, %c0_34] : memref<1x32xf32, #tpu.memory_space<vmem>>, vector<1x32xf32>
    %78 = vector.broadcast %77 : vector<1x32xf32> to vector<5x32xf32>
    %79 = arith.addf %76, %78 : vector<5x32xf32>
    %cst_35 = arith.constant 0.000000e+00 : f32
    %80 = vector.broadcast %cst_35 : f32 to vector<5x32xf32>
    %81 = arith.maximumf %79, %80 : vector<5x32xf32>
    %c0_36 = arith.constant 0 : index
    %c0_37 = arith.constant 0 : index
    %82 = vector.load %arg10[%c0_36, %c0_37] : memref<32x32xf32, #tpu.memory_space<vmem>>, vector<32x32xf32>
    %cst_38 = arith.constant dense<0.000000e+00> : vector<5x32xf32>
    %83 = tpu.matmul %81, %82, %cst_38 {dimension_numbers = #tpu.dot_dimension_numbers<[1], [0], [0], [1], [0, 0, 1, 1], [], []>} : vector<5x32xf32>, vector<32x32xf32>, vector<5x32xf32> -> vector<5x32xf32>
    %c0_39 = arith.constant 0 : index
    %c0_40 = arith.constant 0 : index
    %84 = vector.load %arg11[%c0_39, %c0_40] : memref<1x32xf32, #tpu.memory_space<vmem>>, vector<1x32xf32>
    %85 = vector.broadcast %84 : vector<1x32xf32> to vector<5x32xf32>
    %86 = arith.addf %83, %85 : vector<5x32xf32>
    %87 = arith.addf %74, %86 : vector<5x32xf32>
    %cst_41 = arith.constant dense<0.000000e+00> : vector<5xf32>
    %88 = vector.multi_reduction <add>, %87, %cst_41 [1] : vector<5x32xf32> to vector<5xf32>
    %89 = vector.shape_cast %88 : vector<5xf32> to vector<5x1xf32>
    %cst_42 = arith.constant 3.200000e+01 : f32
    %90 = vector.broadcast %cst_42 : f32 to vector<5x1xf32>
    %91 = arith.divf %89, %90 : vector<5x1xf32>
    %92 = vector.broadcast %91 : vector<5x1xf32> to vector<5x32xf32>
    %93 = arith.subf %87, %92 : vector<5x32xf32>
    %94 = arith.mulf %93, %93 : vector<5x32xf32>
    %cst_43 = arith.constant dense<0.000000e+00> : vector<5xf32>
    %95 = vector.multi_reduction <add>, %94, %cst_43 [1] : vector<5x32xf32> to vector<5xf32>
    %96 = vector.shape_cast %95 : vector<5xf32> to vector<5x1xf32>
    %cst_44 = arith.constant 3.200000e+01 : f32
    %97 = vector.broadcast %cst_44 : f32 to vector<5x1xf32>
    %98 = arith.divf %96, %97 : vector<5x1xf32>
    %99 = vector.broadcast %91 : vector<5x1xf32> to vector<5x32xf32>
    %100 = arith.subf %87, %99 : vector<5x32xf32>
    %cst_45 = arith.constant 9.99999996E-13 : f32
    %101 = vector.broadcast %cst_45 : f32 to vector<5x1xf32>
    %102 = arith.addf %98, %101 : vector<5x1xf32>
    %103 = math.rsqrt %102 : vector<5x1xf32>
    %104 = vector.broadcast %103 : vector<5x1xf32> to vector<5x32xf32>
    %105 = arith.mulf %100, %104 : vector<5x32xf32>
    %c0_46 = arith.constant 0 : index
    %c0_47 = arith.constant 0 : index
    %106 = vector.load %arg12[%c0_46, %c0_47] : memref<1x32xf32, #tpu.memory_space<vmem>>, vector<1x32xf32>
    %107 = vector.broadcast %106 : vector<1x32xf32> to vector<5x32xf32>
    %108 = arith.mulf %105, %107 : vector<5x32xf32>
    %c0_48 = arith.constant 0 : index
    %c0_49 = arith.constant 0 : index
    %109 = vector.load %arg13[%c0_48, %c0_49] : memref<1x32xf32, #tpu.memory_space<vmem>>, vector<1x32xf32>
    %110 = vector.broadcast %109 : vector<1x32xf32> to vector<5x32xf32>
    %111 = arith.addf %108, %110 : vector<5x32xf32>
    %c0_50 = arith.constant 0 : index
    %c0_51 = arith.constant 0 : index
    %c0_52 = arith.constant 0 : index
    %112 = vector.load %arg14[%c0_50, %c0_51, %c0_52] : memref<1x5x32xf32, #tpu.memory_space<vmem>>, vector<1x5x32xf32>
    %113 = vector.shape_cast %112 : vector<1x5x32xf32> to vector<5x32xf32>
    %114 = vector.shape_cast %111 : vector<5x32xf32> to vector<1x5x32xf32>
    tpu.vector_store %arg14[%c0_50, %c0_51, %c0_52], %114 {strides = array<i32>} : memref<1x5x32xf32, #tpu.memory_space<vmem>>, vector<1x5x32xf32>,
    return
  }
  func.func @transform_0(%arg0: i32) -> (i32, i32, i32) {
    %c0_i32 = arith.constant 0 : i32
    %c0_i32_0 = arith.constant 0 : i32
    %c0_i32_1 = arith.constant 0 : i32
    return %arg0, %c0_i32, %c0_i32_0 : i32, i32, i32
  }
  func.func @transform_1(%arg0: i32) -> (i32, i32) {
    %c0_i32 = arith.constant 0 : i32
    %c0_i32_0 = arith.constant 0 : i32
    %c0_i32_1 = arith.constant 0 : i32
    return %c0_i32, %c0_i32_0 : i32, i32
  }
  func.func @transform_2(%arg0: i32) -> (i32, i32) {
    %c0_i32 = arith.constant 0 : i32
    %c0_i32_0 = arith.constant 0 : i32
    %c0_i32_1 = arith.constant 0 : i32
    return %c0_i32, %c0_i32_0 : i32, i32
  }
  func.func @transform_3(%arg0: i32) -> (i32, i32) {
    %c0_i32 = arith.constant 0 : i32
    %c0_i32_0 = arith.constant 0 : i32
    %c0_i32_1 = arith.constant 0 : i32
    return %c0_i32, %c0_i32_0 : i32, i32
  }
  func.func @transform_4(%arg0: i32) -> (i32, i32) {
    %c0_i32 = arith.constant 0 : i32
    %c0_i32_0 = arith.constant 0 : i32
    %c0_i32_1 = arith.constant 0 : i32
    return %c0_i32, %c0_i32_0 : i32, i32
  }
  func.func @transform_5(%arg0: i32) -> (i32, i32) {
    %c0_i32 = arith.constant 0 : i32
    %c0_i32_0 = arith.constant 0 : i32
    %c0_i32_1 = arith.constant 0 : i32
    return %c0_i32, %c0_i32_0 : i32, i32
  }
  func.func @transform_6(%arg0: i32) -> (i32, i32) {
    %c0_i32 = arith.constant 0 : i32
    %c0_i32_0 = arith.constant 0 : i32
    %c0_i32_1 = arith.constant 0 : i32
    return %c0_i32, %c0_i32_0 : i32, i32
  }
  func.func @transform_7(%arg0: i32) -> (i32, i32) {
    %c0_i32 = arith.constant 0 : i32
    %c0_i32_0 = arith.constant 0 : i32
    %c0_i32_1 = arith.constant 0 : i32
    return %c0_i32, %c0_i32_0 : i32, i32
  }
  func.func @transform_8(%arg0: i32) -> (i32, i32) {
    %c0_i32 = arith.constant 0 : i32
    %c0_i32_0 = arith.constant 0 : i32
    %c0_i32_1 = arith.constant 0 : i32
    return %c0_i32, %c0_i32_0 : i32, i32
  }
  func.func @transform_9(%arg0: i32) -> (i32, i32) {
    %c0_i32 = arith.constant 0 : i32
    %c0_i32_0 = arith.constant 0 : i32
    %c0_i32_1 = arith.constant 0 : i32
    return %c0_i32, %c0_i32_0 : i32, i32
  }
  func.func @transform_10(%arg0: i32) -> (i32, i32) {
    %c0_i32 = arith.constant 0 : i32
    %c0_i32_0 = arith.constant 0 : i32
    %c0_i32_1 = arith.constant 0 : i32
    return %c0_i32, %c0_i32_0 : i32, i32
  }
  func.func @transform_11(%arg0: i32) -> (i32, i32) {
    %c0_i32 = arith.constant 0 : i32
    %c0_i32_0 = arith.constant 0 : i32
    %c0_i32_1 = arith.constant 0 : i32
    return %c0_i32, %c0_i32_0 : i32, i32
  }
  func.func @transform_12(%arg0: i32) -> (i32, i32) {
    %c0_i32 = arith.constant 0 : i32
    %c0_i32_0 = arith.constant 0 : i32
    %c0_i32_1 = arith.constant 0 : i32
    return %c0_i32, %c0_i32_0 : i32, i32
  }
  func.func @transform_13(%arg0: i32) -> (i32, i32, i32) {
    %c0_i32 = arith.constant 0 : i32
    %c0_i32_0 = arith.constant 0 : i32
    %c0_i32_1 = arith.constant 0 : i32
    return %arg0, %c0_i32, %c0_i32_0 : i32, i32, i32
  }
}

module attributes {stable_mosaic.version = 11 : i64} {
  func.func @encoder2_kernel(%arg0: i32, %arg1: memref<1x27x16xf32, #tpu.memory_space<vmem>>, %arg2: memref<16x48xf32, #tpu.memory_space<vmem>>, %arg3: memref<1x48xf32, #tpu.memory_space<vmem>>, %arg4: memref<16x16xf32, #tpu.memory_space<vmem>>, %arg5: memref<1x16xf32, #tpu.memory_space<vmem>>, %arg6: memref<1x16xf32, #tpu.memory_space<vmem>>, %arg7: memref<1x16xf32, #tpu.memory_space<vmem>>, %arg8: memref<16x16xf32, #tpu.memory_space<vmem>>, %arg9: memref<1x16xf32, #tpu.memory_space<vmem>>, %arg10: memref<16x16xf32, #tpu.memory_space<vmem>>, %arg11: memref<1x16xf32, #tpu.memory_space<vmem>>, %arg12: memref<1x16xf32, #tpu.memory_space<vmem>>, %arg13: memref<1x16xf32, #tpu.memory_space<vmem>>, %arg14: memref<16x48xf32, #tpu.memory_space<vmem>>, %arg15: memref<1x48xf32, #tpu.memory_space<vmem>>, %arg16: memref<16x16xf32, #tpu.memory_space<vmem>>, %arg17: memref<1x16xf32, #tpu.memory_space<vmem>>, %arg18: memref<1x16xf32, #tpu.memory_space<vmem>>, %arg19: memref<1x16xf32, #tpu.memory_space<vmem>>, %arg20: memref<16x16xf32, #tpu.memory_space<vmem>>, %arg21: memref<1x16xf32, #tpu.memory_space<vmem>>, %arg22: memref<16x16xf32, #tpu.memory_space<vmem>>, %arg23: memref<1x16xf32, #tpu.memory_space<vmem>>, %arg24: memref<1x16xf32, #tpu.memory_space<vmem>>, %arg25: memref<1x16xf32, #tpu.memory_space<vmem>>, %arg26: memref<1x27x16xf32, #tpu.memory_space<vmem>>, %arg27: memref<1x2x27xf32, #tpu.memory_space<vmem>>) attributes {dimension_semantics = [#tpu.dimension_semantics<parallel>], iteration_bounds = array<i64: 2>, scalar_prefetch = 0 : i64, scratch_operands = 0 : i64, tpu.core_type = #tpu.core_type<tc>, window_params = [{transform_indices = @transform_0, window_bounds = array<i64: 1, 27, 16>}, {pipeline_mode = #tpu.pipeline_mode<synchronous>, transform_indices = @transform_1, window_bounds = array<i64: 16, 48>}, {pipeline_mode = #tpu.pipeline_mode<synchronous>, transform_indices = @transform_2, window_bounds = array<i64: 1, 48>}, {pipeline_mode = #tpu.pipeline_mode<synchronous>, transform_indices = @transform_3, window_bounds = array<i64: 16, 16>}, {pipeline_mode = #tpu.pipeline_mode<synchronous>, transform_indices = @transform_4, window_bounds = array<i64: 1, 16>}, {pipeline_mode = #tpu.pipeline_mode<synchronous>, transform_indices = @transform_5, window_bounds = array<i64: 1, 16>}, {pipeline_mode = #tpu.pipeline_mode<synchronous>, transform_indices = @transform_6, window_bounds = array<i64: 1, 16>}, {pipeline_mode = #tpu.pipeline_mode<synchronous>, transform_indices = @transform_7, window_bounds = array<i64: 16, 16>}, {pipeline_mode = #tpu.pipeline_mode<synchronous>, transform_indices = @transform_8, window_bounds = array<i64: 1, 16>}, {pipeline_mode = #tpu.pipeline_mode<synchronous>, transform_indices = @transform_9, window_bounds = array<i64: 16, 16>}, {pipeline_mode = #tpu.pipeline_mode<synchronous>, transform_indices = @transform_10, window_bounds = array<i64: 1, 16>}, {pipeline_mode = #tpu.pipeline_mode<synchronous>, transform_indices = @transform_11, window_bounds = array<i64: 1, 16>}, {pipeline_mode = #tpu.pipeline_mode<synchronous>, transform_indices = @transform_12, window_bounds = array<i64: 1, 16>}, {pipeline_mode = #tpu.pipeline_mode<synchronous>, transform_indices = @transform_13, window_bounds = array<i64: 16, 48>}, {pipeline_mode = #tpu.pipeline_mode<synchronous>, transform_indices = @transform_14, window_bounds = array<i64: 1, 48>}, {pipeline_mode = #tpu.pipeline_mode<synchronous>, transform_indices = @transform_15, window_bounds = array<i64: 16, 16>}, {pipeline_mode = #tpu.pipeline_mode<synchronous>, transform_indices = @transform_16, window_bounds = array<i64: 1, 16>}, {pipeline_mode = #tpu.pipeline_mode<synchronous>, transform_indices = @transform_17, window_bounds = array<i64: 1, 16>}, {pipeline_mode = #tpu.pipeline_mode<synchronous>, transform_indices = @transform_18, window_bounds = array<i64: 1, 16>}, {pipeline_mode = #tpu.pipeline_mode<synchronous>, transform_indices = @transform_19, window_bounds = array<i64: 16, 16>}, {pipeline_mode = #tpu.pipeline_mode<synchronous>, transform_indices = @transform_20, window_bounds = array<i64: 1, 16>}, {pipeline_mode = #tpu.pipeline_mode<synchronous>, transform_indices = @transform_21, window_bounds = array<i64: 16, 16>}, {pipeline_mode = #tpu.pipeline_mode<synchronous>, transform_indices = @transform_22, window_bounds = array<i64: 1, 16>}, {pipeline_mode = #tpu.pipeline_mode<synchronous>, transform_indices = @transform_23, window_bounds = array<i64: 1, 16>}, {pipeline_mode = #tpu.pipeline_mode<synchronous>, transform_indices = @transform_24, window_bounds = array<i64: 1, 16>}, {transform_indices = @transform_25, window_bounds = array<i64: 1, 27, 16>}, {transform_indices = @transform_26, window_bounds = array<i64: 1, 2, 27>}]} {
    %c0 = arith.constant 0 : index
    %c0_0 = arith.constant 0 : index
    %c0_1 = arith.constant 0 : index
    %0 = vector.load %arg1[%c0, %c0_0, %c0_1] : memref<1x27x16xf32, #tpu.memory_space<vmem>>, vector<1x27x16xf32>
    %1 = vector.shape_cast %0 : vector<1x27x16xf32> to vector<27x16xf32>
    %c0_2 = arith.constant 0 : index
    %c0_3 = arith.constant 0 : index
    %2 = vector.load %arg2[%c0_2, %c0_3] : memref<16x48xf32, #tpu.memory_space<vmem>>, vector<16x48xf32>
    %cst = arith.constant dense<0.000000e+00> : vector<27x48xf32>
    %3 = tpu.matmul %1, %2, %cst {dimension_numbers = #tpu.dot_dimension_numbers<[1], [0], [0], [1], [0, 0, 1, 1], [], []>} : vector<27x16xf32>, vector<16x48xf32>, vector<27x48xf32> -> vector<27x48xf32>
    %c0_4 = arith.constant 0 : index
    %c0_5 = arith.constant 0 : index
    %4 = vector.load %arg3[%c0_4, %c0_5] : memref<1x48xf32, #tpu.memory_space<vmem>>, vector<1x48xf32>
    %5 = vector.broadcast %4 : vector<1x48xf32> to vector<27x48xf32>
    %6 = arith.addf %3, %5 : vector<27x48xf32>
    %7 = vector.extract_strided_slice %6 {offsets = [0, 0], sizes = [27, 16], strides = [1, 1]} : vector<27x48xf32> to vector<27x16xf32>
    %8 = vector.extract_strided_slice %6 {offsets = [0, 16], sizes = [27, 16], strides = [1, 1]} : vector<27x48xf32> to vector<27x16xf32>
    %9 = vector.extract_strided_slice %6 {offsets = [0, 32], sizes = [27, 16], strides = [1, 1]} : vector<27x48xf32> to vector<27x16xf32>
    %10 = vector.extract_strided_slice %7 {offsets = [0, 0], sizes = [27, 8], strides = [1, 1]} : vector<27x16xf32> to vector<27x8xf32>
    %11 = vector.extract_strided_slice %8 {offsets = [0, 0], sizes = [27, 8], strides = [1, 1]} : vector<27x16xf32> to vector<27x8xf32>
    %12 = vector.extract_strided_slice %9 {offsets = [0, 0], sizes = [27, 8], strides = [1, 1]} : vector<27x16xf32> to vector<27x8xf32>
    %cst_6 = arith.constant dense<0.000000e+00> : vector<27x27xf32>
    %13 = tpu.matmul %10, %11, %cst_6 {dimension_numbers = #tpu.dot_dimension_numbers<[1], [1], [0], [0], [0, 0, 1, 0], [], []>} : vector<27x8xf32>, vector<27x8xf32>, vector<27x27xf32> -> vector<27x27xf32>
    %cst_7 = arith.constant 0.353553385 : f32
    %14 = vector.broadcast %cst_7 : f32 to vector<27x27xf32>
    %15 = arith.mulf %13, %14 : vector<27x27xf32>
    %cst_8 = arith.constant dense<0xFF800000> : vector<27xf32>
    %16 = vector.multi_reduction <maximumf>, %15, %cst_8 [1] : vector<27x27xf32> to vector<27xf32>
    %17 = vector.shape_cast %16 : vector<27xf32> to vector<27x1xf32>
    %18 = vector.broadcast %17 : vector<27x1xf32> to vector<27x27xf32>
    %19 = arith.subf %15, %18 : vector<27x27xf32>
    %20 = math.exp %19 : vector<27x27xf32>
    %cst_9 = arith.constant dense<0.000000e+00> : vector<27xf32>
    %21 = vector.multi_reduction <add>, %20, %cst_9 [1] : vector<27x27xf32> to vector<27xf32>
    %22 = vector.shape_cast %21 : vector<27xf32> to vector<27x1xf32>
    %23 = tpu.reciprocal %22 {approx = true} : vector<27x1xf32> -> vector<27x1xf32>
    %24 = vector.broadcast %23 : vector<27x1xf32> to vector<27x27xf32>
    %25 = arith.mulf %20, %24 : vector<27x27xf32>
    %26 = vector.extract_strided_slice %25 {offsets = [0, 0], sizes = [1, 27], strides = [1, 1]} : vector<27x27xf32> to vector<1x27xf32>
    %cst_10 = arith.constant dense<0.000000e+00> : vector<27x8xf32>
    %27 = tpu.matmul %25, %12, %cst_10 {dimension_numbers = #tpu.dot_dimension_numbers<[1], [0], [0], [1], [0, 0, 1, 1], [], []>} : vector<27x27xf32>, vector<27x8xf32>, vector<27x8xf32> -> vector<27x8xf32>
    %28 = vector.extract_strided_slice %7 {offsets = [0, 8], sizes = [27, 8], strides = [1, 1]} : vector<27x16xf32> to vector<27x8xf32>
    %29 = vector.extract_strided_slice %8 {offsets = [0, 8], sizes = [27, 8], strides = [1, 1]} : vector<27x16xf32> to vector<27x8xf32>
    %30 = vector.extract_strided_slice %9 {offsets = [0, 8], sizes = [27, 8], strides = [1, 1]} : vector<27x16xf32> to vector<27x8xf32>
    %cst_11 = arith.constant dense<0.000000e+00> : vector<27x27xf32>
    %31 = tpu.matmul %28, %29, %cst_11 {dimension_numbers = #tpu.dot_dimension_numbers<[1], [1], [0], [0], [0, 0, 1, 0], [], []>} : vector<27x8xf32>, vector<27x8xf32>, vector<27x27xf32> -> vector<27x27xf32>
    %cst_12 = arith.constant 0.353553385 : f32
    %32 = vector.broadcast %cst_12 : f32 to vector<27x27xf32>
    %33 = arith.mulf %31, %32 : vector<27x27xf32>
    %cst_13 = arith.constant dense<0xFF800000> : vector<27xf32>
    %34 = vector.multi_reduction <maximumf>, %33, %cst_13 [1] : vector<27x27xf32> to vector<27xf32>
    %35 = vector.shape_cast %34 : vector<27xf32> to vector<27x1xf32>
    %36 = vector.broadcast %35 : vector<27x1xf32> to vector<27x27xf32>
    %37 = arith.subf %33, %36 : vector<27x27xf32>
    %38 = math.exp %37 : vector<27x27xf32>
    %cst_14 = arith.constant dense<0.000000e+00> : vector<27xf32>
    %39 = vector.multi_reduction <add>, %38, %cst_14 [1] : vector<27x27xf32> to vector<27xf32>
    %40 = vector.shape_cast %39 : vector<27xf32> to vector<27x1xf32>
    %41 = tpu.reciprocal %40 {approx = true} : vector<27x1xf32> -> vector<27x1xf32>
    %42 = vector.broadcast %41 : vector<27x1xf32> to vector<27x27xf32>
    %43 = arith.mulf %38, %42 : vector<27x27xf32>
    %44 = vector.extract_strided_slice %43 {offsets = [0, 0], sizes = [1, 27], strides = [1, 1]} : vector<27x27xf32> to vector<1x27xf32>
    %cst_15 = arith.constant dense<0.000000e+00> : vector<27x8xf32>
    %45 = tpu.matmul %43, %30, %cst_15 {dimension_numbers = #tpu.dot_dimension_numbers<[1], [0], [0], [1], [0, 0, 1, 1], [], []>} : vector<27x27xf32>, vector<27x8xf32>, vector<27x8xf32> -> vector<27x8xf32>
    %46 = tpu.concatenate %27, %45 in 1 : vector<27x8xf32>, vector<27x8xf32> -> vector<27x16xf32>
    %c0_16 = arith.constant 0 : index
    %c0_17 = arith.constant 0 : index
    %47 = vector.load %arg4[%c0_16, %c0_17] : memref<16x16xf32, #tpu.memory_space<vmem>>, vector<16x16xf32>
    %cst_18 = arith.constant dense<0.000000e+00> : vector<27x16xf32>
    %48 = tpu.matmul %46, %47, %cst_18 {dimension_numbers = #tpu.dot_dimension_numbers<[1], [0], [0], [1], [0, 0, 1, 1], [], []>} : vector<27x16xf32>, vector<16x16xf32>, vector<27x16xf32> -> vector<27x16xf32>
    %c0_19 = arith.constant 0 : index
    %c0_20 = arith.constant 0 : index
    %49 = vector.load %arg5[%c0_19, %c0_20] : memref<1x16xf32, #tpu.memory_space<vmem>>, vector<1x16xf32>
    %50 = vector.broadcast %49 : vector<1x16xf32> to vector<27x16xf32>
    %51 = arith.addf %48, %50 : vector<27x16xf32>
    %52 = arith.addf %1, %51 : vector<27x16xf32>
    %cst_21 = arith.constant dense<0.000000e+00> : vector<27xf32>
    %53 = vector.multi_reduction <add>, %52, %cst_21 [1] : vector<27x16xf32> to vector<27xf32>
    %54 = vector.shape_cast %53 : vector<27xf32> to vector<27x1xf32>
    %cst_22 = arith.constant 1.600000e+01 : f32
    %55 = vector.broadcast %cst_22 : f32 to vector<27x1xf32>
    %56 = arith.divf %54, %55 : vector<27x1xf32>
    %57 = vector.broadcast %56 : vector<27x1xf32> to vector<27x16xf32>
    %58 = arith.subf %52, %57 : vector<27x16xf32>
    %59 = arith.mulf %58, %58 : vector<27x16xf32>
    %cst_23 = arith.constant dense<0.000000e+00> : vector<27xf32>
    %60 = vector.multi_reduction <add>, %59, %cst_23 [1] : vector<27x16xf32> to vector<27xf32>
    %61 = vector.shape_cast %60 : vector<27xf32> to vector<27x1xf32>
    %cst_24 = arith.constant 1.600000e+01 : f32
    %62 = vector.broadcast %cst_24 : f32 to vector<27x1xf32>
    %63 = arith.divf %61, %62 : vector<27x1xf32>
    %64 = vector.broadcast %56 : vector<27x1xf32> to vector<27x16xf32>
    %65 = arith.subf %52, %64 : vector<27x16xf32>
    %cst_25 = arith.constant 9.99999996E-13 : f32
    %66 = vector.broadcast %cst_25 : f32 to vector<27x1xf32>
    %67 = arith.addf %63, %66 : vector<27x1xf32>
    %68 = math.rsqrt %67 : vector<27x1xf32>
    %69 = vector.broadcast %68 : vector<27x1xf32> to vector<27x16xf32>
    %70 = arith.mulf %65, %69 : vector<27x16xf32>
    %c0_26 = arith.constant 0 : index
    %c0_27 = arith.constant 0 : index
    %71 = vector.load %arg6[%c0_26, %c0_27] : memref<1x16xf32, #tpu.memory_space<vmem>>, vector<1x16xf32>
    %72 = vector.broadcast %71 : vector<1x16xf32> to vector<27x16xf32>
    %73 = arith.mulf %70, %72 : vector<27x16xf32>
    %c0_28 = arith.constant 0 : index
    %c0_29 = arith.constant 0 : index
    %74 = vector.load %arg7[%c0_28, %c0_29] : memref<1x16xf32, #tpu.memory_space<vmem>>, vector<1x16xf32>
    %75 = vector.broadcast %74 : vector<1x16xf32> to vector<27x16xf32>
    %76 = arith.addf %73, %75 : vector<27x16xf32>
    %c0_30 = arith.constant 0 : index
    %c0_31 = arith.constant 0 : index
    %77 = vector.load %arg8[%c0_30, %c0_31] : memref<16x16xf32, #tpu.memory_space<vmem>>, vector<16x16xf32>
    %cst_32 = arith.constant dense<0.000000e+00> : vector<27x16xf32>
    %78 = tpu.matmul %76, %77, %cst_32 {dimension_numbers = #tpu.dot_dimension_numbers<[1], [0], [0], [1], [0, 0, 1, 1], [], []>} : vector<27x16xf32>, vector<16x16xf32>, vector<27x16xf32> -> vector<27x16xf32>
    %c0_33 = arith.constant 0 : index
    %c0_34 = arith.constant 0 : index
    %79 = vector.load %arg9[%c0_33, %c0_34] : memref<1x16xf32, #tpu.memory_space<vmem>>, vector<1x16xf32>
    %80 = vector.broadcast %79 : vector<1x16xf32> to vector<27x16xf32>
    %81 = arith.addf %78, %80 : vector<27x16xf32>
    %cst_35 = arith.constant 0.000000e+00 : f32
    %82 = vector.broadcast %cst_35 : f32 to vector<27x16xf32>
    %83 = arith.maximumf %81, %82 : vector<27x16xf32>
    %c0_36 = arith.constant 0 : index
    %c0_37 = arith.constant 0 : index
    %84 = vector.load %arg10[%c0_36, %c0_37] : memref<16x16xf32, #tpu.memory_space<vmem>>, vector<16x16xf32>
    %cst_38 = arith.constant dense<0.000000e+00> : vector<27x16xf32>
    %85 = tpu.matmul %83, %84, %cst_38 {dimension_numbers = #tpu.dot_dimension_numbers<[1], [0], [0], [1], [0, 0, 1, 1], [], []>} : vector<27x16xf32>, vector<16x16xf32>, vector<27x16xf32> -> vector<27x16xf32>
    %c0_39 = arith.constant 0 : index
    %c0_40 = arith.constant 0 : index
    %86 = vector.load %arg11[%c0_39, %c0_40] : memref<1x16xf32, #tpu.memory_space<vmem>>, vector<1x16xf32>
    %87 = vector.broadcast %86 : vector<1x16xf32> to vector<27x16xf32>
    %88 = arith.addf %85, %87 : vector<27x16xf32>
    %89 = arith.addf %76, %88 : vector<27x16xf32>
    %cst_41 = arith.constant dense<0.000000e+00> : vector<27xf32>
    %90 = vector.multi_reduction <add>, %89, %cst_41 [1] : vector<27x16xf32> to vector<27xf32>
    %91 = vector.shape_cast %90 : vector<27xf32> to vector<27x1xf32>
    %cst_42 = arith.constant 1.600000e+01 : f32
    %92 = vector.broadcast %cst_42 : f32 to vector<27x1xf32>
    %93 = arith.divf %91, %92 : vector<27x1xf32>
    %94 = vector.broadcast %93 : vector<27x1xf32> to vector<27x16xf32>
    %95 = arith.subf %89, %94 : vector<27x16xf32>
    %96 = arith.mulf %95, %95 : vector<27x16xf32>
    %cst_43 = arith.constant dense<0.000000e+00> : vector<27xf32>
    %97 = vector.multi_reduction <add>, %96, %cst_43 [1] : vector<27x16xf32> to vector<27xf32>
    %98 = vector.shape_cast %97 : vector<27xf32> to vector<27x1xf32>
    %cst_44 = arith.constant 1.600000e+01 : f32
    %99 = vector.broadcast %cst_44 : f32 to vector<27x1xf32>
    %100 = arith.divf %98, %99 : vector<27x1xf32>
    %101 = vector.broadcast %93 : vector<27x1xf32> to vector<27x16xf32>
    %102 = arith.subf %89, %101 : vector<27x16xf32>
    %cst_45 = arith.constant 9.99999996E-13 : f32
    %103 = vector.broadcast %cst_45 : f32 to vector<27x1xf32>
    %104 = arith.addf %100, %103 : vector<27x1xf32>
    %105 = math.rsqrt %104 : vector<27x1xf32>
    %106 = vector.broadcast %105 : vector<27x1xf32> to vector<27x16xf32>
    %107 = arith.mulf %102, %106 : vector<27x16xf32>
    %c0_46 = arith.constant 0 : index
    %c0_47 = arith.constant 0 : index
    %108 = vector.load %arg12[%c0_46, %c0_47] : memref<1x16xf32, #tpu.memory_space<vmem>>, vector<1x16xf32>
    %109 = vector.broadcast %108 : vector<1x16xf32> to vector<27x16xf32>
    %110 = arith.mulf %107, %109 : vector<27x16xf32>
    %c0_48 = arith.constant 0 : index
    %c0_49 = arith.constant 0 : index
    %111 = vector.load %arg13[%c0_48, %c0_49] : memref<1x16xf32, #tpu.memory_space<vmem>>, vector<1x16xf32>
    %112 = vector.broadcast %111 : vector<1x16xf32> to vector<27x16xf32>
    %113 = arith.addf %110, %112 : vector<27x16xf32>
    %114 = tpu.concatenate %26, %44 in 0 : vector<1x27xf32>, vector<1x27xf32> -> vector<2x27xf32>
    %c0_50 = arith.constant 0 : index
    %c0_51 = arith.constant 0 : index
    %115 = vector.load %arg14[%c0_50, %c0_51] : memref<16x48xf32, #tpu.memory_space<vmem>>, vector<16x48xf32>
    %cst_52 = arith.constant dense<0.000000e+00> : vector<27x48xf32>
    %116 = tpu.matmul %113, %115, %cst_52 {dimension_numbers = #tpu.dot_dimension_numbers<[1], [0], [0], [1], [0, 0, 1, 1], [], []>} : vector<27x16xf32>, vector<16x48xf32>, vector<27x48xf32> -> vector<27x48xf32>
    %c0_53 = arith.constant 0 : index
    %c0_54 = arith.constant 0 : index
    %117 = vector.load %arg15[%c0_53, %c0_54] : memref<1x48xf32, #tpu.memory_space<vmem>>, vector<1x48xf32>
    %118 = vector.broadcast %117 : vector<1x48xf32> to vector<27x48xf32>
    %119 = arith.addf %116, %118 : vector<27x48xf32>
    %120 = vector.extract_strided_slice %119 {offsets = [0, 0], sizes = [27, 16], strides = [1, 1]} : vector<27x48xf32> to vector<27x16xf32>
    %121 = vector.extract_strided_slice %119 {offsets = [0, 16], sizes = [27, 16], strides = [1, 1]} : vector<27x48xf32> to vector<27x16xf32>
    %122 = vector.extract_strided_slice %119 {offsets = [0, 32], sizes = [27, 16], strides = [1, 1]} : vector<27x48xf32> to vector<27x16xf32>
    %123 = vector.extract_strided_slice %120 {offsets = [0, 0], sizes = [27, 8], strides = [1, 1]} : vector<27x16xf32> to vector<27x8xf32>
    %124 = vector.extract_strided_slice %121 {offsets = [0, 0], sizes = [27, 8], strides = [1, 1]} : vector<27x16xf32> to vector<27x8xf32>
    %125 = vector.extract_strided_slice %122 {offsets = [0, 0], sizes = [27, 8], strides = [1, 1]} : vector<27x16xf32> to vector<27x8xf32>
    %cst_55 = arith.constant dense<0.000000e+00> : vector<27x27xf32>
    %126 = tpu.matmul %123, %124, %cst_55 {dimension_numbers = #tpu.dot_dimension_numbers<[1], [1], [0], [0], [0, 0, 1, 0], [], []>} : vector<27x8xf32>, vector<27x8xf32>, vector<27x27xf32> -> vector<27x27xf32>
    %cst_56 = arith.constant 0.353553385 : f32
    %127 = vector.broadcast %cst_56 : f32 to vector<27x27xf32>
    %128 = arith.mulf %126, %127 : vector<27x27xf32>
    %cst_57 = arith.constant dense<0xFF800000> : vector<27xf32>
    %129 = vector.multi_reduction <maximumf>, %128, %cst_57 [1] : vector<27x27xf32> to vector<27xf32>
    %130 = vector.shape_cast %129 : vector<27xf32> to vector<27x1xf32>
    %131 = vector.broadcast %130 : vector<27x1xf32> to vector<27x27xf32>
    %132 = arith.subf %128, %131 : vector<27x27xf32>
    %133 = math.exp %132 : vector<27x27xf32>
    %cst_58 = arith.constant dense<0.000000e+00> : vector<27xf32>
    %134 = vector.multi_reduction <add>, %133, %cst_58 [1] : vector<27x27xf32> to vector<27xf32>
    %135 = vector.shape_cast %134 : vector<27xf32> to vector<27x1xf32>
    %136 = tpu.reciprocal %135 {approx = true} : vector<27x1xf32> -> vector<27x1xf32>
    %137 = vector.broadcast %136 : vector<27x1xf32> to vector<27x27xf32>
    %138 = arith.mulf %133, %137 : vector<27x27xf32>
    %139 = vector.extract_strided_slice %138 {offsets = [0, 0], sizes = [1, 27], strides = [1, 1]} : vector<27x27xf32> to vector<1x27xf32>
    %cst_59 = arith.constant dense<0.000000e+00> : vector<27x8xf32>
    %140 = tpu.matmul %138, %125, %cst_59 {dimension_numbers = #tpu.dot_dimension_numbers<[1], [0], [0], [1], [0, 0, 1, 1], [], []>} : vector<27x27xf32>, vector<27x8xf32>, vector<27x8xf32> -> vector<27x8xf32>
    %141 = vector.extract_strided_slice %120 {offsets = [0, 8], sizes = [27, 8], strides = [1, 1]} : vector<27x16xf32> to vector<27x8xf32>
    %142 = vector.extract_strided_slice %121 {offsets = [0, 8], sizes = [27, 8], strides = [1, 1]} : vector<27x16xf32> to vector<27x8xf32>
    %143 = vector.extract_strided_slice %122 {offsets = [0, 8], sizes = [27, 8], strides = [1, 1]} : vector<27x16xf32> to vector<27x8xf32>
    %cst_60 = arith.constant dense<0.000000e+00> : vector<27x27xf32>
    %144 = tpu.matmul %141, %142, %cst_60 {dimension_numbers = #tpu.dot_dimension_numbers<[1], [1], [0], [0], [0, 0, 1, 0], [], []>} : vector<27x8xf32>, vector<27x8xf32>, vector<27x27xf32> -> vector<27x27xf32>
    %cst_61 = arith.constant 0.353553385 : f32
    %145 = vector.broadcast %cst_61 : f32 to vector<27x27xf32>
    %146 = arith.mulf %144, %145 : vector<27x27xf32>
    %cst_62 = arith.constant dense<0xFF800000> : vector<27xf32>
    %147 = vector.multi_reduction <maximumf>, %146, %cst_62 [1] : vector<27x27xf32> to vector<27xf32>
    %148 = vector.shape_cast %147 : vector<27xf32> to vector<27x1xf32>
    %149 = vector.broadcast %148 : vector<27x1xf32> to vector<27x27xf32>
    %150 = arith.subf %146, %149 : vector<27x27xf32>
    %151 = math.exp %150 : vector<27x27xf32>
    %cst_63 = arith.constant dense<0.000000e+00> : vector<27xf32>
    %152 = vector.multi_reduction <add>, %151, %cst_63 [1] : vector<27x27xf32> to vector<27xf32>
    %153 = vector.shape_cast %152 : vector<27xf32> to vector<27x1xf32>
    %154 = tpu.reciprocal %153 {approx = true} : vector<27x1xf32> -> vector<27x1xf32>
    %155 = vector.broadcast %154 : vector<27x1xf32> to vector<27x27xf32>
    %156 = arith.mulf %151, %155 : vector<27x27xf32>
    %157 = vector.extract_strided_slice %156 {offsets = [0, 0], sizes = [1, 27], strides = [1, 1]} : vector<27x27xf32> to vector<1x27xf32>
    %cst_64 = arith.constant dense<0.000000e+00> : vector<27x8xf32>
    %158 = tpu.matmul %156, %143, %cst_64 {dimension_numbers = #tpu.dot_dimension_numbers<[1], [0], [0], [1], [0, 0, 1, 1], [], []>} : vector<27x27xf32>, vector<27x8xf32>, vector<27x8xf32> -> vector<27x8xf32>
    %159 = tpu.concatenate %140, %158 in 1 : vector<27x8xf32>, vector<27x8xf32> -> vector<27x16xf32>
    %c0_65 = arith.constant 0 : index
    %c0_66 = arith.constant 0 : index
    %160 = vector.load %arg16[%c0_65, %c0_66] : memref<16x16xf32, #tpu.memory_space<vmem>>, vector<16x16xf32>
    %cst_67 = arith.constant dense<0.000000e+00> : vector<27x16xf32>
    %161 = tpu.matmul %159, %160, %cst_67 {dimension_numbers = #tpu.dot_dimension_numbers<[1], [0], [0], [1], [0, 0, 1, 1], [], []>} : vector<27x16xf32>, vector<16x16xf32>, vector<27x16xf32> -> vector<27x16xf32>
    %c0_68 = arith.constant 0 : index
    %c0_69 = arith.constant 0 : index
    %162 = vector.load %arg17[%c0_68, %c0_69] : memref<1x16xf32, #tpu.memory_space<vmem>>, vector<1x16xf32>
    %163 = vector.broadcast %162 : vector<1x16xf32> to vector<27x16xf32>
    %164 = arith.addf %161, %163 : vector<27x16xf32>
    %165 = arith.addf %113, %164 : vector<27x16xf32>
    %cst_70 = arith.constant dense<0.000000e+00> : vector<27xf32>
    %166 = vector.multi_reduction <add>, %165, %cst_70 [1] : vector<27x16xf32> to vector<27xf32>
    %167 = vector.shape_cast %166 : vector<27xf32> to vector<27x1xf32>
    %cst_71 = arith.constant 1.600000e+01 : f32
    %168 = vector.broadcast %cst_71 : f32 to vector<27x1xf32>
    %169 = arith.divf %167, %168 : vector<27x1xf32>
    %170 = vector.broadcast %169 : vector<27x1xf32> to vector<27x16xf32>
    %171 = arith.subf %165, %170 : vector<27x16xf32>
    %172 = arith.mulf %171, %171 : vector<27x16xf32>
    %cst_72 = arith.constant dense<0.000000e+00> : vector<27xf32>
    %173 = vector.multi_reduction <add>, %172, %cst_72 [1] : vector<27x16xf32> to vector<27xf32>
    %174 = vector.shape_cast %173 : vector<27xf32> to vector<27x1xf32>
    %cst_73 = arith.constant 1.600000e+01 : f32
    %175 = vector.broadcast %cst_73 : f32 to vector<27x1xf32>
    %176 = arith.divf %174, %175 : vector<27x1xf32>
    %177 = vector.broadcast %169 : vector<27x1xf32> to vector<27x16xf32>
    %178 = arith.subf %165, %177 : vector<27x16xf32>
    %cst_74 = arith.constant 9.99999996E-13 : f32
    %179 = vector.broadcast %cst_74 : f32 to vector<27x1xf32>
    %180 = arith.addf %176, %179 : vector<27x1xf32>
    %181 = math.rsqrt %180 : vector<27x1xf32>
    %182 = vector.broadcast %181 : vector<27x1xf32> to vector<27x16xf32>
    %183 = arith.mulf %178, %182 : vector<27x16xf32>
    %c0_75 = arith.constant 0 : index
    %c0_76 = arith.constant 0 : index
    %184 = vector.load %arg18[%c0_75, %c0_76] : memref<1x16xf32, #tpu.memory_space<vmem>>, vector<1x16xf32>
    %185 = vector.broadcast %184 : vector<1x16xf32> to vector<27x16xf32>
    %186 = arith.mulf %183, %185 : vector<27x16xf32>
    %c0_77 = arith.constant 0 : index
    %c0_78 = arith.constant 0 : index
    %187 = vector.load %arg19[%c0_77, %c0_78] : memref<1x16xf32, #tpu.memory_space<vmem>>, vector<1x16xf32>
    %188 = vector.broadcast %187 : vector<1x16xf32> to vector<27x16xf32>
    %189 = arith.addf %186, %188 : vector<27x16xf32>
    %c0_79 = arith.constant 0 : index
    %c0_80 = arith.constant 0 : index
    %190 = vector.load %arg20[%c0_79, %c0_80] : memref<16x16xf32, #tpu.memory_space<vmem>>, vector<16x16xf32>
    %cst_81 = arith.constant dense<0.000000e+00> : vector<27x16xf32>
    %191 = tpu.matmul %189, %190, %cst_81 {dimension_numbers = #tpu.dot_dimension_numbers<[1], [0], [0], [1], [0, 0, 1, 1], [], []>} : vector<27x16xf32>, vector<16x16xf32>, vector<27x16xf32> -> vector<27x16xf32>
    %c0_82 = arith.constant 0 : index
    %c0_83 = arith.constant 0 : index
    %192 = vector.load %arg21[%c0_82, %c0_83] : memref<1x16xf32, #tpu.memory_space<vmem>>, vector<1x16xf32>
    %193 = vector.broadcast %192 : vector<1x16xf32> to vector<27x16xf32>
    %194 = arith.addf %191, %193 : vector<27x16xf32>
    %cst_84 = arith.constant 0.000000e+00 : f32
    %195 = vector.broadcast %cst_84 : f32 to vector<27x16xf32>
    %196 = arith.maximumf %194, %195 : vector<27x16xf32>
    %c0_85 = arith.constant 0 : index
    %c0_86 = arith.constant 0 : index
    %197 = vector.load %arg22[%c0_85, %c0_86] : memref<16x16xf32, #tpu.memory_space<vmem>>, vector<16x16xf32>
    %cst_87 = arith.constant dense<0.000000e+00> : vector<27x16xf32>
    %198 = tpu.matmul %196, %197, %cst_87 {dimension_numbers = #tpu.dot_dimension_numbers<[1], [0], [0], [1], [0, 0, 1, 1], [], []>} : vector<27x16xf32>, vector<16x16xf32>, vector<27x16xf32> -> vector<27x16xf32>
    %c0_88 = arith.constant 0 : index
    %c0_89 = arith.constant 0 : index
    %199 = vector.load %arg23[%c0_88, %c0_89] : memref<1x16xf32, #tpu.memory_space<vmem>>, vector<1x16xf32>
    %200 = vector.broadcast %199 : vector<1x16xf32> to vector<27x16xf32>
    %201 = arith.addf %198, %200 : vector<27x16xf32>
    %202 = arith.addf %189, %201 : vector<27x16xf32>
    %cst_90 = arith.constant dense<0.000000e+00> : vector<27xf32>
    %203 = vector.multi_reduction <add>, %202, %cst_90 [1] : vector<27x16xf32> to vector<27xf32>
    %204 = vector.shape_cast %203 : vector<27xf32> to vector<27x1xf32>
    %cst_91 = arith.constant 1.600000e+01 : f32
    %205 = vector.broadcast %cst_91 : f32 to vector<27x1xf32>
    %206 = arith.divf %204, %205 : vector<27x1xf32>
    %207 = vector.broadcast %206 : vector<27x1xf32> to vector<27x16xf32>
    %208 = arith.subf %202, %207 : vector<27x16xf32>
    %209 = arith.mulf %208, %208 : vector<27x16xf32>
    %cst_92 = arith.constant dense<0.000000e+00> : vector<27xf32>
    %210 = vector.multi_reduction <add>, %209, %cst_92 [1] : vector<27x16xf32> to vector<27xf32>
    %211 = vector.shape_cast %210 : vector<27xf32> to vector<27x1xf32>
    %cst_93 = arith.constant 1.600000e+01 : f32
    %212 = vector.broadcast %cst_93 : f32 to vector<27x1xf32>
    %213 = arith.divf %211, %212 : vector<27x1xf32>
    %214 = vector.broadcast %206 : vector<27x1xf32> to vector<27x16xf32>
    %215 = arith.subf %202, %214 : vector<27x16xf32>
    %cst_94 = arith.constant 9.99999996E-13 : f32
    %216 = vector.broadcast %cst_94 : f32 to vector<27x1xf32>
    %217 = arith.addf %213, %216 : vector<27x1xf32>
    %218 = math.rsqrt %217 : vector<27x1xf32>
    %219 = vector.broadcast %218 : vector<27x1xf32> to vector<27x16xf32>
    %220 = arith.mulf %215, %219 : vector<27x16xf32>
    %c0_95 = arith.constant 0 : index
    %c0_96 = arith.constant 0 : index
    %221 = vector.load %arg24[%c0_95, %c0_96] : memref<1x16xf32, #tpu.memory_space<vmem>>, vector<1x16xf32>
    %222 = vector.broadcast %221 : vector<1x16xf32> to vector<27x16xf32>
    %223 = arith.mulf %220, %222 : vector<27x16xf32>
    %c0_97 = arith.constant 0 : index
    %c0_98 = arith.constant 0 : index
    %224 = vector.load %arg25[%c0_97, %c0_98] : memref<1x16xf32, #tpu.memory_space<vmem>>, vector<1x16xf32>
    %225 = vector.broadcast %224 : vector<1x16xf32> to vector<27x16xf32>
    %226 = arith.addf %223, %225 : vector<27x16xf32>
    %227 = tpu.concatenate %139, %157 in 0 : vector<1x27xf32>, vector<1x27xf32> -> vector<2x27xf32>
    %c0_99 = arith.constant 0 : index
    %c0_100 = arith.constant 0 : index
    %c0_101 = arith.constant 0 : index
    %228 = vector.load %arg26[%c0_99, %c0_100, %c0_101] : memref<1x27x16xf32, #tpu.memory_space<vmem>>, vector<1x27x16xf32>
    %229 = vector.shape_cast %228 : vector<1x27x16xf32> to vector<27x16xf32>
    %230 = vector.shape_cast %226 : vector<27x16xf32> to vector<1x27x16xf32>
    tpu.vector_store %arg26[%c0_99, %c0_100, %c0_101], %230 {strides = array<i32>} : memref<1x27x16xf32, #tpu.memory_space<vmem>>, vector<1x27x16xf32>,
    %231 = arith.mulf %114, %227 : vector<2x27xf32>
    %c0_102 = arith.constant 0 : index
    %c0_103 = arith.constant 0 : index
    %c0_104 = arith.constant 0 : index
    %232 = vector.load %arg27[%c0_102, %c0_103, %c0_104] : memref<1x2x27xf32, #tpu.memory_space<vmem>>, vector<1x2x27xf32>
    %233 = vector.shape_cast %232 : vector<1x2x27xf32> to vector<2x27xf32>
    %234 = vector.shape_cast %231 : vector<2x27xf32> to vector<1x2x27xf32>
    tpu.vector_store %arg27[%c0_102, %c0_103, %c0_104], %234 {strides = array<i32>} : memref<1x2x27xf32, #tpu.memory_space<vmem>>, vector<1x2x27xf32>,
    return
  }
  func.func @transform_0(%arg0: i32) -> (i32, i32, i32) {
    %c0_i32 = arith.constant 0 : i32
    %c0_i32_0 = arith.constant 0 : i32
    %c0_i32_1 = arith.constant 0 : i32
    return %arg0, %c0_i32, %c0_i32_0 : i32, i32, i32
  }
  func.func @transform_1(%arg0: i32) -> (i32, i32) {
    %c0_i32 = arith.constant 0 : i32
    %c0_i32_0 = arith.constant 0 : i32
    %c0_i32_1 = arith.constant 0 : i32
    return %c0_i32, %c0_i32_0 : i32, i32
  }
  func.func @transform_2(%arg0: i32) -> (i32, i32) {
    %c0_i32 = arith.constant 0 : i32
    %c0_i32_0 = arith.constant 0 : i32
    %c0_i32_1 = arith.constant 0 : i32
    return %c0_i32, %c0_i32_0 : i32, i32
  }
  func.func @transform_3(%arg0: i32) -> (i32, i32) {
    %c0_i32 = arith.constant 0 : i32
    %c0_i32_0 = arith.constant 0 : i32
    %c0_i32_1 = arith.constant 0 : i32
    return %c0_i32, %c0_i32_0 : i32, i32
  }
  func.func @transform_4(%arg0: i32) -> (i32, i32) {
    %c0_i32 = arith.constant 0 : i32
    %c0_i32_0 = arith.constant 0 : i32
    %c0_i32_1 = arith.constant 0 : i32
    return %c0_i32, %c0_i32_0 : i32, i32
  }
  func.func @transform_5(%arg0: i32) -> (i32, i32) {
    %c0_i32 = arith.constant 0 : i32
    %c0_i32_0 = arith.constant 0 : i32
    %c0_i32_1 = arith.constant 0 : i32
    return %c0_i32, %c0_i32_0 : i32, i32
  }
  func.func @transform_6(%arg0: i32) -> (i32, i32) {
    %c0_i32 = arith.constant 0 : i32
    %c0_i32_0 = arith.constant 0 : i32
    %c0_i32_1 = arith.constant 0 : i32
    return %c0_i32, %c0_i32_0 : i32, i32
  }
  func.func @transform_7(%arg0: i32) -> (i32, i32) {
    %c0_i32 = arith.constant 0 : i32
    %c0_i32_0 = arith.constant 0 : i32
    %c0_i32_1 = arith.constant 0 : i32
    return %c0_i32, %c0_i32_0 : i32, i32
  }
  func.func @transform_8(%arg0: i32) -> (i32, i32) {
    %c0_i32 = arith.constant 0 : i32
    %c0_i32_0 = arith.constant 0 : i32
    %c0_i32_1 = arith.constant 0 : i32
    return %c0_i32, %c0_i32_0 : i32, i32
  }
  func.func @transform_9(%arg0: i32) -> (i32, i32) {
    %c0_i32 = arith.constant 0 : i32
    %c0_i32_0 = arith.constant 0 : i32
    %c0_i32_1 = arith.constant 0 : i32
    return %c0_i32, %c0_i32_0 : i32, i32
  }
  func.func @transform_10(%arg0: i32) -> (i32, i32) {
    %c0_i32 = arith.constant 0 : i32
    %c0_i32_0 = arith.constant 0 : i32
    %c0_i32_1 = arith.constant 0 : i32
    return %c0_i32, %c0_i32_0 : i32, i32
  }
  func.func @transform_11(%arg0: i32) -> (i32, i32) {
    %c0_i32 = arith.constant 0 : i32
    %c0_i32_0 = arith.constant 0 : i32
    %c0_i32_1 = arith.constant 0 : i32
    return %c0_i32, %c0_i32_0 : i32, i32
  }
  func.func @transform_12(%arg0: i32) -> (i32, i32) {
    %c0_i32 = arith.constant 0 : i32
    %c0_i32_0 = arith.constant 0 : i32
    %c0_i32_1 = arith.constant 0 : i32
    return %c0_i32, %c0_i32_0 : i32, i32
  }
  func.func @transform_13(%arg0: i32) -> (i32, i32) {
    %c0_i32 = arith.constant 0 : i32
    %c0_i32_0 = arith.constant 0 : i32
    %c0_i32_1 = arith.constant 0 : i32
    return %c0_i32, %c0_i32_0 : i32, i32
  }
  func.func @transform_14(%arg0: i32) -> (i32, i32) {
    %c0_i32 = arith.constant 0 : i32
    %c0_i32_0 = arith.constant 0 : i32
    %c0_i32_1 = arith.constant 0 : i32
    return %c0_i32, %c0_i32_0 : i32, i32
  }
  func.func @transform_15(%arg0: i32) -> (i32, i32) {
    %c0_i32 = arith.constant 0 : i32
    %c0_i32_0 = arith.constant 0 : i32
    %c0_i32_1 = arith.constant 0 : i32
    return %c0_i32, %c0_i32_0 : i32, i32
  }
  func.func @transform_16(%arg0: i32) -> (i32, i32) {
    %c0_i32 = arith.constant 0 : i32
    %c0_i32_0 = arith.constant 0 : i32
    %c0_i32_1 = arith.constant 0 : i32
    return %c0_i32, %c0_i32_0 : i32, i32
  }
  func.func @transform_17(%arg0: i32) -> (i32, i32) {
    %c0_i32 = arith.constant 0 : i32
    %c0_i32_0 = arith.constant 0 : i32
    %c0_i32_1 = arith.constant 0 : i32
    return %c0_i32, %c0_i32_0 : i32, i32
  }
  func.func @transform_18(%arg0: i32) -> (i32, i32) {
    %c0_i32 = arith.constant 0 : i32
    %c0_i32_0 = arith.constant 0 : i32
    %c0_i32_1 = arith.constant 0 : i32
    return %c0_i32, %c0_i32_0 : i32, i32
  }
  func.func @transform_19(%arg0: i32) -> (i32, i32) {
    %c0_i32 = arith.constant 0 : i32
    %c0_i32_0 = arith.constant 0 : i32
    %c0_i32_1 = arith.constant 0 : i32
    return %c0_i32, %c0_i32_0 : i32, i32
  }
  func.func @transform_20(%arg0: i32) -> (i32, i32) {
    %c0_i32 = arith.constant 0 : i32
    %c0_i32_0 = arith.constant 0 : i32
    %c0_i32_1 = arith.constant 0 : i32
    return %c0_i32, %c0_i32_0 : i32, i32
  }
  func.func @transform_21(%arg0: i32) -> (i32, i32) {
    %c0_i32 = arith.constant 0 : i32
    %c0_i32_0 = arith.constant 0 : i32
    %c0_i32_1 = arith.constant 0 : i32
    return %c0_i32, %c0_i32_0 : i32, i32
  }
  func.func @transform_22(%arg0: i32) -> (i32, i32) {
    %c0_i32 = arith.constant 0 : i32
    %c0_i32_0 = arith.constant 0 : i32
    %c0_i32_1 = arith.constant 0 : i32
    return %c0_i32, %c0_i32_0 : i32, i32
  }
  func.func @transform_23(%arg0: i32) -> (i32, i32) {
    %c0_i32 = arith.constant 0 : i32
    %c0_i32_0 = arith.constant 0 : i32
    %c0_i32_1 = arith.constant 0 : i32
    return %c0_i32, %c0_i32_0 : i32, i32
  }
  func.func @transform_24(%arg0: i32) -> (i32, i32) {
    %c0_i32 = arith.constant 0 : i32
    %c0_i32_0 = arith.constant 0 : i32
    %c0_i32_1 = arith.constant 0 : i32
    return %c0_i32, %c0_i32_0 : i32, i32
  }
  func.func @transform_25(%arg0: i32) -> (i32, i32, i32) {
    %c0_i32 = arith.constant 0 : i32
    %c0_i32_0 = arith.constant 0 : i32
    %c0_i32_1 = arith.constant 0 : i32
    return %arg0, %c0_i32, %c0_i32_0 : i32, i32, i32
  }
  func.func @transform_26(%arg0: i32) -> (i32, i32, i32) {
    %c0_i32 = arith.constant 0 : i32
    %c0_i32_0 = arith.constant 0 : i32
    %c0_i32_1 = arith.constant 0 : i32
    return %arg0, %c0_i32, %c0_i32_0 : i32, i32, i32
  }
}

module attributes {stable_mosaic.version = 11 : i64} {
  func.func @encoder1_kernel(%arg0: i32, %arg1: memref<1x5x16xf32, #tpu.memory_space<vmem>>, %arg2: memref<16x48xf32, #tpu.memory_space<vmem>>, %arg3: memref<1x48xf32, #tpu.memory_space<vmem>>, %arg4: memref<16x16xf32, #tpu.memory_space<vmem>>, %arg5: memref<1x16xf32, #tpu.memory_space<vmem>>, %arg6: memref<1x16xf32, #tpu.memory_space<vmem>>, %arg7: memref<1x16xf32, #tpu.memory_space<vmem>>, %arg8: memref<16x16xf32, #tpu.memory_space<vmem>>, %arg9: memref<1x16xf32, #tpu.memory_space<vmem>>, %arg10: memref<16x16xf32, #tpu.memory_space<vmem>>, %arg11: memref<1x16xf32, #tpu.memory_space<vmem>>, %arg12: memref<1x16xf32, #tpu.memory_space<vmem>>, %arg13: memref<1x16xf32, #tpu.memory_space<vmem>>, %arg14: memref<1x5x16xf32, #tpu.memory_space<vmem>>) attributes {dimension_semantics = [#tpu.dimension_semantics<parallel>], iteration_bounds = array<i64: 2>, scalar_prefetch = 0 : i64, scratch_operands = 0 : i64, tpu.core_type = #tpu.core_type<tc>, window_params = [{transform_indices = @transform_0, window_bounds = array<i64: 1, 5, 16>}, {pipeline_mode = #tpu.pipeline_mode<synchronous>, transform_indices = @transform_1, window_bounds = array<i64: 16, 48>}, {pipeline_mode = #tpu.pipeline_mode<synchronous>, transform_indices = @transform_2, window_bounds = array<i64: 1, 48>}, {pipeline_mode = #tpu.pipeline_mode<synchronous>, transform_indices = @transform_3, window_bounds = array<i64: 16, 16>}, {pipeline_mode = #tpu.pipeline_mode<synchronous>, transform_indices = @transform_4, window_bounds = array<i64: 1, 16>}, {pipeline_mode = #tpu.pipeline_mode<synchronous>, transform_indices = @transform_5, window_bounds = array<i64: 1, 16>}, {pipeline_mode = #tpu.pipeline_mode<synchronous>, transform_indices = @transform_6, window_bounds = array<i64: 1, 16>}, {pipeline_mode = #tpu.pipeline_mode<synchronous>, transform_indices = @transform_7, window_bounds = array<i64: 16, 16>}, {pipeline_mode = #tpu.pipeline_mode<synchronous>, transform_indices = @transform_8, window_bounds = array<i64: 1, 16>}, {pipeline_mode = #tpu.pipeline_mode<synchronous>, transform_indices = @transform_9, window_bounds = array<i64: 16, 16>}, {pipeline_mode = #tpu.pipeline_mode<synchronous>, transform_indices = @transform_10, window_bounds = array<i64: 1, 16>}, {pipeline_mode = #tpu.pipeline_mode<synchronous>, transform_indices = @transform_11, window_bounds = array<i64: 1, 16>}, {pipeline_mode = #tpu.pipeline_mode<synchronous>, transform_indices = @transform_12, window_bounds = array<i64: 1, 16>}, {transform_indices = @transform_13, window_bounds = array<i64: 1, 5, 16>}]} {
    %c0 = arith.constant 0 : index
    %c0_0 = arith.constant 0 : index
    %c0_1 = arith.constant 0 : index
    %0 = vector.load %arg1[%c0, %c0_0, %c0_1] : memref<1x5x16xf32, #tpu.memory_space<vmem>>, vector<1x5x16xf32>
    %1 = vector.shape_cast %0 : vector<1x5x16xf32> to vector<5x16xf32>
    %c0_2 = arith.constant 0 : index
    %c0_3 = arith.constant 0 : index
    %2 = vector.load %arg2[%c0_2, %c0_3] : memref<16x48xf32, #tpu.memory_space<vmem>>, vector<16x48xf32>
    %cst = arith.constant dense<0.000000e+00> : vector<5x48xf32>
    %3 = tpu.matmul %1, %2, %cst {dimension_numbers = #tpu.dot_dimension_numbers<[1], [0], [0], [1], [0, 0, 1, 1], [], []>} : vector<5x16xf32>, vector<16x48xf32>, vector<5x48xf32> -> vector<5x48xf32>
    %c0_4 = arith.constant 0 : index
    %c0_5 = arith.constant 0 : index
    %4 = vector.load %arg3[%c0_4, %c0_5] : memref<1x48xf32, #tpu.memory_space<vmem>>, vector<1x48xf32>
    %5 = vector.broadcast %4 : vector<1x48xf32> to vector<5x48xf32>
    %6 = arith.addf %3, %5 : vector<5x48xf32>
    %7 = vector.extract_strided_slice %6 {offsets = [0, 0], sizes = [5, 16], strides = [1, 1]} : vector<5x48xf32> to vector<5x16xf32>
    %8 = vector.extract_strided_slice %6 {offsets = [0, 16], sizes = [5, 16], strides = [1, 1]} : vector<5x48xf32> to vector<5x16xf32>
    %9 = vector.extract_strided_slice %6 {offsets = [0, 32], sizes = [5, 16], strides = [1, 1]} : vector<5x48xf32> to vector<5x16xf32>
    %10 = vector.extract_strided_slice %7 {offsets = [0, 0], sizes = [5, 8], strides = [1, 1]} : vector<5x16xf32> to vector<5x8xf32>
    %11 = vector.extract_strided_slice %8 {offsets = [0, 0], sizes = [5, 8], strides = [1, 1]} : vector<5x16xf32> to vector<5x8xf32>
    %12 = vector.extract_strided_slice %9 {offsets = [0, 0], sizes = [5, 8], strides = [1, 1]} : vector<5x16xf32> to vector<5x8xf32>
    %cst_6 = arith.constant dense<0.000000e+00> : vector<5x5xf32>
    %13 = tpu.matmul %10, %11, %cst_6 {dimension_numbers = #tpu.dot_dimension_numbers<[1], [1], [0], [0], [0, 0, 1, 0], [], []>} : vector<5x8xf32>, vector<5x8xf32>, vector<5x5xf32> -> vector<5x5xf32>
    %cst_7 = arith.constant 0.353553385 : f32
    %14 = vector.broadcast %cst_7 : f32 to vector<5x5xf32>
    %15 = arith.mulf %13, %14 : vector<5x5xf32>
    %cst_8 = arith.constant dense<0xFF800000> : vector<5xf32>
    %16 = vector.multi_reduction <maximumf>, %15, %cst_8 [1] : vector<5x5xf32> to vector<5xf32>
    %17 = vector.shape_cast %16 : vector<5xf32> to vector<5x1xf32>
    %18 = vector.broadcast %17 : vector<5x1xf32> to vector<5x5xf32>
    %19 = arith.subf %15, %18 : vector<5x5xf32>
    %20 = math.exp %19 : vector<5x5xf32>
    %cst_9 = arith.constant dense<0.000000e+00> : vector<5xf32>
    %21 = vector.multi_reduction <add>, %20, %cst_9 [1] : vector<5x5xf32> to vector<5xf32>
    %22 = vector.shape_cast %21 : vector<5xf32> to vector<5x1xf32>
    %23 = tpu.reciprocal %22 {approx = true} : vector<5x1xf32> -> vector<5x1xf32>
    %24 = vector.broadcast %23 : vector<5x1xf32> to vector<5x5xf32>
    %25 = arith.mulf %20, %24 : vector<5x5xf32>
    %cst_10 = arith.constant dense<0.000000e+00> : vector<5x8xf32>
    %26 = tpu.matmul %25, %12, %cst_10 {dimension_numbers = #tpu.dot_dimension_numbers<[1], [0], [0], [1], [0, 0, 1, 1], [], []>} : vector<5x5xf32>, vector<5x8xf32>, vector<5x8xf32> -> vector<5x8xf32>
    %27 = vector.extract_strided_slice %7 {offsets = [0, 8], sizes = [5, 8], strides = [1, 1]} : vector<5x16xf32> to vector<5x8xf32>
    %28 = vector.extract_strided_slice %8 {offsets = [0, 8], sizes = [5, 8], strides = [1, 1]} : vector<5x16xf32> to vector<5x8xf32>
    %29 = vector.extract_strided_slice %9 {offsets = [0, 8], sizes = [5, 8], strides = [1, 1]} : vector<5x16xf32> to vector<5x8xf32>
    %cst_11 = arith.constant dense<0.000000e+00> : vector<5x5xf32>
    %30 = tpu.matmul %27, %28, %cst_11 {dimension_numbers = #tpu.dot_dimension_numbers<[1], [1], [0], [0], [0, 0, 1, 0], [], []>} : vector<5x8xf32>, vector<5x8xf32>, vector<5x5xf32> -> vector<5x5xf32>
    %cst_12 = arith.constant 0.353553385 : f32
    %31 = vector.broadcast %cst_12 : f32 to vector<5x5xf32>
    %32 = arith.mulf %30, %31 : vector<5x5xf32>
    %cst_13 = arith.constant dense<0xFF800000> : vector<5xf32>
    %33 = vector.multi_reduction <maximumf>, %32, %cst_13 [1] : vector<5x5xf32> to vector<5xf32>
    %34 = vector.shape_cast %33 : vector<5xf32> to vector<5x1xf32>
    %35 = vector.broadcast %34 : vector<5x1xf32> to vector<5x5xf32>
    %36 = arith.subf %32, %35 : vector<5x5xf32>
    %37 = math.exp %36 : vector<5x5xf32>
    %cst_14 = arith.constant dense<0.000000e+00> : vector<5xf32>
    %38 = vector.multi_reduction <add>, %37, %cst_14 [1] : vector<5x5xf32> to vector<5xf32>
    %39 = vector.shape_cast %38 : vector<5xf32> to vector<5x1xf32>
    %40 = tpu.reciprocal %39 {approx = true} : vector<5x1xf32> -> vector<5x1xf32>
    %41 = vector.broadcast %40 : vector<5x1xf32> to vector<5x5xf32>
    %42 = arith.mulf %37, %41 : vector<5x5xf32>
    %cst_15 = arith.constant dense<0.000000e+00> : vector<5x8xf32>
    %43 = tpu.matmul %42, %29, %cst_15 {dimension_numbers = #tpu.dot_dimension_numbers<[1], [0], [0], [1], [0, 0, 1, 1], [], []>} : vector<5x5xf32>, vector<5x8xf32>, vector<5x8xf32> -> vector<5x8xf32>
    %44 = tpu.concatenate %26, %43 in 1 : vector<5x8xf32>, vector<5x8xf32> -> vector<5x16xf32>
    %c0_16 = arith.constant 0 : index
    %c0_17 = arith.constant 0 : index
    %45 = vector.load %arg4[%c0_16, %c0_17] : memref<16x16xf32, #tpu.memory_space<vmem>>, vector<16x16xf32>
    %cst_18 = arith.constant dense<0.000000e+00> : vector<5x16xf32>
    %46 = tpu.matmul %44, %45, %cst_18 {dimension_numbers = #tpu.dot_dimension_numbers<[1], [0], [0], [1], [0, 0, 1, 1], [], []>} : vector<5x16xf32>, vector<16x16xf32>, vector<5x16xf32> -> vector<5x16xf32>
    %c0_19 = arith.constant 0 : index
    %c0_20 = arith.constant 0 : index
    %47 = vector.load %arg5[%c0_19, %c0_20] : memref<1x16xf32, #tpu.memory_space<vmem>>, vector<1x16xf32>
    %48 = vector.broadcast %47 : vector<1x16xf32> to vector<5x16xf32>
    %49 = arith.addf %46, %48 : vector<5x16xf32>
    %50 = arith.addf %1, %49 : vector<5x16xf32>
    %cst_21 = arith.constant dense<0.000000e+00> : vector<5xf32>
    %51 = vector.multi_reduction <add>, %50, %cst_21 [1] : vector<5x16xf32> to vector<5xf32>
    %52 = vector.shape_cast %51 : vector<5xf32> to vector<5x1xf32>
    %cst_22 = arith.constant 1.600000e+01 : f32
    %53 = vector.broadcast %cst_22 : f32 to vector<5x1xf32>
    %54 = arith.divf %52, %53 : vector<5x1xf32>
    %55 = vector.broadcast %54 : vector<5x1xf32> to vector<5x16xf32>
    %56 = arith.subf %50, %55 : vector<5x16xf32>
    %57 = arith.mulf %56, %56 : vector<5x16xf32>
    %cst_23 = arith.constant dense<0.000000e+00> : vector<5xf32>
    %58 = vector.multi_reduction <add>, %57, %cst_23 [1] : vector<5x16xf32> to vector<5xf32>
    %59 = vector.shape_cast %58 : vector<5xf32> to vector<5x1xf32>
    %cst_24 = arith.constant 1.600000e+01 : f32
    %60 = vector.broadcast %cst_24 : f32 to vector<5x1xf32>
    %61 = arith.divf %59, %60 : vector<5x1xf32>
    %62 = vector.broadcast %54 : vector<5x1xf32> to vector<5x16xf32>
    %63 = arith.subf %50, %62 : vector<5x16xf32>
    %cst_25 = arith.constant 9.99999996E-13 : f32
    %64 = vector.broadcast %cst_25 : f32 to vector<5x1xf32>
    %65 = arith.addf %61, %64 : vector<5x1xf32>
    %66 = math.rsqrt %65 : vector<5x1xf32>
    %67 = vector.broadcast %66 : vector<5x1xf32> to vector<5x16xf32>
    %68 = arith.mulf %63, %67 : vector<5x16xf32>
    %c0_26 = arith.constant 0 : index
    %c0_27 = arith.constant 0 : index
    %69 = vector.load %arg6[%c0_26, %c0_27] : memref<1x16xf32, #tpu.memory_space<vmem>>, vector<1x16xf32>
    %70 = vector.broadcast %69 : vector<1x16xf32> to vector<5x16xf32>
    %71 = arith.mulf %68, %70 : vector<5x16xf32>
    %c0_28 = arith.constant 0 : index
    %c0_29 = arith.constant 0 : index
    %72 = vector.load %arg7[%c0_28, %c0_29] : memref<1x16xf32, #tpu.memory_space<vmem>>, vector<1x16xf32>
    %73 = vector.broadcast %72 : vector<1x16xf32> to vector<5x16xf32>
    %74 = arith.addf %71, %73 : vector<5x16xf32>
    %c0_30 = arith.constant 0 : index
    %c0_31 = arith.constant 0 : index
    %75 = vector.load %arg8[%c0_30, %c0_31] : memref<16x16xf32, #tpu.memory_space<vmem>>, vector<16x16xf32>
    %cst_32 = arith.constant dense<0.000000e+00> : vector<5x16xf32>
    %76 = tpu.matmul %74, %75, %cst_32 {dimension_numbers = #tpu.dot_dimension_numbers<[1], [0], [0], [1], [0, 0, 1, 1], [], []>} : vector<5x16xf32>, vector<16x16xf32>, vector<5x16xf32> -> vector<5x16xf32>
    %c0_33 = arith.constant 0 : index
    %c0_34 = arith.constant 0 : index
    %77 = vector.load %arg9[%c0_33, %c0_34] : memref<1x16xf32, #tpu.memory_space<vmem>>, vector<1x16xf32>
    %78 = vector.broadcast %77 : vector<1x16xf32> to vector<5x16xf32>
    %79 = arith.addf %76, %78 : vector<5x16xf32>
    %cst_35 = arith.constant 0.000000e+00 : f32
    %80 = vector.broadcast %cst_35 : f32 to vector<5x16xf32>
    %81 = arith.maximumf %79, %80 : vector<5x16xf32>
    %c0_36 = arith.constant 0 : index
    %c0_37 = arith.constant 0 : index
    %82 = vector.load %arg10[%c0_36, %c0_37] : memref<16x16xf32, #tpu.memory_space<vmem>>, vector<16x16xf32>
    %cst_38 = arith.constant dense<0.000000e+00> : vector<5x16xf32>
    %83 = tpu.matmul %81, %82, %cst_38 {dimension_numbers = #tpu.dot_dimension_numbers<[1], [0], [0], [1], [0, 0, 1, 1], [], []>} : vector<5x16xf32>, vector<16x16xf32>, vector<5x16xf32> -> vector<5x16xf32>
    %c0_39 = arith.constant 0 : index
    %c0_40 = arith.constant 0 : index
    %84 = vector.load %arg11[%c0_39, %c0_40] : memref<1x16xf32, #tpu.memory_space<vmem>>, vector<1x16xf32>
    %85 = vector.broadcast %84 : vector<1x16xf32> to vector<5x16xf32>
    %86 = arith.addf %83, %85 : vector<5x16xf32>
    %87 = arith.addf %74, %86 : vector<5x16xf32>
    %cst_41 = arith.constant dense<0.000000e+00> : vector<5xf32>
    %88 = vector.multi_reduction <add>, %87, %cst_41 [1] : vector<5x16xf32> to vector<5xf32>
    %89 = vector.shape_cast %88 : vector<5xf32> to vector<5x1xf32>
    %cst_42 = arith.constant 1.600000e+01 : f32
    %90 = vector.broadcast %cst_42 : f32 to vector<5x1xf32>
    %91 = arith.divf %89, %90 : vector<5x1xf32>
    %92 = vector.broadcast %91 : vector<5x1xf32> to vector<5x16xf32>
    %93 = arith.subf %87, %92 : vector<5x16xf32>
    %94 = arith.mulf %93, %93 : vector<5x16xf32>
    %cst_43 = arith.constant dense<0.000000e+00> : vector<5xf32>
    %95 = vector.multi_reduction <add>, %94, %cst_43 [1] : vector<5x16xf32> to vector<5xf32>
    %96 = vector.shape_cast %95 : vector<5xf32> to vector<5x1xf32>
    %cst_44 = arith.constant 1.600000e+01 : f32
    %97 = vector.broadcast %cst_44 : f32 to vector<5x1xf32>
    %98 = arith.divf %96, %97 : vector<5x1xf32>
    %99 = vector.broadcast %91 : vector<5x1xf32> to vector<5x16xf32>
    %100 = arith.subf %87, %99 : vector<5x16xf32>
    %cst_45 = arith.constant 9.99999996E-13 : f32
    %101 = vector.broadcast %cst_45 : f32 to vector<5x1xf32>
    %102 = arith.addf %98, %101 : vector<5x1xf32>
    %103 = math.rsqrt %102 : vector<5x1xf32>
    %104 = vector.broadcast %103 : vector<5x1xf32> to vector<5x16xf32>
    %105 = arith.mulf %100, %104 : vector<5x16xf32>
    %c0_46 = arith.constant 0 : index
    %c0_47 = arith.constant 0 : index
    %106 = vector.load %arg12[%c0_46, %c0_47] : memref<1x16xf32, #tpu.memory_space<vmem>>, vector<1x16xf32>
    %107 = vector.broadcast %106 : vector<1x16xf32> to vector<5x16xf32>
    %108 = arith.mulf %105, %107 : vector<5x16xf32>
    %c0_48 = arith.constant 0 : index
    %c0_49 = arith.constant 0 : index
    %109 = vector.load %arg13[%c0_48, %c0_49] : memref<1x16xf32, #tpu.memory_space<vmem>>, vector<1x16xf32>
    %110 = vector.broadcast %109 : vector<1x16xf32> to vector<5x16xf32>
    %111 = arith.addf %108, %110 : vector<5x16xf32>
    %c0_50 = arith.constant 0 : index
    %c0_51 = arith.constant 0 : index
    %c0_52 = arith.constant 0 : index
    %112 = vector.load %arg14[%c0_50, %c0_51, %c0_52] : memref<1x5x16xf32, #tpu.memory_space<vmem>>, vector<1x5x16xf32>
    %113 = vector.shape_cast %112 : vector<1x5x16xf32> to vector<5x16xf32>
    %114 = vector.shape_cast %111 : vector<5x16xf32> to vector<1x5x16xf32>
    tpu.vector_store %arg14[%c0_50, %c0_51, %c0_52], %114 {strides = array<i32>} : memref<1x5x16xf32, #tpu.memory_space<vmem>>, vector<1x5x16xf32>,
    return
  }
  func.func @transform_0(%arg0: i32) -> (i32, i32, i32) {
    %c0_i32 = arith.constant 0 : i32
    %c0_i32_0 = arith.constant 0 : i32
    %c0_i32_1 = arith.constant 0 : i32
    return %arg0, %c0_i32, %c0_i32_0 : i32, i32, i32
  }
  func.func @transform_1(%arg0: i32) -> (i32, i32) {
    %c0_i32 = arith.constant 0 : i32
    %c0_i32_0 = arith.constant 0 : i32
    %c0_i32_1 = arith.constant 0 : i32
    return %c0_i32, %c0_i32_0 : i32, i32
  }
  func.func @transform_2(%arg0: i32) -> (i32, i32) {
    %c0_i32 = arith.constant 0 : i32
    %c0_i32_0 = arith.constant 0 : i32
    %c0_i32_1 = arith.constant 0 : i32
    return %c0_i32, %c0_i32_0 : i32, i32
  }
  func.func @transform_3(%arg0: i32) -> (i32, i32) {
    %c0_i32 = arith.constant 0 : i32
    %c0_i32_0 = arith.constant 0 : i32
    %c0_i32_1 = arith.constant 0 : i32
    return %c0_i32, %c0_i32_0 : i32, i32
  }
  func.func @transform_4(%arg0: i32) -> (i32, i32) {
    %c0_i32 = arith.constant 0 : i32
    %c0_i32_0 = arith.constant 0 : i32
    %c0_i32_1 = arith.constant 0 : i32
    return %c0_i32, %c0_i32_0 : i32, i32
  }
  func.func @transform_5(%arg0: i32) -> (i32, i32) {
    %c0_i32 = arith.constant 0 : i32
    %c0_i32_0 = arith.constant 0 : i32
    %c0_i32_1 = arith.constant 0 : i32
    return %c0_i32, %c0_i32_0 : i32, i32
  }
  func.func @transform_6(%arg0: i32) -> (i32, i32) {
    %c0_i32 = arith.constant 0 : i32
    %c0_i32_0 = arith.constant 0 : i32
    %c0_i32_1 = arith.constant 0 : i32
    return %c0_i32, %c0_i32_0 : i32, i32
  }
  func.func @transform_7(%arg0: i32) -> (i32, i32) {
    %c0_i32 = arith.constant 0 : i32
    %c0_i32_0 = arith.constant 0 : i32
    %c0_i32_1 = arith.constant 0 : i32
    return %c0_i32, %c0_i32_0 : i32, i32
  }
  func.func @transform_8(%arg0: i32) -> (i32, i32) {
    %c0_i32 = arith.constant 0 : i32
    %c0_i32_0 = arith.constant 0 : i32
    %c0_i32_1 = arith.constant 0 : i32
    return %c0_i32, %c0_i32_0 : i32, i32
  }
  func.func @transform_9(%arg0: i32) -> (i32, i32) {
    %c0_i32 = arith.constant 0 : i32
    %c0_i32_0 = arith.constant 0 : i32
    %c0_i32_1 = arith.constant 0 : i32
    return %c0_i32, %c0_i32_0 : i32, i32
  }
  func.func @transform_10(%arg0: i32) -> (i32, i32) {
    %c0_i32 = arith.constant 0 : i32
    %c0_i32_0 = arith.constant 0 : i32
    %c0_i32_1 = arith.constant 0 : i32
    return %c0_i32, %c0_i32_0 : i32, i32
  }
  func.func @transform_11(%arg0: i32) -> (i32, i32) {
    %c0_i32 = arith.constant 0 : i32
    %c0_i32_0 = arith.constant 0 : i32
    %c0_i32_1 = arith.constant 0 : i32
    return %c0_i32, %c0_i32_0 : i32, i32
  }
  func.func @transform_12(%arg0: i32) -> (i32, i32) {
    %c0_i32 = arith.constant 0 : i32
    %c0_i32_0 = arith.constant 0 : i32
    %c0_i32_1 = arith.constant 0 : i32
    return %c0_i32, %c0_i32_0 : i32, i32
  }
  func.func @transform_13(%arg0: i32) -> (i32, i32, i32) {
    %c0_i32 = arith.constant 0 : i32
    %c0_i32_0 = arith.constant 0 : i32
    %c0_i32_1 = arith.constant 0 : i32
    return %arg0, %c0_i32, %c0_i32_0 : i32, i32, i32
  }
}

</mosaic_0001>

<bundles_post_ra>
// kernel: squeeze.4
= control target key start
LH: loop header
LB: loop body
LE: loop exit
PB: predicated region body
PF: predicated region fallthrough
CT: control target
= control target key end

     0   :  { %vm7_vm0 = vcmask 130048   ;;  %s49_s0 = inlined_call_operand.vmem [shape: f32[2,1,32], index: 0, kind: input, shape index: {}]   ;;  %s50_s1 = inlined_call_operand.vmem [shape: f32[2,2,16], index: 1, kind: output, shape index: {}]  }
   0x1   :  { %v4_v0 = vld [vmem:[%s49_s0] sm:$0x3]  ;;  %s29_s0 = smov 112  }
   0x2   :  { %5 = vst [vmem:[#allocation1] sm:$0x3] %v4_v0 }
   0x9   :  { %v9_v1 = vld [vmem:[#allocation1] sm:$0x3]  }
   0xa   :  { %v6_v2 = vld [vmem:[#allocation1] sm:$0x3]   ;;  %10 = vrot.lane.b32.xlu0 %v9_v1, %s29_s0 }
   0xb   :  { %8 = vst.msk [vmem:[#allocation0] ss:$8 sm:$0x3] %vm7_vm0, %v6_v2  }
  0x7c   :  { %v11_v3 = vpop.permute.xlu0 %10  }
  0x7d   :  { %14 = vst.msk [vmem:[#allocation0 + $0x1] ss:$8 sm:$0x3] %vm7_vm0, %v11_v3  }
  0x84   :  { %v17_v4 = vld [vmem:[#allocation0] sm:$0x3]  ;;  %v22_v5 = vld [vmem:[#allocation0 + $0x8] sm:$0x3] }
  0x85   :  { %20 = vst [vmem:[%s50_s1] sm:$0x3] %v17_v4 }
  0x86   :  { %27 = vst [vmem:[%s50_s1 + $0x2] sm:$0x3] %v22_v5 }

// kernel: model_select_forward.4
= control target key start
LH: loop header
LB: loop body
LE: loop exit
PB: predicated region body
PF: predicated region fallthrough
CT: control target
= control target key end

     0   :  { %s2921_s0 = inlined_call_operand.vmem [shape: f32[2,9,32], index: 0, kind: input, shape index: {}]   ;;  %s2922_s1 = inlined_call_operand.vmem [shape: f32[32,96], index: 1, kind: input, shape index: {}]   ;;  %s2923_s2 = inlined_call_operand.vmem [shape: f32[1,96], index: 2, kind: input, shape index: {}]   ;;  %s2924_s3 = inlined_call_operand.vmem [shape: f32[32,32], index: 3, kind: input, shape index: {}]   ;;  %s2925_s4 = inlined_call_operand.vmem [shape: f32[1,32], index: 4, kind: input, shape index: {}]   ;;  %s2926_s5 = inlined_call_operand.vmem [shape: f32[1,32], index: 5, kind: input, shape index: {}]   ;;  %s2927_s6 = inlined_call_operand.vmem [shape: f32[1,32], index: 6, kind: input, shape index: {}]   ;;  %s2928_s7 = inlined_call_operand.hbm [shape: f32[32,32], index: 7, kind: input, shape index: {}]   ;;  %s2929_s8 = inlined_call_operand.vmem [shape: f32[1,32], index: 8, kind: input, shape index: {}]   ;;  %s2930_s9 = inlined_call_operand.hbm [shape: f32[32,32], index: 9, kind: input, shape index: {}]   ;;  %s2931_s10 = inlined_call_operand.vmem [shape: f32[1,32], index: 10, kind: input, shape index: {}]   ;;  %s2932_s11 = inlined_call_operand.vmem [shape: f32[1,32], index: 11, kind: input, shape index: {}]   ;;  %s2933_s12 = inlined_call_operand.vmem [shape: f32[1,32], index: 12, kind: input, shape index: {}]   ;;  %s2934_s13 = inlined_call_operand.hbm [shape: f32[32,96], index: 13, kind: input, shape index: {}]   ;;  %s2935_s14 = inlined_call_operand.vmem [shape: f32[1,96], index: 14, kind: input, shape index: {}]   ;;  %s2936_s15 = inlined_call_operand.hbm [shape: f32[32,32], index: 15, kind: input, shape index: {}]   ;;  %s2937_s16 = inlined_call_operand.vmem [shape: f32[1,32], index: 16, kind: input, shape index: {}]   ;;  %s2938_s17 = inlined_call_operand.vmem [shape: f32[1,32], index: 17, kind: input, shape index: {}]   ;;  %s2939_s18 = inlined_call_operand.vmem [shape: f32[1,32], index: 18, kind: input, shape index: {}]   ;;  %s2940_s19 = inlined_call_operand.hbm [shape: f32[32,32], index: 19, kind: input, shape index: {}]   ;;  %s2941_s20 = inlined_call_operand.vmem [shape: f32[1,32], index: 20, kind: input, shape index: {}]   ;;  %s2942_s21 = inlined_call_operand.hbm [shape: f32[32,32], index: 21, kind: input, shape index: {}]   ;;  %s2943_s22 = inlined_call_operand.vmem [shape: f32[1,32], index: 22, kind: input, shape index: {}]   ;;  %s2944_s23 = inlined_call_operand.vmem [shape: f32[1,32], index: 23, kind: input, shape index: {}]   ;;  %s2945_s24 = inlined_call_operand.vmem [shape: f32[1,32], index: 24, kind: input, shape index: {}]   ;;  %s2946_s25 = inlined_call_operand.vmem [shape: f32[2,9,32], index: 25, kind: output, shape index: {0}]   ;;  %s2947_s26 = inlined_call_operand.vmem [shape: f32[2,2,9], index: 26, kind: output, shape index: {1}]  }
   0x1   :  { %2951 = sst [smem:[#allocation17_spill]] %s2921_s0 }
   0x2   :  { %2952 = sst [smem:[#allocation18_spill]] %s2922_s1 }
   0x3   :  { %2953 = sst [smem:[#allocation19_spill]] %s2923_s2 }
   0x4   :  { %2954 = sst [smem:[#allocation20_spill]] %s2924_s3 }
   0x5   :  { %2955 = sst [smem:[#allocation21_spill]] %s2925_s4 }
   0x6   :  { %2956 = sst [smem:[#allocation22_spill]] %s2926_s5 }
   0x7   :  { %2957 = sst [smem:[#allocation23_spill]] %s2927_s6 }
   0x8   :  { %2958 = sst [smem:[#allocation24_spill]] %s2928_s7 }
   0x9   :  { %2959 = sst [smem:[#allocation25_spill]] %s2929_s8 }
   0xa   :  { %2960 = sst [smem:[#allocation26_spill]] %s2930_s9 }
   0xb   :  { %2961 = sst [smem:[#allocation27_spill]] %s2931_s10 }
   0xc   :  { %2962 = sst [smem:[#allocation28_spill]] %s2936_s15 }
   0xd   :  { %2963 = sst [smem:[#allocation29_spill]] %s2945_s24 }
   0xe   :  { %2964 = sst [smem:[#allocation30_spill]] %s2946_s25 }
   0xf   :  { %32 = vsyncpa [#allocation3], 0 }
  0x10   :  { %33 = vsyncpa [#allocation5], 0 }
  0x11   :  { %34 = vsyncpa [#allocation8], 0 }
  0x12   :  { %35 = vsyncpa [#allocation11], 0  ;;  %s2587_s27 = smov 0  }
  0x13 LB: > { %2965 = sst [smem:[#allocation16_spill]] %s2435_s27  ;;  %s2593_s3 = sadd.s32 4294967295, %s2435_s27   ;;  %s2435_s27 = sphi %s2587_s27, %s41_s27  }
  0x14   : > { %p2021_p0 = scmp.ge.s32.totalorder %s2435_s27, 1  ;;  %p628_p1 = scmp.lt.s32.totalorder %s2435_s27, 3 }
  0x15   : > { %p2132_p2 = scmp.eq.s32.totalorder %s2593_s3, 0  ;;  %s2966_s8 = sld [smem:[#allocation26_spill]] }
  0x16   : > { %p2601_p3 = pnand %p2021_p0, %p628_p1  ;;  %s2968_s15 = sld [smem:[#allocation28_spill]] }
  0x17   : > { %s2437_s2 = smov [#allocation4]   ;;  %s2438_s6 = smov [#allocation7]  }
  0x18   : > { %p2113_p4 = pneg %p2601_p3  ;;  %s676_s5 = sshll.u32 %s2437_s2, 4  ;;  %s677_s5 = int_to_ptr.vmem [resolvable:$true] %s676_s5 }
  0x19   : > { %s716_s1 = sshll.u32 %s2438_s6, 4  ;;  %s2439_s9 = smov 128   ;;  %s717_s1 = int_to_ptr.vmem [resolvable:$true] %s716_s1 }
  0x1a   : > { %p2612_p5 = pnand %p2132_p2, %p2113_p4  ;;  %s2440_s2 = smov 8  }
  0x1b   : > { %s674_s4 = sshll.u32 %s2966_s8, 4  ;;  %s2970_s8 = sld [smem:[#allocation24_spill]]  ;;  %s675_s4 = int_to_ptr.hbm [resolvable:$true] %s674_s4 }
  0x1c   : > { %s714_s30 = sshll.u32 %s2968_s15, 4  ;;  %s2441_s15 = smov [#allocation2]   ;;  %s715_s30 = int_to_ptr.hbm [resolvable:$true] %s714_s30 }
  0x1d   : > { %2119 = dma.hbm_to_vmem [thread:$0]  (!%p2612_p5), %s675_s4, 512, %s677_s5, [#allocation5], %s2439_s9, %s2439_s9, %s2440_s2  }
  0x1e   : > { %2125 = dma.hbm_to_vmem [thread:$0]  (!%p2612_p5), %s715_s30, 512, %s717_s1, [#allocation8], %s2439_s9, %s2439_s9, %s2440_s2  }
  0x1f   : > { %s659_s27 = sshll.u32 %s2441_s15, 4  ;;  %s697_s6 = sshll.u32 %s2934_s13, 4  ;;  %s660_s27 = int_to_ptr.vmem [resolvable:$true] %s659_s27  ;;  %s698_s6 = int_to_ptr.hbm [resolvable:$true] %s697_s6 }
  0x20   : > { %s2442_s4 = smov [#allocation6]   ;;  %s2443_s15 = smov [#allocation9]  }
  0x21   : > { %s657_s0 = sshll.u32 %s2970_s8, 4  ;;  %s737_s8 = sshll.u32 %s2940_s19, 4  ;;  %s658_s0 = int_to_ptr.hbm [resolvable:$true] %s657_s0  ;;  %s738_s8 = int_to_ptr.hbm [resolvable:$true] %s737_s8 }
  0x22   : > { %2116 = dma.hbm_to_vmem [thread:$0]  (!%p2612_p5), %s658_s0, 512, %s660_s27, [#allocation3], %s2439_s9, %s2439_s9, %s2440_s2  }
  0x23   : > { %s699_s5 = sshll.u32 %s2442_s4, 4  ;;  %s739_s30 = sshll.u32 %s2443_s15, 4  ;;  %s700_s5 = int_to_ptr.vmem [resolvable:$true] %s699_s5  ;;  %s740_s30 = int_to_ptr.vmem [resolvable:$true] %s739_s30 }
  0x24   : > { %2122 = dma.hbm_to_vmem [thread:$0]  (!%p2612_p5), %s698_s6, 512, %s700_s5, [#allocation5], %s2439_s9, %s2439_s9, %s2440_s2  }
  0x25   : > { %s754_s25 = sshll.u32 %s2942_s21, 4  ;;  %s2444_s27 = smov [#allocation10]   ;;  %s755_s25 = int_to_ptr.hbm [resolvable:$true] %s754_s25 }
  0x26   : > { %2128 = dma.hbm_to_vmem [thread:$0]  (!%p2612_p5), %s738_s8, 512, %s740_s30, [#allocation8], %s2439_s9, %s2439_s9, %s2440_s2  }
  0x27   : > { %s756_s0 = sshll.u32 %s2444_s27, 4  ;;  %789 = sbr.rel (%p2601_p3) target bundleno = 3740 (0xe9c), region = 120  ;;  %s757_s0 = int_to_ptr.vmem [resolvable:$true] %s756_s0 }
  0x28   : > { %2131 = dma.hbm_to_vmem [thread:$0]  (!%p2612_p5), %s755_s25, 512, %s757_s0, [#allocation11], %s2439_s9, %s2439_s9, %s2440_s2  }
  0x2c   : > { %2418 = dma.done.wait (%p2132_p2), [#allocation3], 512  }
  0x2d   : > { %2420 = vsyncadd (%p2132_p2), [#allocation3], 4294966784 }
  0x2e   : > { %2422 = dma.done.wait (%p2132_p2), [#allocation5], 1024  }
  0x2f   : > { %2424 = vsyncadd (%p2132_p2), [#allocation5], 4294966272 }
  0x30   : > { %2426 = dma.done.wait (%p2132_p2), [#allocation8], 1024  }
  0x31   : > { %2428 = vsyncadd (%p2132_p2), [#allocation8], 4294966272 }
  0x32   : > { %2430 = dma.done.wait (%p2132_p2), [#allocation11], 512  }
  0x33   : > { %2432 = vsyncadd (%p2132_p2), [#allocation11], 4294966784  ;;  %p889_p6 = scmp.lt.s32.totalorder %s2593_s3, 1  ;;  %s2971_s2 = sld [smem:[#allocation18_spill]]  ;;  %vm913_vm0 = vcmask 261120   ;;  %vm949_vm1 = vcmask 130048  }
  0x34   : > { %s2972_s4 = sld [smem:[#allocation17_spill]]  ;;  %s2445_s10 = smov 112   ;;  %vm983_vm2 = vcmask 72704   ;;  %vm987_vm3 = vcmask 65536   ;;  %vm1018_vm4 = vcmask 1040384   ;;  %vm1195_vm5 = vcmask 253952  }
  0x35   : > { %s2984_s3 = smov (!%p889_p6, %s2593_s3), 1  ;;  %s2973_s0 = sld [smem:[#allocation19_spill]] }
  0x36   : > { %s2087_s29 = sshll.u32 %s2984_s3, 4  ;;  %s2446_s9 = smov 80  }
  0x37   : > { %s2447_s6 = smov 96   ;;  %s2448_s7 = smov 64  }
  0x38   : > { %s2449_s28 = smov 48   ;;  %s2450_s25 = smov 16  }
  0x39   : > { %v908_v0 = vld [vmem:[%s2971_s2 + $0x18] sm:$0xff]  ;;  %v907_v1 = vld [vmem:[%s2971_s2 + $0x10] sm:$0xff]  ;;  %v906_v2 = vld [vmem:[%s2971_s2 + $0x8] sm:$0xff]  ;;  %s2975_s15 = sld [smem:[#allocation21_spill]] }
  0x3a   : > { %s893_s5 = scalar_lea.vmem %s2972_s4, %s2087_s29  ;;  %932 = vmatpush.msra.mxu0 %v908_v0  ;;  %v905_v3 = vld [vmem:[%s2971_s2] sm:$0xff]  ;;  %s2976_s24 = sld [smem:[#allocation22_spill]] }
  0x3b   : > { %v2680_v4 = vld [vmem:[%s893_s5] sm:$0xff]  ;;  %v2684_v5 = vld [vmem:[%s893_s5 + $0x8] sm:$0x1]  ;;  %s2974_s5 = sld [smem:[#allocation20_spill]] }
  0x3c   : > { %933 = vmatpush.msra.mxu0 %v907_v1  ;;  %v2167_v6 = vld [vmem:[%s2973_s0] ss:$0 sm:$0xff]  ;;  %s2977_s8 = sld [smem:[#allocation23_spill]] }
  0x3d   : > { %s2978_s30 = sld [smem:[#allocation25_spill]] }
  0x3e   : > { %934 = vmatpush.msra.mxu0 %v906_v2  ;;  %s2979_s27 = sld [smem:[#allocation27_spill]] }
  0x40   : > { %935 = vmatpush.msra.mxu0 %v905_v3 }
  0x41   : > { %2041 = vmatmul.msk.f32.vlgmr.msra.gmra.mxu0 %vm913_vm0, %v2680_v4  ;;  %v1156_v3 = vld [vmem:[%s2974_s5 + $0x18] sm:$0xff] }
  0x42   : > { %1179 = vmatpush.msrb.mxu0 %v1156_v3 }
  0x49   : > { %2042 = vmatmul.msk.f32.gmra.mxu0 %vm913_vm0, %v2684_v5 }
  0xbe   : > { %v937_v7 = vpop.f32.mrf.mxu0 }
  0xbf   : > { %v2691_v8 = vadd.f32 %v2167_v6, %v937_v7  ;;  %v1154_v7 = vld [vmem:[%s2974_s5 + $0x8] sm:$0xff] }
  0xc1   : > { %1044 = vrot.lane.b32.xlu2 %v2691_v8, %s2445_s10 }
  0xc6   : > { %v940_v9 = vpop.f32.mrf.mxu0 }
  0xc7   : > { %v2695_v10 = vadd.f32 %v2167_v6, %v940_v9  ;;  %v1155_v6 = vld [vmem:[%s2974_s5 + $0x10] sm:$0xff] }
  0xc8   : > { %1180 = vmatpush.msrb.mxu0 %v1155_v6 }
  0xc9   : > { %1050 = vrot.lane.b32.xlu1 %v2695_v10, %s2446_s9  ;;  %947 = vrot.lane.b32.xlu0 %v2695_v10, %s2447_s6 }
  0xca   : > { %1046 = vrot.lane.b32.xlu2 %v2695_v10, %s2445_s10  ;;  %1181 = vmatpush.msrb.mxu0 %v1154_v7 }
  0xd1   : > { %1048 = vrot.lane.b32.xlu1 %v2691_v8, %s2446_s9  ;;  %945 = vrot.lane.b32.xlu0 %v2691_v8, %s2447_s6 }
 0x11b   : > { %v1045_v15 = vpop.permute.xlu2 %1044 }
 0x124   : > { %v1047_v16 = vpop.permute.xlu2 %1046 }
 0x13b   : > { %v1051_v11 = vpop.permute.xlu1 %1050  ;;  %v948_v12 = vpop.permute.xlu0 %947 }
 0x13c   : > { %2043 = vmatpush.xpose.msk.msra.mxu1 %vm949_vm1, %v948_v12  ;;  %2050 = vmatpush.xpose.msk.msra.mxu3 %vm949_vm1, %v1051_v11  ;;  %v1153_v12 = vld [vmem:[%s2974_s5] sm:$0xff] }
 0x13d   : > { %1182 = vmatpush.msrb.mxu0 %v1153_v12 }
 0x143   : > { %v1049_v13 = vpop.permute.xlu1 %1048  ;;  %v946_v14 = vpop.permute.xlu0 %945 }
 0x144   : > { %2044 = vmatpush.xpose.msk.msra.mxu1 %vm949_vm1, %v946_v14  ;;  %2051 = vmatpush.xpose.msk.msra.mxu3 %vm949_vm1, %v1049_v13 }
 0x147   : > { %2045 = vmatmul.msk.f32.vlgmr.msra.gmra.mxu1 %vm949_vm1, %v2691_v8  ;;  %2052 = vmatmul.msk.f32.vlgmr.msra.gmra.mxu3 %vm949_vm1, %v1045_v15 }
 0x14f   : > { %2046 = vmatmul.msk.f32.gmra.mxu1 %vm949_vm1, %v2695_v10  ;;  %2053 = vmatmul.msk.f32.gmra.mxu3 %vm949_vm1, %v1047_v16 }
 0x1c4   : > { %v975_v17 = vpop.f32.mrf.mxu1 }
 0x1c5   : > { %v981_v18 = vmul.f32 0.25, %v975_v17  ;;  %v2168_v17 = vld [vmem:[%s2975_s15] ss:$0 sm:$0xff] }
 0x1c7   : > { %v984_v19 = vsel %vm983_vm2, %v981_v18, -inf }
 0x1c8   : > { %985 = vmax.xlane.f32.xlu0 %v984_v19 }
 0x1ca   : > { %v1077_v20 = vpop.f32.mrf.mxu3 }
 0x1cb   : > { %v1083_v21 = vmul.f32 0.25, %v1077_v20 }
 0x1cc   : > { %v978_v22 = vpop.f32.mrf.mxu1 }
 0x1cd   : > { %v982_v23 = vmul.f32 0.25, %v978_v22  ;;  %v1085_v24 = vsel %vm983_vm2, %v1083_v21, -inf }
 0x1ce   : > { %1086 = vmax.xlane.f32.xlu2 %v1085_v24 }
 0x1cf   : > { %v988_v25 = vsel %vm987_vm3, %v982_v23, -inf }
 0x1d0   : > { %989 = vmax.xlane.f32.xlu1 %v988_v25 }
 0x1d2   : > { %v1080_v26 = vpop.f32.mrf.mxu3 }
 0x1d3   : > { %v1084_v27 = vmul.f32 0.25, %v1080_v26  ;;  %v2451_v26 = vmov 32.0  }
 0x1d5   : > { %v1088_v28 = vsel %vm987_vm3, %v1084_v27, -inf }
 0x1d6   : > { %1089 = vmax.xlane.f32.xlu2 %v1088_v28 }
 0x1dc   : > { %1007 = vrot.lane.b32.xlu0 %v2691_v8, %s2448_s7 }
 0x1e9   : > { %1009 = vrot.lane.b32.xlu1 %v2695_v10, %s2448_s7 }
 0x23b   : > { %v986_v29 = vpop.xlane.xlu0 %985 }
 0x23c   : > { %v991_v30 = vsub.f32 %v981_v18, %v986_v29 }
 0x23e   : > { %v993_v31 = vmul.f32 1.442695, %v991_v30 }
 0x240   : > { %2183 = vpow2.f32 %v993_v31 }
 0x241   : > { %v1087_v32 = vpop.xlane.xlu2 %1086 }
 0x242   : > { %v1091_v33 = vsub.f32 %v1083_v21, %v1087_v32 }
 0x243   : > { %v990_v34 = vpop.xlane.xlu1 %989 }
 0x244   : > { %v1093_v35 = vmul.f32 1.442695, %v1091_v33  ;;  %v992_v36 = vsub.f32 %v982_v23, %v990_v34 }
 0x246   : > { %v2184_v37 = vpop.eup %2183  ;;  %2185 = vpow2.f32 %v1093_v35  ;;  %v995_v39 = vmul.f32 1.442695, %v992_v36 }
 0x247   : > { %v997_v38 = vsel %vm983_vm2, %v2184_v37, 0.0 }
 0x248   : > { %998 = vadd.xlane.f32.xlu0 %v997_v38  ;;  %2187 = vpow2.f32 %v995_v39 }
 0x249   : > { %v1090_v40 = vpop.xlane.xlu2 %1089 }
 0x24a   : > { %v1092_v41 = vsub.f32 %v1084_v27, %v1090_v40 }
 0x24c   : > { %v2186_v42 = vpop.eup %2185  ;;  %v1095_v43 = vmul.f32 1.442695, %v1092_v41  ;;  %v1259_v41 = vld [vmem:[#allocation2 + $0x18] sm:$0xff] }
 0x24d   : > { %v1097_v44 = vsel %vm983_vm2, %v2186_v42, 0.0  ;;  %1282 = vmatpush.msrb.mxu1 %v1259_v41  ;;  %v1396_v41 = vld [vmem:[#allocation6 + $0x18] sm:$0xff] }
 0x24e   : > { %2189 = vpow2.f32 %v1095_v43  ;;  %1098 = vadd.xlane.f32.xlu2 %v1097_v44  ;;  %v2188_v45 = vpop.eup %2187  ;;  %v1008_v50 = vpop.permute.xlu0 %1007  ;;  %v1257_v43 = vld [vmem:[#allocation2 + $0x8] sm:$0xff]  ;;  %v1256_v44 = vld [vmem:[#allocation2] sm:$0xff] }
 0x24f   : > { %v1000_v48 = vsel %vm987_vm3, %v2188_v45, 0.0 }
 0x254   : > { %v2190_v46 = vpop.eup %2189 }
 0x255   : > { %v1100_v47 = vsel %vm987_vm3, %v2190_v46, 0.0 }
 0x256   : > { %1101 = vadd.xlane.f32.xlu1 %v1100_v47  ;;  %1001 = vadd.xlane.f32.xlu2 %v1000_v48  ;;  %v1298_v48 = vld [vmem:[#allocation4 + $0x18] sm:$0xff] }
 0x257   : > { %1321 = vmatpush.msrb.mxu3 %v1298_v48 }
 0x25b   : > { %v1010_v49 = vpop.permute.xlu1 %1009 }
 0x25c   : > { %1107 = vrot.lane.b32.xlu0 %v2691_v8, %s2449_s28  ;;  %2047 = vmatpush.msk.msra.mxu2 %vm1018_vm4, %v1010_v49 }
 0x25e   : > { %1036 = vmatpush.msra.mxu2 %v1008_v50 }
 0x26e   : > { %1109 = vrot.lane.b32.xlu2 %v2695_v10, %s2449_s28 }
 0x2bb   : > { %v999_v51 = vpop.xlane.xlu0 %998 }
 0x2bc   : > { %2191 = vrcp.f32 %v999_v51 }
 0x2c1   : > { %v1099_v52 = vpop.xlane.xlu2 %1098 }
 0x2c2   : > { %v2192_v53 = vpop.eup %2191  ;;  %2193 = vrcp.f32 %v1099_v52 }
 0x2c3   : > { %v1005_v54 = vmul.f32 %v2192_v53, %v2184_v37 }
 0x2c5   : > { %2048 = vmatmul.msk.f32.vlgmr.msra.gmra.mxu2 %vm983_vm2, %v1005_v54 }
 0x2c8   : > { %v2194_v55 = vpop.eup %2193 }
 0x2c9   : > { %v1002_v56 = vpop.xlane.xlu2 %1001  ;;  %v1105_v57 = vmul.f32 %v2194_v55, %v2186_v42  ;;  %v1102_v0 = vpop.xlane.xlu1 %1101  ;;  %v1258_v42 = vld [vmem:[#allocation2 + $0x10] sm:$0xff] }
 0x2ca   : > { %2195 = vrcp.f32 %v1002_v56  ;;  %1283 = vmatpush.msrb.mxu1 %v1258_v42  ;;  %v1395_v42 = vld [vmem:[#allocation6 + $0x10] sm:$0xff] }
 0x2cb   : > { %v1390_v58 = vrot.slane %v1105_v57, 7  ;;  %2197 = vrcp.f32 %v1102_v0 }
 0x2cc   : > { %2199 = vrcp.f32 %v2451_v26  ;;  %1284 = vmatpush.msrb.mxu1 %v1257_v43  ;;  %v1394_v43 = vld [vmem:[#allocation6 + $0x8] sm:$0xff] }
 0x2cd   : > { %v2736_v59 = vsel %vm1018_vm4, %v1005_v54, %v1390_v58 }
 0x2ce   : > { %v1108_v63 = vpop.permute.xlu0 %1107  ;;  %1285 = vmatpush.msrb.mxu1 %v1256_v44  ;;  %v1393_v44 = vld [vmem:[#allocation6] sm:$0xff] }
 0x2d0   : > { %v2196_v60 = vpop.eup %2195 }
 0x2d1   : > { %v1110_v61 = vpop.permute.xlu2 %1109  ;;  %v1006_v62 = vmul.f32 %v2196_v60, %v2188_v45  ;;  %v2198_v1 = vpop.eup %2197 }
 0x2d2   : > { %2054 = vmatpush.msk.msrb.mxu2 %vm1018_vm4, %v1110_v61  ;;  %v1106_v2 = vmul.f32 %v2198_v1, %v2190_v46  ;;  %v2200_v27 = vpop.eup %2199  ;;  %v2169_v61 = vld [vmem:[%s2976_s24] ss:$0 sm:$0xff] }
 0x2d3   : > { %2049 = vmatmul.msk.f32.gmra.mxu2 %vm983_vm2, %v1006_v62  ;;  %v1200_v28 = vmul.f32 32.0, %v2200_v27  ;;  %vm1204_vm6 = vweird.f32 %v2200_v27  ;;  %v2170_v1 = vld [vmem:[%s2977_s8] ss:$0 sm:$0xff] }
 0x2d4   : > { %1135 = vmatpush.msrb.mxu2 %v1108_v63 }
 0x2d5   : > { %v1201_v29 = vsub.f32 1.0, %v1200_v28 }
 0x2d6   : > { %1419 = vmatpush.msra.mxu2 %v1396_v41 }
 0x2d7   : > { %v1202_v30 = vmul.f32 %v2200_v27, %v1201_v29 }
 0x2d8   : > { %1420 = vmatpush.msra.mxu2 %v1395_v42 }
 0x2d9   : > { %v1203_v31 = vadd.f32 %v2200_v27, %v1202_v30 }
 0x2da   : > { %1421 = vmatpush.msra.mxu2 %v1394_v43 }
 0x2db   : > { %2055 = vmatmul.msk.f32.vlgmr.msrb.gmra.mxu2 %vm983_vm2, %v1105_v57 }
 0x2dc   : > { %1422 = vmatpush.msra.mxu2 %v1393_v44 }
 0x2e3   : > { %2056 = vmatmul.msk.f32.gmra.mxu2 %vm983_vm2, %v1106_v2 }
 0x348   : > { %v1038_v8 = vpop.f32.mrf.mxu2 }
 0x356   : > { %v1041_v9 = vpop.f32.mrf.mxu2 }
 0x35e   : > { %v1137_v10 = vpop.f32.mrf.mxu2 }
 0x35f   : > { %1145 = vrot.lane.b32.xlu0 %v1137_v10, %s2450_s25 }
 0x366   : > { %v1140_v11 = vpop.f32.mrf.mxu2 }
 0x367   : > { %1147 = vrot.lane.b32.xlu0 %v1140_v11, %s2450_s25 }
 0x3d1   : > { %v1146_v13 = vpop.permute.xlu0 %1145 }
 0x3d2   : > { %v1151_v14 = vsel %vm949_vm1, %v1038_v8, %v1146_v13  ;;  %v1297_v13 = vld [vmem:[#allocation4 + $0x10] sm:$0xff] }
 0x3d3   : > { %2057 = vmatmul.msk.f32.vlgmr.msrb.gmra.mxu0 %vm913_vm0, %v1151_v14  ;;  %1322 = vmatpush.msrb.mxu3 %v1297_v13  ;;  %v1296_v14 = vld [vmem:[#allocation4 + $0x8] sm:$0xff] }
 0x3d5   : > { %1323 = vmatpush.msrb.mxu3 %v1296_v14 }
 0x3d9   : > { %v1148_v15 = vpop.permute.xlu0 %1147 }
 0x3da   : > { %v1152_v16 = vsel %vm949_vm1, %v1041_v9, %v1148_v15  ;;  %v1295_v15 = vld [vmem:[#allocation4] sm:$0xff] }
 0x3db   : > { %2058 = vmatmul.msk.f32.gmra.mxu0 %vm913_vm0, %v1152_v16  ;;  %1324 = vmatpush.msrb.mxu3 %v1295_v15  ;;  %v2171_v16 = vld [vmem:[%s2978_s30] ss:$0 sm:$0xff] }
 0x450   : > { %v1184_v18 = vpop.f32.mrf.mxu0 }
 0x451   : > { %v1185_v19 = vadd.f32 %v2168_v17, %v1184_v18 }
 0x453   : > { %v1190_v20 = vadd.f32 %v1185_v19, %v2680_v4  ;;  %v2767_v4 = vsel %vm1204_vm6, %v2200_v27, %v1203_v31 }
 0x455   : > { %v1192_v21 = vsel %vm913_vm0, %v1190_v20, 0.0 }
 0x456   : > { %1193 = vadd.xlane.f32.xlu2 %v1192_v21 }
 0x458   : > { %v1187_v22 = vpop.f32.mrf.mxu0 }
 0x459   : > { %v1188_v23 = vadd.f32 %v2168_v17, %v1187_v22 }
 0x45b   : > { %v1191_v24 = vadd.f32 %v1188_v23, %v2684_v5  ;;  %v2172_v23 = vld [vmem:[%s2979_s27] ss:$0 sm:$0xff]  ;;  %s2981_s27 = sld [smem:[#allocation30_spill]] }
 0x45d   : > { %v1196_v25 = vsel %vm1195_vm5, %v1191_v24, 0.0 }
 0x45e   : > { %1197 = vadd.xlane.f32.xlu0 %v1196_v25 }
 0x461   : > { %s898_s0 = scalar_lea.vmem %s2981_s27, %s2087_s29 }
 0x4c9   : > { %v1194_v32 = vpop.xlane.xlu2 %1193 }
 0x4ca   : > { %v1206_v33 = vmul.f32 %v2767_v4, %v1194_v32 }
 0x4cc   : > { %v1208_v34 = vsub.f32 %v1190_v20, %v1206_v33 }
 0x4ce   : > { %v1210_v35 = vmul.f32 %v1208_v34, %v1208_v34 }
 0x4d0   : > { %v1212_v5 = vsel %vm913_vm0, %v1210_v35, 0.0 }
 0x4d1   : > { %1213 = vadd.xlane.f32.xlu1 %v1212_v5  ;;  %v1198_v36 = vpop.xlane.xlu0 %1197 }
 0x4d2   : > { %v1207_v37 = vmul.f32 %v2767_v4, %v1198_v36 }
 0x4d4   : > { %v1209_v38 = vsub.f32 %v1191_v24, %v1207_v37 }
 0x4d6   : > { %v1211_v39 = vmul.f32 %v1209_v38, %v1209_v38 }
 0x4d8   : > { %v1215_v40 = vsel %vm1195_vm5, %v1211_v39, 0.0 }
 0x4d9   : > { %1216 = vadd.xlane.f32.xlu1 %v1215_v40 }
 0x544   : > { %v1214_v45 = vpop.xlane.xlu1 %1213 }
 0x545   : > { %v1218_v46 = vmul.f32 %v1214_v45, %v2767_v4 }
 0x547   : > { %v1220_v47 = vadd.f32 1e-12, %v1218_v46 }
 0x549   : > { %2201 = vrsqrt.f32 %v1220_v47  ;;  %vm1228_vm8 = vweird.f32 %v1220_v47 }
 0x54c   : > { %v1217_v49 = vpop.xlane.xlu1 %1216 }
 0x54d   : > { %v1219_v50 = vmul.f32 %v1217_v49, %v2767_v4 }
 0x54f   : > { %v2202_v51 = vpop.eup %2201  ;;  %v1221_v52 = vadd.f32 1e-12, %v1219_v50 }
 0x550   : > { %v1223_v53 = vmul.f32 %v2202_v51, %v1220_v47  ;;  %vm1229_vm7 = vweird.f32 %v2202_v51 }
 0x551   : > { %2203 = vrsqrt.f32 %v1221_v52  ;;  %vm1230_vm9 = vmor %vm1228_vm8, %vm1229_vm7  ;;  %vm1238_vm11 = vweird.f32 %v1221_v52 }
 0x552   : > { %v1224_v54 = vmul.f32 %v2202_v51, %v1223_v53 }
 0x554   : > { %v1225_v55 = vmul.f32 0.5, %v1224_v54 }
 0x556   : > { %v1226_v56 = vsub.f32 1.5, %v1225_v55 }
 0x557   : > { %v2204_v57 = vpop.eup %2203 }
 0x558   : > { %v1227_v58 = vmul.f32 %v2202_v51, %v1226_v56  ;;  %v1233_v60 = vmul.f32 %v2204_v57, %v1221_v52  ;;  %vm1239_vm10 = vweird.f32 %v2204_v57 }
 0x559   : > { %vm1240_vm12 = vmor %vm1238_vm11, %vm1239_vm10 }
 0x55a   : > { %v1231_v62 = vsel %vm1230_vm9, %v2202_v51, %v1227_v58  ;;  %v1234_v63 = vmul.f32 %v2204_v57, %v1233_v60  ;;  %v2173_v60 = vld [vmem:[%s2932_s11] ss:$0 sm:$0xff] }
 0x55b   : > { %v1242_v0 = vmul.f32 %v1231_v62, %v1208_v34 }
 0x55c   : > { %v1235_v2 = vmul.f32 0.5, %v1234_v63 }
 0x55d   : > { %v1248_v3 = vmul.f32 %v2169_v61, %v1242_v0  ;;  %v2174_v0 = vld [vmem:[%s2933_s12] ss:$0 sm:$0xff] }
 0x55e   : > { %v1236_v6 = vsub.f32 1.5, %v1235_v2 }
 0x55f   : > { %v1254_v7 = vadd.f32 %v2170_v1, %v1248_v3 }
 0x560   : > { %v1237_v8 = vmul.f32 %v2204_v57, %v1236_v6 }
 0x561   : > { %2059 = vmatmul.msk.f32.vlgmr.msrb.gmra.mxu1 %vm913_vm0, %v1254_v7 }
 0x562   : > { %v1241_v9 = vsel %vm1240_vm12, %v2204_v57, %v1237_v8 }
 0x563   : > { %v1243_v10 = vmul.f32 %v1241_v9, %v1209_v38 }
 0x565   : > { %v1249_v11 = vmul.f32 %v2169_v61, %v1243_v10 }
 0x567   : > { %v1255_v12 = vadd.f32 %v2170_v1, %v1249_v11 }
 0x569   : > { %2060 = vmatmul.msk.f32.gmra.mxu1 %vm913_vm0, %v1255_v12 }
 0x5de   : > { %v1287_v17 = vpop.f32.mrf.mxu1 }
 0x5df   : > { %v1288_v18 = vadd.f32 %v2171_v16, %v1287_v17 }
 0x5e1   : > { %v1293_v19 = vmax.f32 %v1288_v18, 0.0 }
 0x5e3   : > { %2061 = vmatmul.msk.f32.vlgmr.msrb.gmra.mxu3 %vm913_vm0, %v1293_v19 }
 0x5e6   : > { %v1290_v20 = vpop.f32.mrf.mxu1 }
 0x5e7   : > { %v1291_v21 = vadd.f32 %v2171_v16, %v1290_v20 }
 0x5e9   : > { %v1294_v22 = vmax.f32 %v1291_v21, 0.0 }
 0x5eb   : > { %2062 = vmatmul.msk.f32.gmra.mxu3 %vm913_vm0, %v1294_v22 }
 0x666   : > { %v1326_v24 = vpop.f32.mrf.mxu3 }
 0x667   : > { %v1327_v25 = vadd.f32 %v2172_v23, %v1326_v24 }
 0x669   : > { %v1332_v26 = vadd.f32 %v1327_v25, %v1254_v7 }
 0x66b   : > { %v1334_v27 = vsel %vm913_vm0, %v1332_v26, 0.0 }
 0x66c   : > { %1335 = vadd.xlane.f32.xlu1 %v1334_v27 }
 0x66e   : > { %v1329_v28 = vpop.f32.mrf.mxu3 }
 0x66f   : > { %v1330_v29 = vadd.f32 %v2172_v23, %v1329_v28 }
 0x671   : > { %v1333_v30 = vadd.f32 %v1330_v29, %v1255_v12  ;;  %v2175_v12 = vld [vmem:[%s2935_s14] ss:$0 sm:$0xff] }
 0x673   : > { %v1337_v31 = vsel %vm1195_vm5, %v1333_v30, 0.0 }
 0x674   : > { %1338 = vadd.xlane.f32.xlu2 %v1337_v31 }
 0x6df   : > { %v1336_v32 = vpop.xlane.xlu1 %1335 }
 0x6e0   : > { %v1340_v33 = vmul.f32 %v1336_v32, %v2767_v4 }
 0x6e2   : > { %v1342_v34 = vsub.f32 %v1332_v26, %v1340_v33 }
 0x6e4   : > { %v1344_v35 = vmul.f32 %v1342_v34, %v1342_v34 }
 0x6e6   : > { %v1346_v5 = vsel %vm913_vm0, %v1344_v35, 0.0 }
 0x6e7   : > { %v1339_v36 = vpop.xlane.xlu2 %1338  ;;  %1347 = vadd.xlane.f32.xlu1 %v1346_v5 }
 0x6e8   : > { %v1341_v37 = vmul.f32 %v1339_v36, %v2767_v4 }
 0x6ea   : > { %v1343_v38 = vsub.f32 %v1333_v30, %v1341_v37 }
 0x6ec   : > { %v1345_v39 = vmul.f32 %v1343_v38, %v1343_v38 }
 0x6ee   : > { %v1349_v40 = vsel %vm1195_vm5, %v1345_v39, 0.0 }
 0x6ef   : > { %1350 = vadd.xlane.f32.xlu0 %v1349_v40 }
 0x75a   : > { %v1348_v45 = vpop.xlane.xlu1 %1347 }
 0x75b   : > { %v1352_v46 = vmul.f32 %v1348_v45, %v2767_v4 }
 0x75d   : > { %v1354_v47 = vadd.f32 1e-12, %v1352_v46 }
 0x75f   : > { %2205 = vrsqrt.f32 %v1354_v47  ;;  %vm1362_vm14 = vweird.f32 %v1354_v47 }
 0x762   : > { %v1351_v48 = vpop.xlane.xlu0 %1350 }
 0x763   : > { %v1353_v49 = vmul.f32 %v1351_v48, %v2767_v4 }
 0x765   : > { %v2206_v50 = vpop.eup %2205  ;;  %v1355_v51 = vadd.f32 1e-12, %v1353_v49 }
 0x766   : > { %v1357_v52 = vmul.f32 %v2206_v50, %v1354_v47  ;;  %vm1363_vm13 = vweird.f32 %v2206_v50 }
 0x767   : > { %2207 = vrsqrt.f32 %v1355_v51  ;;  %vm1364_vm15 = vmor %vm1362_vm14, %vm1363_vm13  ;;  %vm1372_vm7 = vweird.f32 %v1355_v51 }
 0x768   : > { %v1358_v53 = vmul.f32 %v2206_v50, %v1357_v52 }
 0x76a   : > { %v1359_v54 = vmul.f32 0.5, %v1358_v53 }
 0x76c   : > { %v1360_v55 = vsub.f32 1.5, %v1359_v54 }
 0x76d   : > { %v2208_v56 = vpop.eup %2207 }
 0x76e   : > { %v1361_v57 = vmul.f32 %v2206_v50, %v1360_v55  ;;  %v1367_v58 = vmul.f32 %v2208_v56, %v1355_v51  ;;  %vm1373_vm6 = vweird.f32 %v2208_v56 }
 0x76f   : > { %vm1374_vm8 = vmor %vm1372_vm7, %vm1373_vm6 }
 0x770   : > { %v1365_v61 = vsel %vm1364_vm15, %v2206_v50, %v1361_v57  ;;  %v1368_v62 = vmul.f32 %v2208_v56, %v1367_v58 }
 0x771   : > { %v1376_v63 = vmul.f32 %v1365_v61, %v1342_v34 }
 0x772   : > { %v1369_v1 = vmul.f32 0.5, %v1368_v62 }
 0x773   : > { %v1382_v2 = vmul.f32 %v2173_v60, %v1376_v63 }
 0x774   : > { %v1370_v3 = vsub.f32 1.5, %v1369_v1 }
 0x775   : > { %v2805_v6 = vadd.f32 %v2174_v0, %v1382_v2 }
 0x776   : > { %v1371_v7 = vmul.f32 %v2208_v56, %v1370_v3 }
 0x777   : > { %2063 = vmatmul.msk.f32.vlgmr.msra.gmra.mxu2 %vm913_vm0, %v2805_v6 }
 0x778   : > { %v1375_v8 = vsel %vm1374_vm8, %v2208_v56, %v1371_v7 }
 0x779   : > { %v1377_v9 = vmul.f32 %v1375_v8, %v1343_v38 }
 0x77b   : > { %v1383_v10 = vmul.f32 %v2173_v60, %v1377_v9 }
 0x77d   : > { %v2809_v11 = vadd.f32 %v2174_v0, %v1383_v10 }
 0x77f   : > { %2064 = vmatmul.msk.f32.gmra.mxu2 %vm913_vm0, %v2809_v11 }
 0x7fa   : > { %v1424_v13 = vpop.f32.mrf.mxu2 }
 0x7fb   : > { %v1425_v14 = vadd.f32 %v2175_v12, %v1424_v13 }
 0x7fd   : > { %1527 = vrot.lane.b32.xlu0 %v1425_v14, %s2445_s10  ;;  %1531 = vrot.lane.b32.xlu1 %v1425_v14, %s2446_s9 }
 0x802   : > { %v1427_v15 = vpop.f32.mrf.mxu2 }
 0x803   : > { %v2818_v16 = vadd.f32 %v2175_v12, %v1427_v15  ;;  %v1638_v15 = vld [vmem:[#allocation7 + $0x10] sm:$0xff] }
 0x805   : > { %1533 = vrot.lane.b32.xlu2 %v2818_v16, %s2446_s9  ;;  %1434 = vrot.lane.b32.xlu0 %v2818_v16, %s2447_s6 }
 0x806   : > { %1432 = vrot.lane.b32.xlu1 %v1425_v14, %s2447_s6 }
 0x80d   : > { %1529 = vrot.lane.b32.xlu2 %v2818_v16, %s2445_s10  ;;  %s2040_s10 = sshll.u32 %s2984_s3, 1 }
 0x85f   : > { %v1534_v17 = vpop.permute.xlu2 %1533 }
 0x860   : > { %2072 = vmatpush.xpose.msk.msra.mxu3 %vm949_vm1, %v1534_v17 }
 0x867   : > { %v1530_v21 = vpop.permute.xlu2 %1529 }
 0x86f   : > { %v1528_v18 = vpop.permute.xlu0 %1527  ;;  %v1532_v19 = vpop.permute.xlu1 %1531 }
 0x870   : > { %2073 = vmatpush.xpose.msk.msra.mxu3 %vm949_vm1, %v1532_v19 }
 0x873   : > { %2074 = vmatmul.msk.f32.vlgmr.msra.gmra.mxu3 %vm949_vm1, %v1528_v18 }
 0x877   : > { %v1435_v20 = vpop.permute.xlu0 %1434 }
 0x878   : > { %2065 = vmatpush.xpose.msk.msra.mxu0 %vm949_vm1, %v1435_v20  ;;  %v1433_v22 = vpop.permute.xlu1 %1432 }
 0x87b   : > { %2075 = vmatmul.msk.f32.gmra.mxu3 %vm949_vm1, %v1530_v21 }
 0x87c   : > { %2066 = vmatpush.xpose.msk.msra.mxu0 %vm949_vm1, %v1433_v22 }
 0x87f   : > { %2067 = vmatmul.msk.f32.vlgmr.msra.gmra.mxu0 %vm949_vm1, %v1425_v14 }
 0x887   : > { %2068 = vmatmul.msk.f32.gmra.mxu0 %vm949_vm1, %v2818_v16 }
 0x8f6   : > { %v1560_v23 = vpop.f32.mrf.mxu3 }
 0x8f7   : > { %v1566_v24 = vmul.f32 0.25, %v1560_v23 }
 0x8f9   : > { %v1568_v25 = vsel %vm983_vm2, %v1566_v24, -inf }
 0x8fa   : > { %1569 = vmax.xlane.f32.xlu2 %v1568_v25  ;;  %v2176_v25 = vld [vmem:[%s2937_s16] ss:$0 sm:$0xff] }
 0x8fc   : > { %v1461_v26 = vpop.f32.mrf.mxu0 }
 0x8fd   : > { %v1467_v27 = vmul.f32 0.25, %v1461_v26 }
 0x8fe   : > { %v1563_v28 = vpop.f32.mrf.mxu3 }
 0x8ff   : > { %v1567_v29 = vmul.f32 0.25, %v1563_v28  ;;  %v1469_v30 = vsel %vm983_vm2, %v1467_v27, -inf }
 0x900   : > { %1470 = vmax.xlane.f32.xlu1 %v1469_v30 }
 0x901   : > { %v1571_v31 = vsel %vm987_vm3, %v1567_v29, -inf }
 0x902   : > { %1572 = vmax.xlane.f32.xlu0 %v1571_v31 }
 0x904   : > { %v1464_v32 = vpop.f32.mrf.mxu0 }
 0x905   : > { %v1468_v33 = vmul.f32 0.25, %v1464_v32 }
 0x907   : > { %v1472_v34 = vsel %vm987_vm3, %v1468_v33, -inf }
 0x90a   : > { %1473 = vmax.xlane.f32.xlu0 %v1472_v34 }
 0x919   : > { %1592 = vrot.lane.b32.xlu1 %v2818_v16, %s2449_s28 }
 0x91e   : > { %1590 = vrot.lane.b32.xlu0 %v1425_v14, %s2449_s28  ;;  %s2980_s28 = sld [smem:[#allocation29_spill]] }
 0x926   : > { %1491 = vrot.lane.b32.xlu0 %v1425_v14, %s2448_s7  ;;  %v1639_v14 = vld [vmem:[#allocation7 + $0x18] sm:$0xff] }
 0x927   : > { %1662 = vmatpush.msrb.mxu0 %v1639_v14 }
 0x929   : > { %1663 = vmatpush.msrb.mxu0 %v1638_v15  ;;  %v1772_v15 = vld [vmem:[#allocation10 + $0x10] sm:$0xff] }
 0x96d   : > { %v1570_v35 = vpop.xlane.xlu2 %1569 }
 0x96e   : > { %v1574_v5 = vsub.f32 %v1566_v24, %v1570_v35 }
 0x970   : > { %v1576_v36 = vmul.f32 1.442695, %v1574_v5 }
 0x972   : > { %2209 = vpow2.f32 %v1576_v36 }
 0x973   : > { %v1471_v37 = vpop.xlane.xlu1 %1470 }
 0x974   : > { %v1475_v41 = vsub.f32 %v1467_v27, %v1471_v37 }
 0x975   : > { %v1573_v38 = vpop.xlane.xlu0 %1572 }
 0x976   : > { %v1575_v39 = vsub.f32 %v1567_v29, %v1573_v38  ;;  %v1477_v44 = vmul.f32 1.442695, %v1475_v41 }
 0x978   : > { %v2210_v40 = vpop.eup %2209  ;;  %v1578_v42 = vmul.f32 1.442695, %v1575_v39 }
 0x979   : > { %v1580_v43 = vsel %vm983_vm2, %v2210_v40, 0.0 }
 0x97a   : > { %2211 = vpow2.f32 %v1578_v42  ;;  %1581 = vadd.xlane.f32.xlu2 %v1580_v43  ;;  %v1733_v42 = vld [vmem:[#allocation9 + $0x10] sm:$0xff]  ;;  %v1732_v43 = vld [vmem:[#allocation9 + $0x8] sm:$0xff] }
 0x97b   : > { %2213 = vpow2.f32 %v1477_v44  ;;  %v1731_v44 = vld [vmem:[#allocation9] sm:$0xff] }
 0x97d   : > { %v1474_v45 = vpop.xlane.xlu0 %1473 }
 0x97e   : > { %v1476_v46 = vsub.f32 %v1468_v33, %v1474_v45 }
 0x980   : > { %v2212_v47 = vpop.eup %2211  ;;  %v1479_v48 = vmul.f32 1.442695, %v1476_v46 }
 0x981   : > { %v1583_v49 = vsel %vm987_vm3, %v2212_v47, 0.0  ;;  %v2214_v50 = vpop.eup %2213 }
 0x982   : > { %2215 = vpow2.f32 %v1479_v48  ;;  %1584 = vadd.xlane.f32.xlu2 %v1583_v49  ;;  %v1481_v52 = vsel %vm983_vm2, %v2214_v50, 0.0  ;;  %v1773_v48 = vld [vmem:[#allocation10 + $0x18] sm:$0xff] }
 0x983   : > { %1796 = vmatpush.msrb.mxu3 %v1773_v48 }
 0x985   : > { %1797 = vmatpush.msrb.mxu3 %v1772_v15 }
 0x988   : > { %v2216_v51 = vpop.eup %2215 }
 0x989   : > { %v1484_v53 = vsel %vm987_vm3, %v2216_v51, 0.0  ;;  %vm1871_vm3 = vcmask 66560  }
 0x98a   : > { %1482 = vadd.xlane.f32.xlu2 %v1481_v52  ;;  %1485 = vadd.xlane.f32.xlu1 %v1484_v53 }
 0x98b   : > { %v1593_v54 = vpop.permute.xlu1 %1592 }
 0x98c   : > { %2076 = vmatpush.msk.msrb.mxu2 %vm1018_vm4, %v1593_v54 }
 0x990   : > { %v1591_v55 = vpop.permute.xlu0 %1590 }
 0x991   : > { %1618 = vmatpush.msrb.mxu2 %v1591_v55 }
 0x998   : > { %v1492_v8 = vpop.permute.xlu0 %1491 }
 0x9a2   : > { %1493 = vrot.lane.b32.xlu2 %v2818_v16, %s2448_s7  ;;  %s902_s7 = scalar_lea.vmem %s2947_s26, %s2040_s10  ;;  %v1637_v16 = vld [vmem:[#allocation7 + $0x8] sm:$0xff] }
 0x9a3   : > { %1664 = vmatpush.msrb.mxu0 %v1637_v16  ;;  %v1771_v16 = vld [vmem:[#allocation10 + $0x8] sm:$0xff] }
 0x9a4   : > { %1798 = vmatpush.msrb.mxu3 %v1771_v16 }
 0x9ed   : > { %v1582_v56 = vpop.xlane.xlu2 %1581 }
 0x9ee   : > { %2217 = vrcp.f32 %v1582_v56 }
 0x9f4   : > { %v2218_v57 = vpop.eup %2217 }
 0x9f5   : > { %v1588_v58 = vmul.f32 %v2218_v57, %v2210_v40  ;;  %v1585_v60 = vpop.xlane.xlu2 %1584 }
 0x9f6   : > { %2219 = vrcp.f32 %v1585_v60 }
 0x9f7   : > { %2077 = vmatmul.msk.f32.vlgmr.msrb.gmra.mxu2 %vm983_vm2, %v1588_v58  ;;  %v1865_v2 = vrot.slane %v1588_v58, 7 }
 0x9fc   : > { %v2220_v61 = vpop.eup %2219 }
 0x9fd   : > { %v1483_v62 = vpop.xlane.xlu2 %1482  ;;  %v1589_v63 = vmul.f32 %v2220_v61, %v2212_v47  ;;  %v1486_v0 = vpop.xlane.xlu1 %1485  ;;  %v2177_v61 = vld [vmem:[%s2938_s17] ss:$0 sm:$0xff] }
 0x9fe   : > { %2221 = vrcp.f32 %v1483_v62 }
 0x9ff   : > { %2078 = vmatmul.msk.f32.gmra.mxu2 %vm983_vm2, %v1589_v63  ;;  %2223 = vrcp.f32 %v1486_v0 }
 0xa04   : > { %v2222_v1 = vpop.eup %2221 }
 0xa05   : > { %v1489_v3 = vmul.f32 %v2222_v1, %v2214_v50  ;;  %v1494_v7 = vpop.permute.xlu2 %1493  ;;  %v2224_v12 = vpop.eup %2223  ;;  %v2178_v1 = vld [vmem:[%s2939_s18] ss:$0 sm:$0xff] }
 0xa06   : > { %2069 = vmatpush.msk.msra.mxu1 %vm1018_vm4, %v1494_v7  ;;  %v1490_v13 = vmul.f32 %v2224_v12, %v2216_v51 }
 0xa07   : > { %v1867_v9 = vsel %vm1018_vm4, %v1489_v3, %v1865_v2 }
 0xa08   : > { %v1870_v10 = vmul.f32 %v1867_v9, %v2736_v59  ;;  %1519 = vmatpush.msra.mxu1 %v1492_v8  ;;  %v1636_v59 = vld [vmem:[#allocation7] sm:$0xff] }
 0xa09   : > { %2070 = vmatmul.msk.f32.vlgmr.msra.gmra.mxu1 %vm983_vm2, %v1489_v3  ;;  %1665 = vmatpush.msrb.mxu0 %v1636_v59 }
 0xa0a   : > { %1872 = vst.msk [vmem:[%s902_s7] sm:$0x3] %vm1871_vm3, %v1870_v10 }
 0xa11   : > { %2071 = vmatmul.msk.f32.gmra.mxu1 %vm983_vm2, %v1490_v13 }
 0xa7a   : > { %v1620_v17 = vpop.f32.mrf.mxu2 }
 0xa7b   : > { %1628 = vrot.lane.b32.xlu0 %v1620_v17, %s2450_s25  ;;  %v1770_v17 = vld [vmem:[#allocation10] sm:$0xff] }
 0xa7c   : > { %1799 = vmatpush.msrb.mxu3 %v1770_v17 }
 0xa82   : > { %v1623_v18 = vpop.f32.mrf.mxu2 }
 0xa83   : > { %1630 = vrot.lane.b32.xlu0 %v1623_v18, %s2450_s25  ;;  %v2179_v18 = vld [vmem:[%s2941_s20] ss:$0 sm:$0xff] }
 0xa86   : > { %v1521_v19 = vpop.f32.mrf.mxu1 }
 0xa8e   : > { %v1524_v22 = vpop.f32.mrf.mxu1 }
 0xaed   : > { %v1629_v20 = vpop.permute.xlu0 %1628 }
 0xaee   : > { %v1634_v21 = vsel %vm949_vm1, %v1521_v19, %v1629_v20 }
 0xaef   : > { %2079 = vmatmul.msk.f32.vlgmr.msrb.gmra.mxu0 %vm913_vm0, %v1634_v21 }
 0xaf5   : > { %v1631_v23 = vpop.permute.xlu0 %1630 }
 0xaf6   : > { %v1635_v24 = vsel %vm949_vm1, %v1524_v22, %v1631_v23 }
 0xaf7   : > { %2080 = vmatmul.msk.f32.gmra.mxu0 %vm913_vm0, %v1635_v24  ;;  %v2180_v24 = vld [vmem:[%s2943_s22] ss:$0 sm:$0xff] }
 0xb6c   : > { %v1667_v26 = vpop.f32.mrf.mxu0 }
 0xb6d   : > { %v1668_v27 = vadd.f32 %v2176_v25, %v1667_v26 }
 0xb6f   : > { %v1673_v28 = vadd.f32 %v1668_v27, %v2805_v6 }
 0xb71   : > { %v1675_v29 = vsel %vm913_vm0, %v1673_v28, 0.0 }
 0xb72   : > { %1676 = vadd.xlane.f32.xlu2 %v1675_v29 }
 0xb74   : > { %v1670_v30 = vpop.f32.mrf.mxu0 }
 0xb75   : > { %v1671_v31 = vadd.f32 %v2176_v25, %v1670_v30 }
 0xb77   : > { %v1674_v32 = vadd.f32 %v1671_v31, %v2809_v11  ;;  %v1734_v11 = vld [vmem:[#allocation9 + $0x18] sm:$0xff] }
 0xb78   : > { %1757 = vmatpush.msrb.mxu1 %v1734_v11 }
 0xb79   : > { %v1678_v33 = vsel %vm1195_vm5, %v1674_v32, 0.0 }
 0xb7a   : > { %1679 = vadd.xlane.f32.xlu0 %v1678_v33  ;;  %1758 = vmatpush.msrb.mxu1 %v1733_v42 }
 0xb7c   : > { %1759 = vmatpush.msrb.mxu1 %v1732_v43 }
 0xb7e   : > { %1760 = vmatpush.msrb.mxu1 %v1731_v44 }
 0xbe5   : > { %v1677_v34 = vpop.xlane.xlu2 %1676 }
 0xbe6   : > { %v1681_v35 = vmul.f32 %v1677_v34, %v2767_v4 }
 0xbe8   : > { %v1683_v5 = vsub.f32 %v1673_v28, %v1681_v35 }
 0xbea   : > { %v1685_v36 = vmul.f32 %v1683_v5, %v1683_v5 }
 0xbec   : > { %v1687_v37 = vsel %vm913_vm0, %v1685_v36, 0.0 }
 0xbed   : > { %1688 = vadd.xlane.f32.xlu1 %v1687_v37  ;;  %v1680_v38 = vpop.xlane.xlu0 %1679 }
 0xbee   : > { %v1682_v6 = vmul.f32 %v1680_v38, %v2767_v4 }
 0xbf0   : > { %v1684_v39 = vsub.f32 %v1674_v32, %v1682_v6 }
 0xbf2   : > { %v1686_v40 = vmul.f32 %v1684_v39, %v1684_v39 }
 0xbf4   : > { %v1690_v41 = vsel %vm1195_vm5, %v1686_v40, 0.0 }
 0xbf5   : > { %1691 = vadd.xlane.f32.xlu1 %v1690_v41 }
 0xc60   : > { %v1689_v45 = vpop.xlane.xlu1 %1688 }
 0xc61   : > { %v1693_v46 = vmul.f32 %v1689_v45, %v2767_v4 }
 0xc63   : > { %v1695_v47 = vadd.f32 1e-12, %v1693_v46 }
 0xc65   : > { %2225 = vrsqrt.f32 %v1695_v47  ;;  %vm1703_vm2 = vweird.f32 %v1695_v47 }
 0xc68   : > { %v1692_v49 = vpop.xlane.xlu1 %1691 }
 0xc69   : > { %v1694_v50 = vmul.f32 %v1692_v49, %v2767_v4 }
 0xc6b   : > { %v2226_v51 = vpop.eup %2225  ;;  %v1696_v52 = vadd.f32 1e-12, %v1694_v50 }
 0xc6c   : > { %v1698_v53 = vmul.f32 %v2226_v51, %v1695_v47  ;;  %vm1704_vm1 = vweird.f32 %v2226_v51 }
 0xc6d   : > { %2227 = vrsqrt.f32 %v1696_v52  ;;  %vm1705_vm4 = vmor %vm1703_vm2, %vm1704_vm1  ;;  %vm1713_vm10 = vweird.f32 %v1696_v52 }
 0xc6e   : > { %v1699_v54 = vmul.f32 %v2226_v51, %v1698_v53 }
 0xc70   : > { %v1700_v55 = vmul.f32 0.5, %v1699_v54  ;;  %v2181_v54 = vld [vmem:[%s2944_s23] ss:$0 sm:$0xff] }
 0xc72   : > { %v1701_v56 = vsub.f32 1.5, %v1700_v55 }
 0xc73   : > { %v2228_v57 = vpop.eup %2227 }
 0xc74   : > { %v1702_v58 = vmul.f32 %v2226_v51, %v1701_v56  ;;  %v1708_v60 = vmul.f32 %v2228_v57, %v1696_v52  ;;  %vm1714_vm9 = vweird.f32 %v2228_v57  ;;  %v2182_v56 = vld [vmem:[%s2980_s28] ss:$0 sm:$0xff] }
 0xc75   : > { %vm1715_vm11 = vmor %vm1713_vm10, %vm1714_vm9 }
 0xc76   : > { %v1706_v62 = vsel %vm1705_vm4, %v2226_v51, %v1702_v58  ;;  %v1709_v63 = vmul.f32 %v2228_v57, %v1708_v60 }
 0xc77   : > { %v1717_v0 = vmul.f32 %v1706_v62, %v1683_v5 }
 0xc78   : > { %v1710_v2 = vmul.f32 0.5, %v1709_v63 }
 0xc79   : > { %v1723_v3 = vmul.f32 %v2177_v61, %v1717_v0 }
 0xc7a   : > { %v1711_v7 = vsub.f32 1.5, %v1710_v2 }
 0xc7b   : > { %v1729_v8 = vadd.f32 %v2178_v1, %v1723_v3 }
 0xc7c   : > { %v1712_v9 = vmul.f32 %v2228_v57, %v1711_v7 }
 0xc7d   : > { %2081 = vmatmul.msk.f32.vlgmr.msrb.gmra.mxu1 %vm913_vm0, %v1729_v8 }
 0xc7e   : > { %v1716_v10 = vsel %vm1715_vm11, %v2228_v57, %v1712_v9 }
 0xc7f   : > { %v1718_v12 = vmul.f32 %v1716_v10, %v1684_v39 }
 0xc81   : > { %v1724_v13 = vmul.f32 %v2177_v61, %v1718_v12 }
 0xc83   : > { %v1730_v14 = vadd.f32 %v2178_v1, %v1724_v13 }
 0xc85   : > { %2082 = vmatmul.msk.f32.gmra.mxu1 %vm913_vm0, %v1730_v14 }
 0xcfa   : > { %v1762_v59 = vpop.f32.mrf.mxu1 }
 0xcfb   : > { %v1763_v19 = vadd.f32 %v2179_v18, %v1762_v59 }
 0xcfd   : > { %v1768_v20 = vmax.f32 %v1763_v19, 0.0 }
 0xcff   : > { %2083 = vmatmul.msk.f32.vlgmr.msrb.gmra.mxu3 %vm913_vm0, %v1768_v20 }
 0xd02   : > { %v1765_v21 = vpop.f32.mrf.mxu1 }
 0xd03   : > { %v1766_v22 = vadd.f32 %v2179_v18, %v1765_v21 }
 0xd05   : > { %v1769_v23 = vmax.f32 %v1766_v22, 0.0 }
 0xd07   : > { %2084 = vmatmul.msk.f32.gmra.mxu3 %vm913_vm0, %v1769_v23 }
 0xd82   : > { %v1801_v25 = vpop.f32.mrf.mxu3 }
 0xd83   : > { %v1802_v26 = vadd.f32 %v2180_v24, %v1801_v25 }
 0xd85   : > { %v1807_v27 = vadd.f32 %v1802_v26, %v1729_v8 }
 0xd87   : > { %v1809_v28 = vsel %vm913_vm0, %v1807_v27, 0.0 }
 0xd88   : > { %1810 = vadd.xlane.f32.xlu1 %v1809_v28 }
 0xd8a   : > { %v1804_v29 = vpop.f32.mrf.mxu3 }
 0xd8b   : > { %v1805_v30 = vadd.f32 %v2180_v24, %v1804_v29 }
 0xd8d   : > { %v1808_v31 = vadd.f32 %v1805_v30, %v1730_v14 }
 0xd8f   : > { %v1812_v32 = vsel %vm1195_vm5, %v1808_v31, 0.0 }
 0xd90   : > { %1813 = vadd.xlane.f32.xlu2 %v1812_v32 }
 0xdfb   : > { %v1811_v33 = vpop.xlane.xlu1 %1810 }
 0xdfc   : > { %v1815_v34 = vmul.f32 %v1811_v33, %v2767_v4 }
 0xdfe   : > { %v1817_v35 = vsub.f32 %v1807_v27, %v1815_v34 }
 0xe00   : > { %v1819_v5 = vmul.f32 %v1817_v35, %v1817_v35 }
 0xe02   : > { %v1821_v36 = vsel %vm913_vm0, %v1819_v5, 0.0 }
 0xe03   : > { %v1814_v37 = vpop.xlane.xlu2 %1813  ;;  %1822 = vadd.xlane.f32.xlu1 %v1821_v36 }
 0xe04   : > { %v1816_v38 = vmul.f32 %v1814_v37, %v2767_v4 }
 0xe06   : > { %v1818_v6 = vsub.f32 %v1808_v31, %v1816_v38 }
 0xe08   : > { %v1820_v39 = vmul.f32 %v1818_v6, %v1818_v6 }
 0xe0a   : > { %v1824_v40 = vsel %vm1195_vm5, %v1820_v39, 0.0 }
 0xe0b   : > { %1825 = vadd.xlane.f32.xlu0 %v1824_v40 }
 0xe76   : > { %v1823_v41 = vpop.xlane.xlu1 %1822 }
 0xe77   : > { %v1827_v11 = vmul.f32 %v1823_v41, %v2767_v4 }
 0xe79   : > { %v1829_v42 = vadd.f32 1e-12, %v1827_v11 }
 0xe7b   : > { %2229 = vrsqrt.f32 %v1829_v42  ;;  %vm1837_vm13 = vweird.f32 %v1829_v42 }
 0xe7e   : > { %v1826_v43 = vpop.xlane.xlu0 %1825 }
 0xe7f   : > { %v1828_v44 = vmul.f32 %v1826_v43, %v2767_v4 }
 0xe81   : > { %v2230_v45 = vpop.eup %2229  ;;  %v1830_v46 = vadd.f32 1e-12, %v1828_v44 }
 0xe82   : > { %v1832_v47 = vmul.f32 %v2230_v45, %v1829_v42  ;;  %vm1838_vm12 = vweird.f32 %v2230_v45 }
 0xe83   : > { %2231 = vrsqrt.f32 %v1830_v46  ;;  %vm1839_vm14 = vmor %vm1837_vm13, %vm1838_vm12  ;;  %vm1847_vm6 = vweird.f32 %v1830_v46 }
 0xe84   : > { %v1833_v48 = vmul.f32 %v2230_v45, %v1832_v47 }
 0xe86   : > { %v1834_v49 = vmul.f32 0.5, %v1833_v48 }
 0xe88   : > { %v1835_v50 = vsub.f32 1.5, %v1834_v49 }
 0xe89   : > { %v2232_v51 = vpop.eup %2231 }
 0xe8a   : > { %v1836_v52 = vmul.f32 %v2230_v45, %v1835_v50  ;;  %v1842_v53 = vmul.f32 %v2232_v51, %v1830_v46  ;;  %vm1848_vm15 = vweird.f32 %v2232_v51 }
 0xe8b   : > { %vm1849_vm7 = vmor %vm1847_vm6, %vm1848_vm15 }
 0xe8c   : > { %v1840_v55 = vsel %vm1839_vm14, %v2230_v45, %v1836_v52  ;;  %v1843_v4 = vmul.f32 %v2232_v51, %v1842_v53 }
 0xe8d   : > { %v1851_v57 = vmul.f32 %v1840_v55, %v1817_v35 }
 0xe8e   : > { %v1844_v58 = vmul.f32 0.5, %v1843_v4 }
 0xe8f   : > { %v1857_v60 = vmul.f32 %v2181_v54, %v1851_v57 }
 0xe90   : > { %v1845_v61 = vsub.f32 1.5, %v1844_v58 }
 0xe91   : > { %v1863_v62 = vadd.f32 %v2182_v56, %v1857_v60 }
 0xe92   : > { %v1846_v63 = vmul.f32 %v2232_v51, %v1845_v61 }
 0xe93   : > { %1868 = vst.msk [vmem:[%s898_s0] sm:$0xff] %vm913_vm0, %v1863_v62 }
 0xe94   : > { %v1850_v0 = vsel %vm1849_vm7, %v2232_v51, %v1846_v63 }
 0xe95   : > { %v1852_v1 = vmul.f32 %v1850_v0, %v1818_v6 }
 0xe97   : > { %v1858_v2 = vmul.f32 %v2181_v54, %v1852_v1 }
 0xe99   : > { %v1864_v3 = vadd.f32 %v2182_v56, %v1858_v2 }
 0xe9b   : > { %1869 = vst.msk [vmem:[%s898_s0 + $0x8] sm:$0x1] %vm1195_vm5, %v1864_v3 }
 0xe9c PF: > { %s2982_s3 = sld [smem:[#allocation16_spill]] }
 0xea2   : > { %s41_s27 = sadd.s32 1, %s2982_s3  }
 0xea3   : > { %p38_p7 = scmp.ge.s32.totalorder %s41_s27, 4  }
 0xea5   :  { %40 = sbr.rel (!%p38_p7) target bundleno = 19 (0x13), region = 187 }
 0xeaa   :  { %1908 = vsyncpa [#allocation3], 1 }
 0xeab   :  { %1910 = vsyncpa [#allocation3 + $0x1], 1 }
 0xeac   :  { %1911 = vsyncpa [#allocation5], 1 }
 0xead   :  { %1912 = vsyncpa [#allocation8], 1 }
 0xeae   :  { %1913 = vsyncpa [#allocation11], 1 }

// kernel: model_select_forward.5
= control target key start
LH: loop header
LB: loop body
LE: loop exit
PB: predicated region body
PF: predicated region fallthrough
CT: control target
= control target key end

     0   :  { %s976_s25 = smov 0   ;;  %s1094_s0 = inlined_call_operand.vmem [shape: f32[2,5,32], index: 0, kind: input, shape index: {}]   ;;  %s1095_s1 = inlined_call_operand.vmem [shape: f32[32,96], index: 1, kind: input, shape index: {}]   ;;  %s1096_s2 = inlined_call_operand.vmem [shape: f32[1,96], index: 2, kind: input, shape index: {}]   ;;  %s1097_s3 = inlined_call_operand.vmem [shape: f32[32,32], index: 3, kind: input, shape index: {}]   ;;  %s1098_s4 = inlined_call_operand.vmem [shape: f32[1,32], index: 4, kind: input, shape index: {}]   ;;  %s1099_s5 = inlined_call_operand.vmem [shape: f32[1,32], index: 5, kind: input, shape index: {}]   ;;  %s1100_s6 = inlined_call_operand.vmem [shape: f32[1,32], index: 6, kind: input, shape index: {}]   ;;  %s1101_s7 = inlined_call_operand.vmem [shape: f32[32,32], index: 7, kind: input, shape index: {}]   ;;  %s1102_s8 = inlined_call_operand.vmem [shape: f32[1,32], index: 8, kind: input, shape index: {}]   ;;  %s1103_s9 = inlined_call_operand.vmem [shape: f32[32,32], index: 9, kind: input, shape index: {}]   ;;  %s1104_s10 = inlined_call_operand.vmem [shape: f32[1,32], index: 10, kind: input, shape index: {}]   ;;  %s1105_s11 = inlined_call_operand.vmem [shape: f32[1,32], index: 11, kind: input, shape index: {}]   ;;  %s1106_s12 = inlined_call_operand.vmem [shape: f32[1,32], index: 12, kind: input, shape index: {}]   ;;  %s1107_s13 = inlined_call_operand.vmem [shape: f32[2,5,32], index: 13, kind: output, shape index: {}]  }
   0x1 LB: > { %s833_s26 = sadd.s32 4294967295, %s897_s25   ;;  %p837_p0 = scmp.ge.s32.totalorder %s897_s25, 1  ;;  %s897_s25 = sphi %s976_s25, %s23_s25  }
   0x2   : > { %p386_p1 = scmp.lt.s32.totalorder %s897_s25, 3 }
   0x4   : > { %p387_p2 = pnand %p837_p0, %p386_p1 }
   0x5   : > { %p428_p3 = scmp.lt.s32.totalorder (!%p387_p2), %s833_s26, 1  ;;  %s899_s24 = smov (!%p387_p2), 112  }
   0x6   : > { %390 = sbr.rel (%p387_p2) target bundleno = 1818 (0x71a), region = 72  ;;  %s900_s27 = smov (!%p387_p2), 96  }
   0x7   : > { %s901_s28 = smov (!%p387_p2), 80   ;;  %s902_s29 = smov (!%p387_p2), 64  }
   0x8   : > { %s903_s30 = smov (!%p387_p2), 48  }
   0xb   : > { %v440_v0 = vld [vmem:[%s1095_s1 + $0x18] sm:$0xff]  ;;  %v439_v1 = vld [vmem:[%s1095_s1 + $0x10] sm:$0xff]  ;;  %v438_v2 = vld [vmem:[%s1095_s1 + $0x8] sm:$0xff]  ;;  %s1109_s26 = smov (!%p428_p3, %s833_s26), 1  ;;  %vm445_vm0 = vcmask 261120   ;;  %vm472_vm1 = vcmask 130048  }
   0xc   : > { %461 = vmatpush.msra.mxu0 %v440_v0  ;;  %v437_v3 = vld [vmem:[%s1095_s1] sm:$0xff]  ;;  %s838_s18 = sshll.u32 %s1109_s26, 3  ;;  %vm498_vm2 = vcmask 36864   ;;  %vm516_vm3 = vcmask 1044480   ;;  %vm512_vm4 = vcmask 39936   ;;  %v614_v35 = vld [vmem:[%s1097_s3 + $0x18] sm:$0xff] }
   0xd   : > { %s431_s21 = scalar_lea.vmem %s1094_s0, %s838_s18  ;;  %v869_v5 = vld [vmem:[%s1096_s2] ss:$0 sm:$0xff]  ;;  %v613_v36 = vld [vmem:[%s1097_s3 + $0x10] sm:$0xff]  ;;  %v612_v37 = vld [vmem:[%s1097_s3 + $0x8] sm:$0xff]  ;;  %vm643_vm5 = vcmask 258048   ;;  %v905_v48 = vmov 32.0  }
   0xe   : > { %462 = vmatpush.msra.mxu0 %v439_v1  ;;  %v1004_v4 = vld [vmem:[%s431_s21] sm:$0x1f]  ;;  %s904_s21 = smov 16   ;;  %v686_v60 = vld [vmem:[%s1101_s7 + $0x18] sm:$0xff]  ;;  %v685_v61 = vld [vmem:[%s1101_s7 + $0x10] sm:$0xff] }
   0xf   : > { %v611_v40 = vld [vmem:[%s1097_s3] sm:$0xff]  ;;  %v684_v62 = vld [vmem:[%s1101_s7 + $0x8] sm:$0xff]  ;;  %v718_v0 = vld [vmem:[%s1103_s9 + $0x18] sm:$0xff] }
  0x10   : > { %463 = vmatpush.msra.mxu0 %v438_v2  ;;  %v870_v43 = vld [vmem:[%s1098_s4] ss:$0 sm:$0xff] }
  0x11   : > { %v683_v63 = vld [vmem:[%s1101_s7] sm:$0xff] }
  0x12   : > { %464 = vmatpush.msra.mxu0 %v437_v3 }
  0x13   : > { %840 = vmatmul.msk.f32.vlgmr.msra.gmra.mxu0 %vm445_vm0, %v1004_v4 }
  0x14   : > { %738 = vmatpush.msrb.mxu0 %v718_v0 }
  0x90   : > { %v466_v6 = vpop.f32.mrf.mxu0 }
  0x91   : > { %v467_v7 = vadd.f32 %v869_v5, %v466_v6 }
  0x93   : > { %539 = vrot.lane.b32.xlu1 %v467_v7, %s899_s24  ;;  %470 = vrot.lane.b32.xlu0 %v467_v7, %s900_s27 }
  0x9b   : > { %541 = vrot.lane.b32.xlu0 %v467_v7, %s901_s28 }
 0x105   : > { %v471_v8 = vpop.permute.xlu0 %470  ;;  %v540_v10 = vpop.permute.xlu1 %539 }
 0x106   : > { %841 = vmatpush.xpose.msk.msra.mxu1 %vm472_vm1, %v471_v8 }
 0x109   : > { %842 = vmatmul.msk.f32.vlgmr.msra.gmra.mxu1 %vm472_vm1, %v467_v7 }
 0x10a   : > { %634 = vmatpush.msrb.mxu1 %v614_v35 }
 0x10c   : > { %635 = vmatpush.msrb.mxu1 %v613_v36 }
 0x10d   : > { %v542_v9 = vpop.permute.xlu0 %541 }
 0x10e   : > { %845 = vmatpush.xpose.msk.msra.mxu3 %vm472_vm1, %v542_v9  ;;  %636 = vmatpush.msrb.mxu1 %v612_v37 }
 0x110   : > { %637 = vmatpush.msrb.mxu1 %v611_v40 }
 0x111   : > { %846 = vmatmul.msk.f32.vlgmr.msra.gmra.mxu3 %vm472_vm1, %v540_v10  ;;  %v871_v10 = vld [vmem:[%s1099_s5] ss:$0 sm:$0xff] }
 0x112   : > { %706 = vmatpush.msrb.mxu3 %v686_v60 }
 0x114   : > { %707 = vmatpush.msrb.mxu3 %v685_v61 }
 0x116   : > { %708 = vmatpush.msrb.mxu3 %v684_v62 }
 0x118   : > { %709 = vmatpush.msrb.mxu3 %v683_v63 }
 0x186   : > { %v494_v11 = vpop.f32.mrf.mxu1 }
 0x187   : > { %v497_v12 = vmul.f32 0.25, %v494_v11 }
 0x189   : > { %v499_v13 = vsel %vm498_vm2, %v497_v12, -inf }
 0x18a   : > { %500 = vmax.xlane.f32.xlu1 %v499_v13  ;;  %v872_v13 = vld [vmem:[%s1100_s6] ss:$0 sm:$0xff] }
 0x194   : > { %v564_v14 = vpop.f32.mrf.mxu3 }
 0x195   : > { %v567_v15 = vmul.f32 0.25, %v564_v14 }
 0x197   : > { %v568_v16 = vsel %vm498_vm2, %v567_v15, -inf }
 0x198   : > { %569 = vmax.xlane.f32.xlu2 %v568_v16  ;;  %v717_v16 = vld [vmem:[%s1103_s9 + $0x10] sm:$0xff] }
 0x199   : > { %739 = vmatpush.msrb.mxu0 %v717_v16 }
 0x1fd   : > { %v501_v17 = vpop.xlane.xlu1 %500 }
 0x1fe   : > { %v502_v18 = vsub.f32 %v497_v12, %v501_v17  ;;  %v716_v17 = vld [vmem:[%s1103_s9 + $0x8] sm:$0xff] }
 0x1ff   : > { %740 = vmatpush.msrb.mxu0 %v716_v17 }
 0x200   : > { %v503_v19 = vmul.f32 1.442695, %v502_v18  ;;  %v715_v18 = vld [vmem:[%s1103_s9] sm:$0xff] }
 0x201   : > { %741 = vmatpush.msrb.mxu0 %v715_v18 }
 0x202   : > { %877 = vpow2.f32 %v503_v19  ;;  %v873_v19 = vld [vmem:[%s1102_s8] ss:$0 sm:$0xff] }
 0x208   : > { %v878_v20 = vpop.eup %877 }
 0x209   : > { %v505_v21 = vsel %vm498_vm2, %v878_v20, 0.0 }
 0x20a   : > { %506 = vadd.xlane.f32.xlu2 %v505_v21 }
 0x20b   : > { %v570_v22 = vpop.xlane.xlu2 %569 }
 0x20c   : > { %v571_v23 = vsub.f32 %v567_v15, %v570_v22 }
 0x20e   : > { %v572_v24 = vmul.f32 1.442695, %v571_v23  ;;  %v874_v23 = vld [vmem:[%s1104_s10] ss:$0 sm:$0xff] }
 0x210   : > { %879 = vpow2.f32 %v572_v24 }
 0x216   : > { %v880_v25 = vpop.eup %879 }
 0x217   : > { %v574_v26 = vsel %vm498_vm2, %v880_v25, 0.0 }
 0x218   : > { %575 = vadd.xlane.f32.xlu0 %v574_v26 }
 0x222   : > { %510 = vrot.lane.b32.xlu2 %v467_v7, %s902_s29 }
 0x22a   : > { %579 = vrot.lane.b32.xlu2 %v467_v7, %s903_s30  ;;  %s435_s30 = scalar_lea.vmem %s1107_s13, %s838_s18 }
 0x27d   : > { %v507_v27 = vpop.xlane.xlu2 %506 }
 0x27e   : > { %881 = vrcp.f32 %v507_v27 }
 0x284   : > { %v882_v28 = vpop.eup %881 }
 0x285   : > { %v511_v29 = vpop.permute.xlu2 %510  ;;  %v509_v30 = vmul.f32 %v882_v28, %v878_v20 }
 0x286   : > { %843 = vmatpush.msk.msra.mxu2 %vm516_vm3, %v511_v29 }
 0x287   : > { %844 = vmatmul.msk.f32.vlgmr.msra.gmra.mxu2 %vm512_vm4, %v509_v30 }
 0x28b   : > { %v576_v31 = vpop.xlane.xlu0 %575 }
 0x28c   : > { %883 = vrcp.f32 %v576_v31 }
 0x28d   : > { %v580_v32 = vpop.permute.xlu2 %579  ;;  %885 = vrcp.f32 %v905_v48 }
 0x28e   : > { %847 = vmatpush.msk.msrb.mxu2 %vm516_vm3, %v580_v32 }
 0x292   : > { %v884_v33 = vpop.eup %883 }
 0x293   : > { %v578_v34 = vmul.f32 %v884_v33, %v880_v25  ;;  %v886_v49 = vpop.eup %885 }
 0x294   : > { %v648_v50 = vmul.f32 32.0, %v886_v49  ;;  %vm652_vm6 = vweird.f32 %v886_v49 }
 0x295   : > { %848 = vmatmul.msk.f32.vlgmr.msrb.gmra.mxu2 %vm512_vm4, %v578_v34 }
 0x296   : > { %v649_v51 = vsub.f32 1.0, %v648_v50 }
 0x298   : > { %v650_v52 = vmul.f32 %v886_v49, %v649_v51 }
 0x29a   : > { %v651_v53 = vadd.f32 %v886_v49, %v650_v52 }
 0x29c   : > { %v653_v54 = vsel %vm652_vm6, %v886_v49, %v651_v53 }
 0x30a   : > { %v536_v38 = vpop.f32.mrf.mxu2 }
 0x318   : > { %v603_v39 = vpop.f32.mrf.mxu2 }
 0x319   : > { %607 = vrot.lane.b32.xlu2 %v603_v39, %s904_s21 }
 0x373   : > { %v608_v41 = vpop.permute.xlu2 %607 }
 0x374   : > { %v610_v42 = vsel %vm472_vm1, %v536_v38, %v608_v41 }
 0x375   : > { %849 = vmatmul.msk.f32.vlgmr.msrb.gmra.mxu1 %vm445_vm0, %v610_v42  ;;  %v875_v42 = vld [vmem:[%s1105_s11] ss:$0 sm:$0xff] }
 0x3f2   : > { %v639_v44 = vpop.f32.mrf.mxu1 }
 0x3f3   : > { %v640_v45 = vadd.f32 %v870_v43, %v639_v44  ;;  %v876_v44 = vld [vmem:[%s1106_s12] ss:$0 sm:$0xff] }
 0x3f5   : > { %v642_v46 = vadd.f32 %v640_v45, %v1004_v4 }
 0x3f7   : > { %v644_v47 = vsel %vm643_vm5, %v642_v46, 0.0 }
 0x3f8   : > { %645 = vadd.xlane.f32.xlu1 %v644_v47 }
 0x46b   : > { %v646_v55 = vpop.xlane.xlu1 %645 }
 0x46c   : > { %v654_v56 = vmul.f32 %v653_v54, %v646_v55 }
 0x46e   : > { %v655_v57 = vsub.f32 %v642_v46, %v654_v56 }
 0x470   : > { %v656_v58 = vmul.f32 %v655_v57, %v655_v57 }
 0x472   : > { %v657_v59 = vsel %vm643_vm5, %v656_v58, 0.0 }
 0x473   : > { %658 = vadd.xlane.f32.xlu2 %v657_v59 }
 0x4e6   : > { %v659_v1 = vpop.xlane.xlu2 %658 }
 0x4e7   : > { %v660_v2 = vmul.f32 %v659_v1, %v653_v54 }
 0x4e9   : > { %v661_v3 = vadd.f32 1e-12, %v660_v2 }
 0x4eb   : > { %887 = vrsqrt.f32 %v661_v3  ;;  %vm668_vm8 = vweird.f32 %v661_v3 }
 0x4f1   : > { %v888_v4 = vpop.eup %887 }
 0x4f2   : > { %v663_v5 = vmul.f32 %v888_v4, %v661_v3  ;;  %vm669_vm7 = vweird.f32 %v888_v4 }
 0x4f3   : > { %vm670_vm9 = vmor %vm668_vm8, %vm669_vm7 }
 0x4f4   : > { %v664_v6 = vmul.f32 %v888_v4, %v663_v5 }
 0x4f6   : > { %v665_v7 = vmul.f32 0.5, %v664_v6 }
 0x4f8   : > { %v666_v8 = vsub.f32 1.5, %v665_v7 }
 0x4fa   : > { %v667_v9 = vmul.f32 %v888_v4, %v666_v8 }
 0x4fc   : > { %v671_v11 = vsel %vm670_vm9, %v888_v4, %v667_v9 }
 0x4fd   : > { %v672_v12 = vmul.f32 %v671_v11, %v655_v57 }
 0x4ff   : > { %v677_v14 = vmul.f32 %v871_v10, %v672_v12 }
 0x501   : > { %v682_v15 = vadd.f32 %v872_v13, %v677_v14 }
 0x503   : > { %850 = vmatmul.msk.f32.vlgmr.msrb.gmra.mxu3 %vm445_vm0, %v682_v15 }
 0x586   : > { %v711_v20 = vpop.f32.mrf.mxu3 }
 0x587   : > { %v712_v21 = vadd.f32 %v873_v19, %v711_v20 }
 0x589   : > { %v714_v22 = vmax.f32 %v712_v21, 0.0 }
 0x58b   : > { %851 = vmatmul.msk.f32.vlgmr.msrb.gmra.mxu0 %vm445_vm0, %v714_v22 }
 0x608   : > { %v743_v24 = vpop.f32.mrf.mxu0 }
 0x609   : > { %v744_v25 = vadd.f32 %v874_v23, %v743_v24 }
 0x60b   : > { %v746_v26 = vadd.f32 %v744_v25, %v682_v15 }
 0x60d   : > { %v747_v27 = vsel %vm643_vm5, %v746_v26, 0.0 }
 0x60e   : > { %748 = vadd.xlane.f32.xlu0 %v747_v27 }
 0x681   : > { %v749_v28 = vpop.xlane.xlu0 %748 }
 0x682   : > { %v750_v29 = vmul.f32 %v749_v28, %v653_v54 }
 0x684   : > { %v751_v30 = vsub.f32 %v746_v26, %v750_v29 }
 0x686   : > { %v752_v31 = vmul.f32 %v751_v30, %v751_v30 }
 0x688   : > { %v753_v32 = vsel %vm643_vm5, %v752_v31, 0.0 }
 0x689   : > { %754 = vadd.xlane.f32.xlu1 %v753_v32 }
 0x6fc   : > { %v755_v33 = vpop.xlane.xlu1 %754 }
 0x6fd   : > { %v756_v34 = vmul.f32 %v755_v33, %v653_v54 }
 0x6ff   : > { %v757_v35 = vadd.f32 1e-12, %v756_v34 }
 0x701   : > { %889 = vrsqrt.f32 %v757_v35  ;;  %vm764_vm11 = vweird.f32 %v757_v35 }
 0x707   : > { %v890_v36 = vpop.eup %889 }
 0x708   : > { %v759_v37 = vmul.f32 %v890_v36, %v757_v35  ;;  %vm765_vm10 = vweird.f32 %v890_v36 }
 0x709   : > { %vm766_vm12 = vmor %vm764_vm11, %vm765_vm10 }
 0x70a   : > { %v760_v38 = vmul.f32 %v890_v36, %v759_v37 }
 0x70c   : > { %v761_v39 = vmul.f32 0.5, %v760_v38 }
 0x70e   : > { %v762_v40 = vsub.f32 1.5, %v761_v39 }
 0x710   : > { %v763_v41 = vmul.f32 %v890_v36, %v762_v40 }
 0x712   : > { %v767_v43 = vsel %vm766_vm12, %v890_v36, %v763_v41 }
 0x713   : > { %v768_v45 = vmul.f32 %v767_v43, %v751_v30 }
 0x715   : > { %v773_v46 = vmul.f32 %v875_v42, %v768_v45 }
 0x717   : > { %v778_v47 = vadd.f32 %v876_v44, %v773_v46 }
 0x719   : > { %779 = vst.msk [vmem:[%s435_s30] sm:$0x1f] %vm643_vm5, %v778_v47 }
 0x71a PF: > { %s23_s25 = sadd.s32 1, %s897_s25  }
 0x71b   : > { %p20_p4 = scmp.ge.s32.totalorder %s23_s25, 4  }
 0x71d   :  { %22 = sbr.rel (!%p20_p4) target bundleno = 1 (0x1), region = 102 }

// kernel: model_select_forward.6
= control target key start
LH: loop header
LB: loop body
LE: loop exit
PB: predicated region body
PF: predicated region fallthrough
CT: control target
= control target key end

     0   :  { %s2817_s27 = smov 0   ;;  %s3380_s0 = inlined_call_operand.vmem [shape: f32[2,27,16], index: 0, kind: input, shape index: {}]   ;;  %s3381_s1 = inlined_call_operand.vmem [shape: f32[16,48], index: 1, kind: input, shape index: {}]   ;;  %s3382_s2 = inlined_call_operand.vmem [shape: f32[1,48], index: 2, kind: input, shape index: {}]   ;;  %s3383_s3 = inlined_call_operand.vmem [shape: f32[16,16], index: 3, kind: input, shape index: {}]   ;;  %s3384_s4 = inlined_call_operand.vmem [shape: f32[1,16], index: 4, kind: input, shape index: {}]   ;;  %s3385_s5 = inlined_call_operand.vmem [shape: f32[1,16], index: 5, kind: input, shape index: {}]   ;;  %s3386_s6 = inlined_call_operand.vmem [shape: f32[1,16], index: 6, kind: input, shape index: {}]   ;;  %s3387_s7 = inlined_call_operand.vmem [shape: f32[16,16], index: 7, kind: input, shape index: {}]   ;;  %s3388_s8 = inlined_call_operand.vmem [shape: f32[1,16], index: 8, kind: input, shape index: {}]   ;;  %s3389_s9 = inlined_call_operand.vmem [shape: f32[16,16], index: 9, kind: input, shape index: {}]   ;;  %s3390_s10 = inlined_call_operand.vmem [shape: f32[1,16], index: 10, kind: input, shape index: {}]   ;;  %s3391_s11 = inlined_call_operand.vmem [shape: f32[1,16], index: 11, kind: input, shape index: {}]   ;;  %s3392_s12 = inlined_call_operand.vmem [shape: f32[1,16], index: 12, kind: input, shape index: {}]   ;;  %s3393_s13 = inlined_call_operand.vmem [shape: f32[16,48], index: 13, kind: input, shape index: {}]   ;;  %s3394_s14 = inlined_call_operand.vmem [shape: f32[1,48], index: 14, kind: input, shape index: {}]   ;;  %s3395_s15 = inlined_call_operand.vmem [shape: f32[16,16], index: 15, kind: input, shape index: {}]   ;;  %s3396_s16 = inlined_call_operand.vmem [shape: f32[1,16], index: 16, kind: input, shape index: {}]   ;;  %s3397_s17 = inlined_call_operand.vmem [shape: f32[1,16], index: 17, kind: input, shape index: {}]   ;;  %s3398_s18 = inlined_call_operand.vmem [shape: f32[1,16], index: 18, kind: input, shape index: {}]   ;;  %s3399_s19 = inlined_call_operand.vmem [shape: f32[16,16], index: 19, kind: input, shape index: {}]   ;;  %s3400_s20 = inlined_call_operand.vmem [shape: f32[1,16], index: 20, kind: input, shape index: {}]   ;;  %s3401_s21 = inlined_call_operand.vmem [shape: f32[16,16], index: 21, kind: input, shape index: {}]   ;;  %s3402_s22 = inlined_call_operand.vmem [shape: f32[1,16], index: 22, kind: input, shape index: {}]   ;;  %s3403_s23 = inlined_call_operand.vmem [shape: f32[1,16], index: 23, kind: input, shape index: {}]   ;;  %s3404_s24 = inlined_call_operand.vmem [shape: f32[1,16], index: 24, kind: input, shape index: {}]   ;;  %s3405_s25 = inlined_call_operand.vmem [shape: f32[2,27,16], index: 25, kind: output, shape index: {0}]   ;;  %s3406_s26 = inlined_call_operand.vmem [shape: f32[2,2,27], index: 26, kind: output, shape index: {1}]  }
   0x1   :  { %3420 = sst [smem:[#allocation2_spill]] %s3380_s0 }
   0x2   :  { %3421 = sst [smem:[#allocation3_spill]] %s3381_s1 }
   0x3   :  { %3422 = sst [smem:[#allocation4_spill]] %s3382_s2 }
   0x4   :  { %3423 = sst [smem:[#allocation5_spill]] %s3383_s3 }
   0x5   :  { %3424 = sst [smem:[#allocation6_spill]] %s3384_s4 }
   0x6   :  { %3425 = sst [smem:[#allocation7_spill]] %s3385_s5 }
   0x7   :  { %3426 = sst [smem:[#allocation8_spill]] %s3386_s6 }
   0x8   :  { %3427 = sst [smem:[#allocation9_spill]] %s3387_s7 }
   0x9   :  { %3428 = sst [smem:[#allocation10_spill]] %s3388_s8 }
   0xa   :  { %3429 = sst [smem:[#allocation11_spill]] %s3389_s9 }
   0xb   :  { %3430 = sst [smem:[#allocation12_spill]] %s3390_s10 }
   0xc LB: > { %s2420_s3 = sadd.s32 4294967295, %s2673_s27   ;;  %p2424_p0 = scmp.ge.s32.totalorder %s2673_s27, 1  ;;  %s2673_s27 = sphi %s2817_s27, %s37_s27  }
   0xd   : > { %p715_p1 = scmp.lt.s32.totalorder %s2673_s27, 3 }
   0xf   : > { %p716_p2 = pnand %p2424_p0, %p715_p1 }
  0x10   : > { %s3431_s8 = sld [smem:[#allocation3_spill]] (!%p716_p2)  ;;  %p789_p3 = scmp.lt.s32.totalorder (!%p716_p2), %s2420_s3, 1 }
  0x11   : > { %719 = sbr.rel (%p716_p2) target bundleno = 3831 (0xef7), region = 120  ;;  %s3432_s2 = sld [smem:[#allocation2_spill]] (!%p716_p2) }
  0x12   : > { %s3433_s1 = sld [smem:[#allocation4_spill]] (!%p716_p2)  ;;  %s2675_s7 = smov (!%p716_p2), 120  }
  0x13   : > { %s2676_s28 = smov (!%p716_p2), 104   ;;  %s3418_s4 = smov (!%p716_p2), 112  }
  0x14   : > { %s3416_s29 = smov (!%p716_p2), 88   ;;  %s3414_s9 = smov (!%p716_p2), 96  }
  0x15   : > { %s3412_s30 = smov (!%p716_p2), 8   ;;  %s3434_s10 = sld [smem:[#allocation5_spill]] (!%p716_p2) }
  0x16   : > { %v808_v0 = vld [vmem:[%s3431_s8 + $0x8] sm:$0xff]  ;;  %v807_v1 = vld [vmem:[%s3431_s8] sm:$0xff]  ;;  %s3448_s3 = smov (!%p789_p3, %s2420_s3), 1  ;;  %vm813_vm0 = vcmask 130048   ;;  %vm867_vm1 = vcmask 64512   ;;  %vm917_vm2 = vcmask 220160  }
  0x17   : > { %840 = vmatpush.msra.mxu0 %v808_v0  ;;  %s3411_s0 = sshll.u32 %s3448_s3, 5  ;;  %vm927_vm3 = vcmask 215040   ;;  %vm986_vm4 = vcmask 1042432   ;;  %vm1572_vm5 = vcmask 1040384   ;;  %s3435_s6 = sld [smem:[#allocation6_spill]]  ;;  %vm1261_vm6 = vcmask 124928  }
  0x18   : > { %s793_s5 = scalar_lea.vmem %s3432_s2, %s3411_s0  ;;  %v2553_v6 = vld [vmem:[%s3433_s1] ss:$0 sm:$0xff]  ;;  %s3437_s2 = sld [smem:[#allocation7_spill]] }
  0x19   : > { %841 = vmatpush.msra.mxu0 %v807_v1  ;;  %v2839_v2 = vld [vmem:[%s793_s5] sm:$0xff]  ;;  %v2843_v3 = vld [vmem:[%s793_s5 + $0x8] sm:$0xff]  ;;  %v2847_v4 = vld [vmem:[%s793_s5 + $0x10] sm:$0xff]  ;;  %s3439_s0 = sld [smem:[#allocation11_spill]]  ;;  %s3445_s1 = smov 8  }
  0x1a   : > { %2430 = vmatmul.msk.f32.vlgmr.msra.gmra.mxu0 %vm813_vm0, %v2839_v2  ;;  %v2851_v5 = vld [vmem:[%s793_s5 + $0x18] sm:$0x7]  ;;  %s3436_s5 = sld [smem:[#allocation9_spill]] }
  0x22   : > { %2431 = vmatmul.msk.f32.gmra.mxu0 %vm813_vm0, %v2843_v3 }
  0x2a   : > { %2432 = vmatmul.msk.f32.gmra.mxu0 %vm813_vm0, %v2847_v4 }
  0x32   : > { %2433 = vmatmul.msk.f32.gmra.mxu0 %vm813_vm0, %v2851_v5 }
  0x97   : > { %v843_v7 = vpop.f32.mrf.mxu0 }
  0x98   : > { %v2858_v8 = vadd.f32 %v2553_v6, %v843_v7 }
  0x9a   : > { %1018 = vrot.lane.b32.xlu2 %v2858_v8, %s2675_s7 }
  0x9f   : > { %v846_v9 = vpop.f32.mrf.mxu0 }
  0xa0   : > { %v2862_v10 = vadd.f32 %v2553_v6, %v846_v9 }
  0xa2   : > { %1028 = vrot.lane.b32.xlu1 %v2862_v10, %s2676_s28  ;;  %1020 = vrot.lane.b32.xlu2 %v2862_v10, %s2675_s7 }
  0xa7   : > { %v849_v11 = vpop.f32.mrf.mxu0 }
  0xa8   : > { %v850_v14 = vadd.f32 %v2553_v6, %v849_v11 }
  0xaa   : > { %1026 = vrot.lane.b32.xlu1 %v2858_v8, %s2676_s28  ;;  %v2533_v46 = vpack.i.bf16 %v2862_v10, %v850_v14 }
  0xaf   : > { %v852_v12 = vpop.f32.mrf.mxu0 }
  0xb0   : > { %v2870_v13 = vadd.f32 %v2553_v6, %v852_v12 }
  0xb2   : > { %1032 = vrot.lane.b32.xlu0 %v2870_v13, %s2676_s28  ;;  %1024 = vrot.lane.b32.xlu2 %v2870_v13, %s2675_s7 }
  0xb3   : > { %865 = vrot.lane.b32.xlu1 %v2870_v13, %s3418_s4 }
  0xba   : > { %1030 = vrot.lane.b32.xlu0 %v850_v14, %s2676_s28  ;;  %859 = vrot.lane.b32.xlu2 %v2858_v8, %s3418_s4 }
  0xbb   : > { %861 = vrot.lane.b32.xlu1 %v2862_v10, %s3418_s4 }
  0xc2   : > { %1022 = vrot.lane.b32.xlu0 %v850_v14, %s2675_s7 }
  0xca   : > { %863 = vrot.lane.b32.xlu0 %v850_v14, %s3418_s4  ;;  %s3440_s4 = sld [smem:[#allocation10_spill]] }
  0xf4   : > { %v1019_v19 = vpop.permute.xlu2 %1018 }
  0xfc   : > { %v1021_v21 = vpop.permute.xlu2 %1020 }
 0x10c   : > { %v1025_v23 = vpop.permute.xlu2 %1024 }
 0x114   : > { %v1029_v15 = vpop.permute.xlu1 %1028  ;;  %v860_v26 = vpop.permute.xlu2 %859 }
 0x11c   : > { %v1027_v16 = vpop.permute.xlu1 %1026 }
 0x124   : > { %v1033_v17 = vpop.permute.xlu0 %1032 }
 0x125   : > { %v866_v18 = vpop.permute.xlu1 %865  ;;  %2447 = vmatpush.xpose.msk.msra.mxu3 %vm867_vm1, %v1033_v17 }
 0x126   : > { %2434 = vmatpush.xpose.msk.msra.mxu1 %vm867_vm1, %v866_v18 }
 0x12c   : > { %v1031_v20 = vpop.permute.xlu0 %1030 }
 0x12d   : > { %2448 = vmatpush.xpose.msk.msra.mxu3 %vm867_vm1, %v1031_v20  ;;  %v862_v25 = vpop.permute.xlu1 %861 }
 0x131   : > { %2449 = vmatpush.xpose.msk.msra.mxu3 %vm867_vm1, %v1029_v15 }
 0x134   : > { %v1023_v22 = vpop.permute.xlu0 %1022 }
 0x135   : > { %2450 = vmatpush.xpose.msk.msra.mxu3 %vm867_vm1, %v1027_v16 }
 0x138   : > { %2451 = vmatmul.msk.f32.vlgmr.msra.gmra.mxu3 %vm867_vm1, %v1019_v19 }
 0x13c   : > { %v864_v24 = vpop.permute.xlu0 %863 }
 0x13d   : > { %2435 = vmatpush.xpose.msk.msra.mxu1 %vm867_vm1, %v864_v24 }
 0x140   : > { %2452 = vmatmul.msk.f32.gmra.mxu3 %vm867_vm1, %v1021_v21 }
 0x141   : > { %2436 = vmatpush.xpose.msk.msra.mxu1 %vm867_vm1, %v862_v25 }
 0x145   : > { %2437 = vmatpush.xpose.msk.msra.mxu1 %vm867_vm1, %v860_v26 }
 0x148   : > { %2438 = vmatmul.msk.f32.vlgmr.msra.gmra.mxu1 %vm867_vm1, %v2858_v8  ;;  %2453 = vmatmul.msk.f32.gmra.mxu3 %vm867_vm1, %v1023_v22 }
 0x150   : > { %2439 = vmatmul.msk.f32.gmra.mxu1 %vm867_vm1, %v2862_v10  ;;  %2454 = vmatmul.msk.f32.gmra.mxu3 %vm867_vm1, %v1025_v23 }
 0x158   : > { %2440 = vmatmul.msk.f32.gmra.mxu1 %vm867_vm1, %v850_v14 }
 0x160   : > { %2441 = vmatmul.msk.f32.gmra.mxu1 %vm867_vm1, %v2870_v13 }
 0x1bb   : > { %v1067_v27 = vpop.f32.mrf.mxu3 }
 0x1bc   : > { %v1079_v31 = vmul.f32 0.35355338, %v1067_v27 }
 0x1be   : > { %v1083_v35 = vsel %vm917_vm2, %v1079_v31, -inf }
 0x1c3   : > { %v1070_v34 = vpop.f32.mrf.mxu3 }
 0x1c4   : > { %v1080_v37 = vmul.f32 0.35355338, %v1070_v34 }
 0x1c5   : > { %v901_v28 = vpop.f32.mrf.mxu1 }
 0x1c6   : > { %v2904_v29 = vmul.f32 0.35355338, %v901_v28  ;;  %v1086_v40 = vsel %vm917_vm2, %v1080_v37, -inf }
 0x1c8   : > { %v918_v30 = vsel %vm917_vm2, %v2904_v29, -inf }
 0x1c9   : > { %919 = vmax.xlane.f32.xlu0 %v918_v30 }
 0x1cb   : > { %v1073_v42 = vpop.f32.mrf.mxu3 }
 0x1cc   : > { %v1081_v43 = vmul.f32 0.35355338, %v1073_v42 }
 0x1cd   : > { %v904_v32 = vpop.f32.mrf.mxu1 }
 0x1ce   : > { %v2908_v33 = vmul.f32 0.35355338, %v904_v32  ;;  %v1089_v44 = vsel %vm917_vm2, %v1081_v43, -inf }
 0x1d0   : > { %v921_v36 = vsel %vm917_vm2, %v2908_v33, -inf }
 0x1d1   : > { %1084 = vmax.xlane.f32.xlu0 %v1083_v35  ;;  %922 = vmax.xlane.f32.xlu1 %v921_v36 }
 0x1d3   : > { %v1076_v49 = vpop.f32.mrf.mxu3 }
 0x1d4   : > { %v1082_v50 = vmul.f32 0.35355338, %v1076_v49 }
 0x1d5   : > { %v907_v38 = vpop.f32.mrf.mxu1 }
 0x1d6   : > { %v2913_v39 = vmul.f32 0.35355338, %v907_v38  ;;  %v1092_v51 = vsel %vm927_vm3, %v1082_v50, -inf }
 0x1d8   : > { %v924_v41 = vsel %vm917_vm2, %v2913_v39, -inf }
 0x1d9   : > { %1087 = vmax.xlane.f32.xlu1 %v1086_v40  ;;  %925 = vmax.xlane.f32.xlu2 %v924_v41 }
 0x1dd   : > { %v910_v45 = vpop.f32.mrf.mxu1 }
 0x1de   : > { %v2920_v47 = vmul.f32 0.35355338, %v910_v45 }
 0x1e0   : > { %v928_v48 = vsel %vm927_vm3, %v2920_v47, -inf }
 0x1e1   : > { %1090 = vmax.xlane.f32.xlu2 %v1089_v44 }
 0x1e5   : > { %2534 = vrot.lane.b32.xlu0 %v2533_v46, %s3416_s29 }
 0x1e9   : > { %929 = vmax.xlane.f32.xlu2 %v928_v48 }
 0x1f1   : > { %1093 = vmax.xlane.f32.xlu2 %v1092_v51 }
 0x1f2   : > { %1133 = vrot.lane.b32.xlu1 %v2870_v13, %s3416_s29 }
 0x23c   : > { %v920_v52 = vpop.xlane.xlu0 %919 }
 0x23d   : > { %v931_v20 = vsub.f32 %v2904_v29, %v920_v52 }
 0x23f   : > { %v935_v22 = vmul.f32 1.442695, %v931_v20 }
 0x244   : > { %v1085_v53 = vpop.xlane.xlu0 %1084  ;;  %v923_v54 = vpop.xlane.xlu1 %922 }
 0x245   : > { %v1095_v55 = vsub.f32 %v1079_v31, %v1085_v53  ;;  %v932_v24 = vsub.f32 %v2908_v33, %v923_v54 }
 0x247   : > { %v1099_v56 = vmul.f32 1.442695, %v1095_v55  ;;  %v937_v26 = vmul.f32 1.442695, %v932_v24 }
 0x249   : > { %2569 = vpow2.f32 %v1099_v56 }
 0x24c   : > { %v1088_v57 = vpop.xlane.xlu1 %1087  ;;  %v926_v58 = vpop.xlane.xlu2 %925 }
 0x24d   : > { %v1096_v59 = vsub.f32 %v1080_v37, %v1088_v57  ;;  %v933_v25 = vsub.f32 %v2913_v39, %v926_v58 }
 0x24f   : > { %v2928_v60 = vpop.eup %2569  ;;  %v1101_v61 = vmul.f32 1.442695, %v1096_v59  ;;  %v939_v28 = vmul.f32 1.442695, %v933_v25 }
 0x250   : > { %v1107_v62 = vsel %vm917_vm2, %v2928_v60, 0.0 }
 0x251   : > { %2571 = vpow2.f32 %v1101_v61  ;;  %1108 = vadd.xlane.f32.xlu0 %v1107_v62 }
 0x254   : > { %v1091_v63 = vpop.xlane.xlu2 %1090 }
 0x255   : > { %v1097_v0 = vsub.f32 %v1081_v43, %v1091_v63 }
 0x257   : > { %v2932_v1 = vpop.eup %2571  ;;  %v1103_v6 = vmul.f32 1.442695, %v1097_v0  ;;  %v2535_v11 = vpop.permute.xlu0 %2534 }
 0x258   : > { %v1110_v7 = vsel %vm917_vm2, %v2932_v1, 0.0  ;;  %v2536_v14 = vunpack.i.l.bf16 %v2535_v11  ;;  %v2537_v15 = vunpack.i.h.bf16 %v2535_v11 }
 0x259   : > { %2573 = vpow2.f32 %v1103_v6  ;;  %1111 = vadd.xlane.f32.xlu2 %v1110_v7 }
 0x25c   : > { %v930_v16 = vpop.xlane.xlu2 %929 }
 0x25f   : > { %v2936_v9 = vpop.eup %2573 }
 0x260   : > { %v1113_v10 = vsel %vm917_vm2, %v2936_v9, 0.0 }
 0x261   : > { %1114 = vadd.xlane.f32.xlu1 %v1113_v10 }
 0x264   : > { %v1134_v12 = vpop.permute.xlu1 %1133  ;;  %v1094_v17 = vpop.xlane.xlu2 %1093 }
 0x265   : > { %2539 = vrot.lane.b32.xlu0 %v2533_v46, %s3414_s9  ;;  %2455 = vmatpush.msk.msrb.mxu0 %vm986_vm4, %v1134_v12  ;;  %v1098_v18 = vsub.f32 %v1082_v50, %v1094_v17 }
 0x267   : > { %1165 = vmatpush.msrb.mxu0 %v2536_v14  ;;  %v1105_v19 = vmul.f32 1.442695, %v1098_v18  ;;  %v1202_v14 = vld [vmem:[%s3434_s10 + $0x8] sm:$0xff] }
 0x269   : > { %1166 = vmatpush.msrb.mxu0 %v2537_v15  ;;  %2575 = vpow2.f32 %v1105_v19  ;;  %v1201_v15 = vld [vmem:[%s3434_s10] sm:$0xff] }
 0x26a   : > { %2577 = vpow2.f32 %v935_v22 }
 0x26b   : > { %2579 = vpow2.f32 %v937_v26 }
 0x26c   : > { %2581 = vpow2.f32 %v939_v28  ;;  %v2554_v28 = vld [vmem:[%s3435_s6] ss:$0 sm:$0xff]  ;;  %s3442_s6 = smov 112  }
 0x26f   : > { %v2576_v21 = vpop.eup %2575 }
 0x270   : > { %v1116_v23 = vsel %vm927_vm3, %v2576_v21, 0.0  ;;  %v2578_v27 = vpop.eup %2577 }
 0x271   : > { %1127 = vrot.lane.b32.xlu2 %v2858_v8, %s3416_s29  ;;  %v943_v30 = vsel %vm917_vm2, %v2578_v27, 0.0  ;;  %v2580_v31 = vpop.eup %2579 }
 0x272   : > { %v2582_v32 = vpop.eup %2581  ;;  %v946_v34 = vsel %vm917_vm2, %v2580_v31, 0.0 }
 0x273   : > { %v949_v33 = vsel %vm917_vm2, %v2582_v32, 0.0 }
 0x27a   : > { %969 = vrot.lane.b32.xlu1 %v2870_v13, %s3414_s9  ;;  %v934_v13 = vsub.f32 %v2920_v47, %v930_v16 }
 0x27c   : > { %v941_v29 = vmul.f32 1.442695, %v934_v13 }
 0x27e   : > { %2583 = vpow2.f32 %v941_v29 }
 0x284   : > { %v2584_v35 = vpop.eup %2583 }
 0x285   : > { %v952_v36 = vsel %vm927_vm3, %v2584_v35, 0.0 }
 0x28f   : > { %1117 = vadd.xlane.f32.xlu0 %v1116_v23 }
 0x29a   : > { %944 = vadd.xlane.f32.xlu2 %v943_v30 }
 0x2a2   : > { %947 = vadd.xlane.f32.xlu2 %v946_v34 }
 0x2a3   : > { %963 = vrot.lane.b32.xlu0 %v2858_v8, %s3414_s9  ;;  %s3438_s9 = sld [smem:[#allocation8_spill]] }
 0x2a4   : > { %950 = vadd.xlane.f32.xlu1 %v949_v33 }
 0x2aa   : > { %953 = vadd.xlane.f32.xlu2 %v952_v36 }
 0x2c4   : > { %v1109_v37 = vpop.xlane.xlu0 %1108 }
 0x2c5   : > { %2585 = vrcp.f32 %v1109_v37 }
 0x2cb   : > { %v2586_v39 = vpop.eup %2585 }
 0x2cc   : > { %v1112_v38 = vpop.xlane.xlu2 %1111  ;;  %v1123_v41 = vmul.f32 %v2586_v39, %v2928_v60 }
 0x2cd   : > { %2587 = vrcp.f32 %v1112_v38 }
 0x2ce   : > { %v1570_v55 = vrot.slane %v1123_v41, 7 }
 0x2d3   : > { %v2588_v8 = vpop.eup %2587 }
 0x2d4   : > { %v1128_v40 = vpop.permute.xlu2 %1127  ;;  %v1115_v42 = vpop.xlane.xlu1 %1114  ;;  %v1124_v43 = vmul.f32 %v2588_v8, %v2932_v1  ;;  %v2681_v8 = vmov 16.0  }
 0x2d5   : > { %1167 = vmatpush.msrb.mxu0 %v1128_v40  ;;  %2589 = vrcp.f32 %v1115_v42 }
 0x2d6   : > { %2456 = vmatmul.msk.f32.vlgmr.msrb.gmra.mxu0 %vm917_vm2, %v1123_v41 }
 0x2d7   : > { %v2540_v46 = vpop.permute.xlu0 %2539 }
 0x2d8   : > { %v2541_v48 = vunpack.i.l.bf16 %v2540_v46  ;;  %v2542_v49 = vunpack.i.h.bf16 %v2540_v46 }
 0x2db   : > { %v2590_v44 = vpop.eup %2589 }
 0x2dc   : > { %v1125_v45 = vmul.f32 %v2590_v44, %v2936_v9 }
 0x2de   : > { %2457 = vmatmul.msk.f32.gmra.mxu0 %vm917_vm2, %v1124_v43 }
 0x2e6   : > { %2458 = vmatmul.msk.f32.gmra.mxu0 %vm917_vm2, %v1125_v45 }
 0x2ec   : > { %v970_v47 = vpop.permute.xlu1 %969 }
 0x2ed   : > { %2442 = vmatpush.msk.msra.mxu2 %vm986_vm4, %v970_v47 }
 0x2ef   : > { %1002 = vmatpush.msra.mxu2 %v2541_v48 }
 0x2f1   : > { %1003 = vmatpush.msra.mxu2 %v2542_v49 }
 0x302   : > { %v1118_v50 = vpop.xlane.xlu0 %1117 }
 0x303   : > { %2591 = vrcp.f32 %v1118_v50 }
 0x309   : > { %v2592_v51 = vpop.eup %2591 }
 0x30a   : > { %v1126_v52 = vmul.f32 %v2592_v51, %v2576_v21 }
 0x30c   : > { %2459 = vmatmul.msk.f32.gmra.mxu0 %vm917_vm2, %v1126_v52 }
 0x30d   : > { %v945_v53 = vpop.xlane.xlu2 %944 }
 0x30e   : > { %2593 = vrcp.f32 %v945_v53 }
 0x314   : > { %v2594_v54 = vpop.eup %2593 }
 0x315   : > { %v964_v56 = vpop.permute.xlu0 %963  ;;  %v948_v57 = vpop.xlane.xlu2 %947  ;;  %v959_v58 = vmul.f32 %v2594_v54, %v2578_v27 }
 0x316   : > { %2595 = vrcp.f32 %v948_v57  ;;  %1004 = vmatpush.msra.mxu2 %v964_v56 }
 0x317   : > { %2443 = vmatmul.msk.f32.vlgmr.msra.gmra.mxu2 %vm917_vm2, %v959_v58  ;;  %v2967_v59 = vsel %vm1572_vm5, %v959_v58, %v1570_v55  ;;  %v951_v60 = vpop.xlane.xlu1 %950 }
 0x318   : > { %2597 = vrcp.f32 %v951_v60  ;;  %1233 = vmatpush.msrb.mxu2 %v1202_v14 }
 0x31a   : > { %1234 = vmatpush.msrb.mxu2 %v1201_v15 }
 0x31c   : > { %v2596_v61 = vpop.eup %2595 }
 0x31d   : > { %v960_v62 = vmul.f32 %v2596_v61, %v2580_v31  ;;  %v954_v63 = vpop.xlane.xlu2 %953 }
 0x31e   : > { %v2598_v0 = vpop.eup %2597  ;;  %2599 = vrcp.f32 %v954_v63 }
 0x31f   : > { %2444 = vmatmul.msk.f32.gmra.mxu2 %vm917_vm2, %v960_v62  ;;  %v961_v1 = vmul.f32 %v2598_v0, %v2582_v32  ;;  %2601 = vrcp.f32 %v2681_v8 }
 0x324   : > { %v2600_v6 = vpop.eup %2599 }
 0x325   : > { %v962_v7 = vmul.f32 %v2600_v6, %v2584_v35 }
 0x327   : > { %2445 = vmatmul.msk.f32.gmra.mxu2 %vm917_vm2, %v961_v1 }
 0x32f   : > { %2446 = vmatmul.msk.f32.gmra.mxu2 %vm917_vm2, %v962_v7  ;;  %v1365_v7 = vld [vmem:[%s3436_s5 + $0x8] sm:$0xff] }
 0x330   : > { %1396 = vmatpush.msrb.mxu1 %v1365_v7 }
 0x353   : > { %v1169_v9 = vpop.f32.mrf.mxu0 }
 0x354   : > { %1185 = vrot.lane.b32.xlu0 %v1169_v9, %s3412_s30  ;;  %v1364_v9 = vld [vmem:[%s3436_s5] sm:$0xff] }
 0x355   : > { %1397 = vmatpush.msrb.mxu1 %v1364_v9 }
 0x35b   : > { %v1172_v10 = vpop.f32.mrf.mxu0 }
 0x35c   : > { %1187 = vrot.lane.b32.xlu2 %v1172_v10, %s3412_s30 }
 0x363   : > { %v1175_v11 = vpop.f32.mrf.mxu0 }
 0x364   : > { %1189 = vrot.lane.b32.xlu0 %v1175_v11, %s3412_s30 }
 0x389   : > { %v1178_v12 = vpop.f32.mrf.mxu0 }
 0x38a   : > { %1191 = vrot.lane.b32.xlu0 %v1178_v12, %s3412_s30 }
 0x39a   : > { %v1006_v16 = vpop.f32.mrf.mxu2 }
 0x3a2   : > { %v1009_v19 = vpop.f32.mrf.mxu2 }
 0x3aa   : > { %v1012_v22 = vpop.f32.mrf.mxu2 }
 0x3b2   : > { %v1015_v25 = vpop.f32.mrf.mxu2 }
 0x3b6   : > { %v1188_v20 = vpop.permute.xlu2 %1187 }
 0x3b7   : > { %v1198_v21 = vsel %vm867_vm1, %v1009_v19, %v1188_v20 }
 0x3c6   : > { %v1186_v17 = vpop.permute.xlu0 %1185 }
 0x3c7   : > { %v1197_v18 = vsel %vm867_vm1, %v1006_v16, %v1186_v17 }
 0x3c8   : > { %2460 = vmatmul.msk.f32.vlgmr.msrb.gmra.mxu2 %vm813_vm0, %v1197_v18 }
 0x3d0   : > { %2461 = vmatmul.msk.f32.gmra.mxu2 %vm813_vm0, %v1198_v21 }
 0x3d6   : > { %v1190_v23 = vpop.permute.xlu0 %1189 }
 0x3d7   : > { %v1199_v24 = vsel %vm867_vm1, %v1012_v22, %v1190_v23 }
 0x3d8   : > { %2462 = vmatmul.msk.f32.gmra.mxu2 %vm813_vm0, %v1199_v24 }
 0x3fc   : > { %v1192_v26 = vpop.permute.xlu0 %1191 }
 0x3fd   : > { %v1200_v27 = vsel %vm867_vm1, %v1015_v25, %v1192_v26 }
 0x3fe   : > { %2463 = vmatmul.msk.f32.gmra.mxu2 %vm813_vm0, %v1200_v27 }
 0x44b   : > { %v1236_v13 = vpop.f32.mrf.mxu2 }
 0x44c   : > { %v1237_v30 = vadd.f32 %v2554_v28, %v1236_v13 }
 0x44e   : > { %v1248_v29 = vadd.f32 %v1237_v30, %v2839_v2 }
 0x450   : > { %v1252_v31 = vsel %vm813_vm0, %v1248_v29, 0.0 }
 0x451   : > { %1253 = vadd.xlane.f32.xlu0 %v1252_v31  ;;  %v2556_v31 = vld [vmem:[%s3438_s9] ss:$0 sm:$0xff]  ;;  %s3441_s9 = sld [smem:[#allocation12_spill]] }
 0x453   : > { %v1239_v32 = vpop.f32.mrf.mxu2 }
 0x454   : > { %v1240_v34 = vadd.f32 %v2554_v28, %v1239_v32 }
 0x456   : > { %v1249_v33 = vadd.f32 %v1240_v34, %v2843_v3  ;;  %v2602_v3 = vpop.eup %2601 }
 0x457   : > { %v1266_v43 = vmul.f32 16.0, %v2602_v3  ;;  %vm1270_vm7 = vweird.f32 %v2602_v3 }
 0x458   : > { %v1255_v35 = vsel %vm813_vm0, %v1249_v33, 0.0 }
 0x459   : > { %1256 = vadd.xlane.f32.xlu2 %v1255_v35  ;;  %v1267_v44 = vsub.f32 1.0, %v1266_v43 }
 0x45b   : > { %v1242_v36 = vpop.f32.mrf.mxu2  ;;  %v1268_v45 = vmul.f32 %v2602_v3, %v1267_v44 }
 0x45c   : > { %v1243_v37 = vadd.f32 %v2554_v28, %v1242_v36 }
 0x45d   : > { %v1269_v46 = vadd.f32 %v2602_v3, %v1268_v45 }
 0x45e   : > { %v1250_v38 = vadd.f32 %v1243_v37, %v2847_v4 }
 0x45f   : > { %v3001_v4 = vsel %vm1270_vm7, %v2602_v3, %v1269_v46 }
 0x460   : > { %v1258_v39 = vsel %vm813_vm0, %v1250_v38, 0.0 }
 0x461   : > { %1259 = vadd.xlane.f32.xlu1 %v1258_v39 }
 0x481   : > { %v1245_v40 = vpop.f32.mrf.mxu2 }
 0x482   : > { %v1246_v41 = vadd.f32 %v2554_v28, %v1245_v40  ;;  %v2555_v28 = vld [vmem:[%s3437_s2] ss:$0 sm:$0xff] }
 0x484   : > { %v1251_v2 = vadd.f32 %v1246_v41, %v2851_v5 }
 0x486   : > { %v1262_v42 = vsel %vm1261_vm6, %v1251_v2, 0.0 }
 0x487   : > { %1263 = vadd.xlane.f32.xlu1 %v1262_v42 }
 0x4c4   : > { %v1254_v47 = vpop.xlane.xlu0 %1253 }
 0x4c5   : > { %v1272_v48 = vmul.f32 %v3001_v4, %v1254_v47 }
 0x4c7   : > { %v1276_v49 = vsub.f32 %v1248_v29, %v1272_v48 }
 0x4c9   : > { %v1280_v50 = vmul.f32 %v1276_v49, %v1276_v49 }
 0x4cb   : > { %v1284_v5 = vsel %vm813_vm0, %v1280_v50, 0.0 }
 0x4cc   : > { %1285 = vadd.xlane.f32.xlu1 %v1284_v5  ;;  %v1257_v51 = vpop.xlane.xlu2 %1256 }
 0x4cd   : > { %v1273_v52 = vmul.f32 %v3001_v4, %v1257_v51 }
 0x4cf   : > { %v1277_v53 = vsub.f32 %v1249_v33, %v1273_v52 }
 0x4d1   : > { %v1281_v54 = vmul.f32 %v1277_v53, %v1277_v53 }
 0x4d3   : > { %v1287_v55 = vsel %vm813_vm0, %v1281_v54, 0.0 }
 0x4d4   : > { %v1260_v56 = vpop.xlane.xlu1 %1259  ;;  %1288 = vadd.xlane.f32.xlu1 %v1287_v55 }
 0x4d5   : > { %v1274_v57 = vmul.f32 %v3001_v4, %v1260_v56 }
 0x4d7   : > { %v3008_v58 = vsub.f32 %v1250_v38, %v1274_v57 }
 0x4d9   : > { %v1282_v60 = vmul.f32 %v3008_v58, %v3008_v58 }
 0x4db   : > { %v1290_v61 = vsel %vm813_vm0, %v1282_v60, 0.0 }
 0x4dc   : > { %1291 = vadd.xlane.f32.xlu0 %v1290_v61  ;;  %v1416_v61 = vld [vmem:[%s3439_s0 + $0x8] sm:$0xff] }
 0x4dd   : > { %1447 = vmatpush.msrb.mxu3 %v1416_v61 }
 0x4fa   : > { %v1264_v62 = vpop.xlane.xlu1 %1263 }
 0x4fb   : > { %v1275_v63 = vmul.f32 %v3001_v4, %v1264_v62  ;;  %v1415_v62 = vld [vmem:[%s3439_s0] sm:$0xff] }
 0x4fc   : > { %1448 = vmatpush.msrb.mxu3 %v1415_v62 }
 0x4fd   : > { %v3014_v0 = vsub.f32 %v1251_v2, %v1275_v63  ;;  %v2557_v63 = vld [vmem:[%s3440_s4] ss:$0 sm:$0xff]  ;;  %s2429_s4 = sshll.u32 %s3448_s3, 1 }
 0x4fe   : > { %s802_s30 = scalar_lea.vmem %s3406_s26, %s2429_s4 }
 0x4ff   : > { %v1283_v1 = vmul.f32 %v3014_v0, %v3014_v0 }
 0x501   : > { %v1293_v6 = vsel %vm1261_vm6, %v1283_v1, 0.0 }
 0x502   : > { %1294 = vadd.xlane.f32.xlu1 %v1293_v6 }
 0x53f   : > { %v1286_v10 = vpop.xlane.xlu1 %1285 }
 0x540   : > { %v1296_v11 = vmul.f32 %v1286_v10, %v3001_v4 }
 0x542   : > { %v1300_v12 = vadd.f32 1e-12, %v1296_v11 }
 0x544   : > { %2603 = vrsqrt.f32 %v1300_v12  ;;  %vm1310_vm9 = vweird.f32 %v1300_v12 }
 0x547   : > { %v1289_v14 = vpop.xlane.xlu1 %1288 }
 0x548   : > { %v1297_v15 = vmul.f32 %v1289_v14, %v3001_v4 }
 0x54a   : > { %v2604_v16 = vpop.eup %2603  ;;  %v1301_v17 = vadd.f32 1e-12, %v1297_v15 }
 0x54b   : > { %v1305_v18 = vmul.f32 %v2604_v16, %v1300_v12  ;;  %vm1311_vm8 = vweird.f32 %v2604_v16 }
 0x54c   : > { %2605 = vrsqrt.f32 %v1301_v17  ;;  %vm1312_vm10 = vmor %vm1310_vm9, %vm1311_vm8  ;;  %vm1320_vm12 = vweird.f32 %v1301_v17 }
 0x54d   : > { %v1306_v19 = vmul.f32 %v2604_v16, %v1305_v18  ;;  %v2558_v18 = vld [vmem:[%s3441_s9] ss:$0 sm:$0xff] }
 0x54f   : > { %v1307_v20 = vmul.f32 0.5, %v1306_v19  ;;  %v1292_v21 = vpop.xlane.xlu0 %1291 }
 0x550   : > { %v1298_v22 = vmul.f32 %v1292_v21, %v3001_v4 }
 0x551   : > { %v1308_v23 = vsub.f32 1.5, %v1307_v20 }
 0x552   : > { %v2606_v24 = vpop.eup %2605  ;;  %v1302_v25 = vadd.f32 1e-12, %v1298_v22 }
 0x553   : > { %v1309_v26 = vmul.f32 %v2604_v16, %v1308_v23  ;;  %v1315_v27 = vmul.f32 %v2606_v24, %v1301_v17  ;;  %vm1321_vm11 = vweird.f32 %v2606_v24 }
 0x554   : > { %2607 = vrsqrt.f32 %v1302_v25  ;;  %vm1322_vm13 = vmor %vm1320_vm12, %vm1321_vm11  ;;  %vm1330_vm15 = vweird.f32 %v1302_v25 }
 0x555   : > { %v1313_v13 = vsel %vm1312_vm10, %v2604_v16, %v1309_v26  ;;  %v1316_v30 = vmul.f32 %v2606_v24, %v1315_v27 }
 0x556   : > { %v1344_v29 = vmul.f32 %v1313_v13, %v1276_v49 }
 0x557   : > { %v1317_v32 = vmul.f32 0.5, %v1316_v30 }
 0x558   : > { %v1352_v34 = vmul.f32 %v2555_v28, %v1344_v29 }
 0x559   : > { %v1318_v33 = vsub.f32 1.5, %v1317_v32 }
 0x55a   : > { %v2608_v35 = vpop.eup %2607  ;;  %v3034_v36 = vadd.f32 %v2556_v31, %v1352_v34 }
 0x55b   : > { %v1319_v37 = vmul.f32 %v2606_v24, %v1318_v33  ;;  %v1325_v38 = vmul.f32 %v2608_v35, %v1302_v25  ;;  %vm1331_vm14 = vweird.f32 %v2608_v35 }
 0x55c   : > { %2464 = vmatmul.msk.f32.vlgmr.msrb.gmra.mxu1 %vm813_vm0, %v3034_v36  ;;  %vm1332_vm7 = vmor %vm1330_vm15, %vm1331_vm14 }
 0x55d   : > { %v1323_v39 = vsel %vm1322_vm13, %v2606_v24, %v1319_v37  ;;  %v1326_v40 = vmul.f32 %v2608_v35, %v1325_v38 }
 0x55e   : > { %v1345_v41 = vmul.f32 %v1323_v39, %v1277_v53 }
 0x55f   : > { %v1327_v2 = vmul.f32 0.5, %v1326_v40 }
 0x560   : > { %v1353_v42 = vmul.f32 %v2555_v28, %v1345_v41 }
 0x561   : > { %v1328_v8 = vsub.f32 1.5, %v1327_v2 }
 0x562   : > { %v1361_v3 = vadd.f32 %v2556_v31, %v1353_v42 }
 0x563   : > { %v1329_v43 = vmul.f32 %v2608_v35, %v1328_v8 }
 0x564   : > { %2465 = vmatmul.msk.f32.gmra.mxu1 %vm813_vm0, %v1361_v3 }
 0x565   : > { %v1333_v44 = vsel %vm1332_vm7, %v2608_v35, %v1329_v43 }
 0x566   : > { %v1346_v45 = vmul.f32 %v1333_v44, %v3008_v58 }
 0x568   : > { %v1354_v46 = vmul.f32 %v2555_v28, %v1346_v45 }
 0x56a   : > { %v1362_v47 = vadd.f32 %v2556_v31, %v1354_v46 }
 0x56c   : > { %2466 = vmatmul.msk.f32.gmra.mxu1 %vm813_vm0, %v1362_v47 }
 0x575   : > { %v1295_v48 = vpop.xlane.xlu1 %1294 }
 0x576   : > { %v1299_v49 = vmul.f32 %v1295_v48, %v3001_v4 }
 0x578   : > { %v1303_v50 = vadd.f32 1e-12, %v1299_v49 }
 0x57a   : > { %2609 = vrsqrt.f32 %v1303_v50  ;;  %vm1340_vm9 = vweird.f32 %v1303_v50 }
 0x580   : > { %v2610_v5 = vpop.eup %2609 }
 0x581   : > { %v1335_v51 = vmul.f32 %v2610_v5, %v1303_v50  ;;  %vm1341_vm8 = vweird.f32 %v2610_v5 }
 0x582   : > { %vm1342_vm10 = vmor %vm1340_vm9, %vm1341_vm8 }
 0x583   : > { %v1336_v52 = vmul.f32 %v2610_v5, %v1335_v51  ;;  %v1574_v51 = vld [vmem:[%s3393_s13] sm:$0xff] }
 0x585   : > { %v1337_v53 = vmul.f32 0.5, %v1336_v52 }
 0x587   : > { %v1338_v54 = vsub.f32 1.5, %v1337_v53 }
 0x589   : > { %v1339_v55 = vmul.f32 %v2610_v5, %v1338_v54 }
 0x58b   : > { %v1343_v56 = vsel %vm1342_vm10, %v2610_v5, %v1339_v55  ;;  %v1575_v5 = vld [vmem:[%s3393_s13 + $0x8] sm:$0xff] }
 0x58c   : > { %v1347_v57 = vmul.f32 %v1343_v56, %v3014_v0  ;;  %1606 = vmatpush.msra.mxu0 %v1575_v5 }
 0x58e   : > { %v1355_v58 = vmul.f32 %v2555_v28, %v1347_v57  ;;  %1607 = vmatpush.msra.mxu0 %v1574_v51 }
 0x590   : > { %v1363_v60 = vadd.f32 %v2556_v31, %v1355_v58 }
 0x592   : > { %2467 = vmatmul.msk.f32.gmra.mxu1 %vm813_vm0, %v1363_v60 }
 0x5d9   : > { %v1399_v1 = vpop.f32.mrf.mxu1 }
 0x5da   : > { %v1400_v0 = vadd.f32 %v2557_v63, %v1399_v1 }
 0x5dc   : > { %v1411_v6 = vmax.f32 %v1400_v0, 0.0 }
 0x5de   : > { %2468 = vmatmul.msk.f32.vlgmr.msrb.gmra.mxu3 %vm813_vm0, %v1411_v6 }
 0x5e1   : > { %v1402_v7 = vpop.f32.mrf.mxu1 }
 0x5e2   : > { %v1403_v9 = vadd.f32 %v2557_v63, %v1402_v7 }
 0x5e4   : > { %v1412_v10 = vmax.f32 %v1403_v9, 0.0 }
 0x5e6   : > { %2469 = vmatmul.msk.f32.gmra.mxu3 %vm813_vm0, %v1412_v10 }
 0x5e9   : > { %v1405_v11 = vpop.f32.mrf.mxu1 }
 0x5ea   : > { %v1406_v12 = vadd.f32 %v2557_v63, %v1405_v11  ;;  %v2559_v11 = vld [vmem:[%s3391_s11] ss:$0 sm:$0xff] }
 0x5ec   : > { %v1413_v14 = vmax.f32 %v1406_v12, 0.0 }
 0x5ee   : > { %2470 = vmatmul.msk.f32.gmra.mxu3 %vm813_vm0, %v1413_v14 }
 0x60f   : > { %v1408_v15 = vpop.f32.mrf.mxu1 }
 0x610   : > { %v1409_v16 = vadd.f32 %v2557_v63, %v1408_v15 }
 0x612   : > { %v1414_v17 = vmax.f32 %v1409_v16, 0.0  ;;  %v2560_v16 = vld [vmem:[%s3392_s12] ss:$0 sm:$0xff] }
 0x614   : > { %2471 = vmatmul.msk.f32.gmra.mxu3 %vm813_vm0, %v1414_v17 }
 0x661   : > { %v1450_v19 = vpop.f32.mrf.mxu3 }
 0x662   : > { %v1451_v20 = vadd.f32 %v2558_v18, %v1450_v19 }
 0x664   : > { %v1462_v21 = vadd.f32 %v1451_v20, %v3034_v36 }
 0x666   : > { %v1466_v22 = vsel %vm813_vm0, %v1462_v21, 0.0 }
 0x667   : > { %1467 = vadd.xlane.f32.xlu2 %v1466_v22 }
 0x669   : > { %v1453_v23 = vpop.f32.mrf.mxu3 }
 0x66a   : > { %v1454_v24 = vadd.f32 %v2558_v18, %v1453_v23 }
 0x66c   : > { %v1463_v25 = vadd.f32 %v1454_v24, %v1361_v3 }
 0x66e   : > { %v1469_v26 = vsel %vm813_vm0, %v1463_v25, 0.0 }
 0x66f   : > { %1470 = vadd.xlane.f32.xlu0 %v1469_v26 }
 0x671   : > { %v1456_v27 = vpop.f32.mrf.mxu3 }
 0x672   : > { %v1457_v28 = vadd.f32 %v2558_v18, %v1456_v27 }
 0x674   : > { %v1464_v13 = vadd.f32 %v1457_v28, %v1362_v47 }
 0x676   : > { %v1472_v30 = vsel %vm813_vm0, %v1464_v13, 0.0 }
 0x677   : > { %1473 = vadd.xlane.f32.xlu1 %v1472_v30 }
 0x697   : > { %v1459_v29 = vpop.f32.mrf.mxu3 }
 0x698   : > { %v1460_v31 = vadd.f32 %v2558_v18, %v1459_v29 }
 0x69a   : > { %v1465_v32 = vadd.f32 %v1460_v31, %v1363_v60 }
 0x69c   : > { %v1475_v34 = vsel %vm1261_vm6, %v1465_v32, 0.0 }
 0x69d   : > { %1476 = vadd.xlane.f32.xlu2 %v1475_v34 }
 0x6da   : > { %v1468_v33 = vpop.xlane.xlu2 %1467 }
 0x6db   : > { %v1478_v35 = vmul.f32 %v1468_v33, %v3001_v4 }
 0x6dd   : > { %v1482_v36 = vsub.f32 %v1462_v21, %v1478_v35 }
 0x6df   : > { %v1486_v37 = vmul.f32 %v1482_v36, %v1482_v36 }
 0x6e1   : > { %v1490_v38 = vsel %vm813_vm0, %v1486_v37, 0.0 }
 0x6e2   : > { %v1471_v39 = vpop.xlane.xlu0 %1470  ;;  %1491 = vadd.xlane.f32.xlu0 %v1490_v38 }
 0x6e3   : > { %v1479_v40 = vmul.f32 %v1471_v39, %v3001_v4 }
 0x6e5   : > { %v1483_v41 = vsub.f32 %v1463_v25, %v1479_v40 }
 0x6e7   : > { %v1487_v2 = vmul.f32 %v1483_v41, %v1483_v41 }
 0x6e9   : > { %v1493_v42 = vsel %vm813_vm0, %v1487_v2, 0.0 }
 0x6ea   : > { %1494 = vadd.xlane.f32.xlu1 %v1493_v42  ;;  %v1474_v8 = vpop.xlane.xlu1 %1473 }
 0x6eb   : > { %v1480_v3 = vmul.f32 %v1474_v8, %v3001_v4 }
 0x6ed   : > { %v3070_v43 = vsub.f32 %v1464_v13, %v1480_v3 }
 0x6ef   : > { %v1488_v44 = vmul.f32 %v3070_v43, %v3070_v43 }
 0x6f1   : > { %v1496_v45 = vsel %vm813_vm0, %v1488_v44, 0.0 }
 0x6f2   : > { %1497 = vadd.xlane.f32.xlu2 %v1496_v45 }
 0x710   : > { %v1477_v46 = vpop.xlane.xlu2 %1476 }
 0x711   : > { %v1481_v47 = vmul.f32 %v1477_v46, %v3001_v4  ;;  %v2561_v46 = vld [vmem:[%s3394_s14] ss:$0 sm:$0xff] }
 0x713   : > { %v3076_v48 = vsub.f32 %v1465_v32, %v1481_v47 }
 0x715   : > { %v1489_v49 = vmul.f32 %v3076_v48, %v3076_v48 }
 0x717   : > { %v1499_v50 = vsel %vm1261_vm6, %v1489_v49, 0.0 }
 0x718   : > { %1500 = vadd.xlane.f32.xlu0 %v1499_v50 }
 0x755   : > { %v1492_v52 = vpop.xlane.xlu0 %1491 }
 0x756   : > { %v1502_v53 = vmul.f32 %v1492_v52, %v3001_v4 }
 0x758   : > { %v1506_v54 = vadd.f32 1e-12, %v1502_v53 }
 0x75a   : > { %2611 = vrsqrt.f32 %v1506_v54  ;;  %vm1516_vm12 = vweird.f32 %v1506_v54 }
 0x75d   : > { %v1495_v55 = vpop.xlane.xlu1 %1494 }
 0x75e   : > { %v1503_v56 = vmul.f32 %v1495_v55, %v3001_v4 }
 0x760   : > { %v2612_v57 = vpop.eup %2611  ;;  %v1507_v58 = vadd.f32 1e-12, %v1503_v56 }
 0x761   : > { %v1511_v60 = vmul.f32 %v2612_v57, %v1506_v54  ;;  %vm1517_vm11 = vweird.f32 %v2612_v57 }
 0x762   : > { %2613 = vrsqrt.f32 %v1507_v58  ;;  %vm1518_vm13 = vmor %vm1516_vm12, %vm1517_vm11  ;;  %vm1526_vm15 = vweird.f32 %v1507_v58 }
 0x763   : > { %v1512_v61 = vmul.f32 %v2612_v57, %v1511_v60 }
 0x765   : > { %v1513_v62 = vmul.f32 0.5, %v1512_v61  ;;  %v1498_v63 = vpop.xlane.xlu2 %1497 }
 0x766   : > { %v1504_v1 = vmul.f32 %v1498_v63, %v3001_v4 }
 0x767   : > { %v1514_v0 = vsub.f32 1.5, %v1513_v62 }
 0x768   : > { %v2614_v6 = vpop.eup %2613  ;;  %v1508_v7 = vadd.f32 1e-12, %v1504_v1 }
 0x769   : > { %v1515_v9 = vmul.f32 %v2612_v57, %v1514_v0  ;;  %v1521_v10 = vmul.f32 %v2614_v6, %v1507_v58  ;;  %vm1527_vm14 = vweird.f32 %v2614_v6 }
 0x76a   : > { %2615 = vrsqrt.f32 %v1508_v7  ;;  %vm1528_vm7 = vmor %vm1526_vm15, %vm1527_vm14  ;;  %vm1536_vm9 = vweird.f32 %v1508_v7 }
 0x76b   : > { %v1519_v12 = vsel %vm1518_vm13, %v2612_v57, %v1515_v9  ;;  %v1522_v14 = vmul.f32 %v2614_v6, %v1521_v10 }
 0x76c   : > { %v1550_v15 = vmul.f32 %v1519_v12, %v1482_v36 }
 0x76d   : > { %v1523_v17 = vmul.f32 0.5, %v1522_v14 }
 0x76e   : > { %v1558_v18 = vmul.f32 %v2559_v11, %v1550_v15 }
 0x76f   : > { %v1524_v19 = vsub.f32 1.5, %v1523_v17 }
 0x770   : > { %v2616_v20 = vpop.eup %2615  ;;  %v3096_v21 = vadd.f32 %v2560_v16, %v1558_v18 }
 0x771   : > { %v1525_v22 = vmul.f32 %v2614_v6, %v1524_v19  ;;  %v1531_v23 = vmul.f32 %v2616_v20, %v1508_v7  ;;  %vm1537_vm8 = vweird.f32 %v2616_v20 }
 0x772   : > { %2472 = vmatmul.msk.f32.vlgmr.msra.gmra.mxu0 %vm813_vm0, %v3096_v21  ;;  %vm1538_vm10 = vmor %vm1536_vm9, %vm1537_vm8 }
 0x773   : > { %v1529_v24 = vsel %vm1528_vm7, %v2614_v6, %v1525_v22  ;;  %v1532_v25 = vmul.f32 %v2616_v20, %v1531_v23 }
 0x774   : > { %v1551_v26 = vmul.f32 %v1529_v24, %v1483_v41 }
 0x775   : > { %v1533_v27 = vmul.f32 0.5, %v1532_v25 }
 0x776   : > { %v1559_v28 = vmul.f32 %v2559_v11, %v1551_v26 }
 0x777   : > { %v1534_v13 = vsub.f32 1.5, %v1533_v27 }
 0x778   : > { %v3100_v30 = vadd.f32 %v2560_v16, %v1559_v28 }
 0x779   : > { %v1535_v29 = vmul.f32 %v2616_v20, %v1534_v13 }
 0x77a   : > { %2473 = vmatmul.msk.f32.gmra.mxu0 %vm813_vm0, %v3100_v30 }
 0x77b   : > { %v1539_v31 = vsel %vm1538_vm10, %v2616_v20, %v1535_v29 }
 0x77c   : > { %v1552_v32 = vmul.f32 %v1539_v31, %v3070_v43 }
 0x77e   : > { %v1560_v34 = vmul.f32 %v2559_v11, %v1552_v32 }
 0x780   : > { %v3105_v33 = vadd.f32 %v2560_v16, %v1560_v34 }
 0x782   : > { %2474 = vmatmul.msk.f32.gmra.mxu0 %vm813_vm0, %v3105_v33 }
 0x78b   : > { %v1501_v35 = vpop.xlane.xlu0 %1500 }
 0x78c   : > { %v1505_v36 = vmul.f32 %v1501_v35, %v3001_v4 }
 0x78e   : > { %v1509_v37 = vadd.f32 1e-12, %v1505_v36 }
 0x790   : > { %2617 = vrsqrt.f32 %v1509_v37  ;;  %vm1546_vm12 = vweird.f32 %v1509_v37 }
 0x796   : > { %v2618_v38 = vpop.eup %2617 }
 0x797   : > { %v1541_v39 = vmul.f32 %v2618_v38, %v1509_v37  ;;  %vm1547_vm11 = vweird.f32 %v2618_v38 }
 0x798   : > { %vm1548_vm13 = vmor %vm1546_vm12, %vm1547_vm11 }
 0x799   : > { %v1542_v40 = vmul.f32 %v2618_v38, %v1541_v39 }
 0x79b   : > { %v1543_v41 = vmul.f32 0.5, %v1542_v40 }
 0x79d   : > { %v1544_v2 = vsub.f32 1.5, %v1543_v41 }
 0x79f   : > { %v1545_v42 = vmul.f32 %v2618_v38, %v1544_v2 }
 0x7a1   : > { %v1549_v8 = vsel %vm1548_vm13, %v2618_v38, %v1545_v42 }
 0x7a2   : > { %v1553_v3 = vmul.f32 %v1549_v8, %v3076_v48 }
 0x7a4   : > { %v1561_v43 = vmul.f32 %v2559_v11, %v1553_v3 }
 0x7a6   : > { %v3111_v44 = vadd.f32 %v2560_v16, %v1561_v43 }
 0x7a8   : > { %2475 = vmatmul.msk.f32.gmra.mxu0 %vm813_vm0, %v3111_v44 }
 0x7ef   : > { %v1609_v45 = vpop.f32.mrf.mxu0 }
 0x7f0   : > { %v3122_v5 = vadd.f32 %v2561_v46, %v1609_v45 }
 0x7f7   : > { %v1612_v47 = vpop.f32.mrf.mxu0 }
 0x7f8   : > { %v3118_v49 = vadd.f32 %v2561_v46, %v1612_v47 }
 0x7fa   : > { %1790 = vrot.lane.b32.xlu0 %v3118_v49, %s2676_s28 }
 0x7ff   : > { %v1615_v50 = vpop.f32.mrf.mxu0 }
 0x800   : > { %v3124_v48 = vadd.f32 %v2561_v46, %v1615_v50 }
 0x802   : > { %1780 = vrot.lane.b32.xlu0 %v3122_v5, %s2675_s7  ;;  %1792 = vrot.lane.b32.xlu2 %v3124_v48, %s2676_s28  ;;  %v2543_v29 = vpack.i.bf16 %v3118_v49, %v3124_v48 }
 0x80a   : > { %1782 = vrot.lane.b32.xlu2 %v3118_v49, %s2675_s7 }
 0x825   : > { %v1618_v51 = vpop.f32.mrf.mxu0 }
 0x826   : > { %v3132_v52 = vadd.f32 %v2561_v46, %v1618_v51 }
 0x828   : > { %1631 = vrot.lane.b32.xlu0 %v3132_v52, %s3442_s6  ;;  %1794 = vrot.lane.b32.xlu1 %v3132_v52, %s2676_s28 }
 0x829   : > { %1786 = vrot.lane.b32.xlu2 %v3132_v52, %s2675_s7 }
 0x830   : > { %1627 = vrot.lane.b32.xlu0 %v3118_v49, %s3442_s6  ;;  %1788 = vrot.lane.b32.xlu1 %v3122_v5, %s2676_s28  ;;  %s3444_s28 = smov 96  }
 0x831   : > { %1625 = vrot.lane.b32.xlu2 %v3122_v5, %s3442_s6 }
 0x838   : > { %1784 = vrot.lane.b32.xlu1 %v3124_v48, %s2675_s7  ;;  %s3443_s7 = smov 88  }
 0x840   : > { %1629 = vrot.lane.b32.xlu1 %v3124_v48, %s3442_s6 }
 0x85c   : > { %v1793_v57 = vpop.permute.xlu2 %1792 }
 0x864   : > { %v1783_v60 = vpop.permute.xlu2 %1782 }
 0x86c   : > { %v1791_v53 = vpop.permute.xlu0 %1790 }
 0x874   : > { %v1781_v54 = vpop.permute.xlu0 %1780 }
 0x883   : > { %v1787_v62 = vpop.permute.xlu2 %1786 }
 0x88b   : > { %v1626_v0 = vpop.permute.xlu2 %1625 }
 0x89a   : > { %v1632_v55 = vpop.permute.xlu0 %1631  ;;  %v1795_v56 = vpop.permute.xlu1 %1794 }
 0x89b   : > { %2476 = vmatpush.xpose.msk.msra.mxu2 %vm867_vm1, %v1632_v55  ;;  %2489 = vmatpush.xpose.msk.msra.mxu3 %vm867_vm1, %v1795_v56 }
 0x89f   : > { %2490 = vmatpush.xpose.msk.msra.mxu3 %vm867_vm1, %v1793_v57 }
 0x8a2   : > { %v1789_v58 = vpop.permute.xlu1 %1788  ;;  %v1628_v1 = vpop.permute.xlu0 %1627 }
 0x8a3   : > { %2491 = vmatpush.xpose.msk.msra.mxu3 %vm867_vm1, %v1791_v53 }
 0x8a7   : > { %2492 = vmatpush.xpose.msk.msra.mxu3 %vm867_vm1, %v1789_v58 }
 0x8aa   : > { %v1785_v61 = vpop.permute.xlu1 %1784  ;;  %2493 = vmatmul.msk.f32.vlgmr.msra.gmra.mxu3 %vm867_vm1, %v1781_v54 }
 0x8b2   : > { %v1630_v63 = vpop.permute.xlu1 %1629  ;;  %2494 = vmatmul.msk.f32.gmra.mxu3 %vm867_vm1, %v1783_v60 }
 0x8b3   : > { %2477 = vmatpush.xpose.msk.msra.mxu2 %vm867_vm1, %v1630_v63 }
 0x8b7   : > { %2478 = vmatpush.xpose.msk.msra.mxu2 %vm867_vm1, %v1628_v1 }
 0x8ba   : > { %2495 = vmatmul.msk.f32.gmra.mxu3 %vm867_vm1, %v1785_v61 }
 0x8bb   : > { %2479 = vmatpush.xpose.msk.msra.mxu2 %vm867_vm1, %v1626_v0 }
 0x8be   : > { %2480 = vmatmul.msk.f32.vlgmr.msra.gmra.mxu2 %vm867_vm1, %v3122_v5 }
 0x8c2   : > { %2496 = vmatmul.msk.f32.gmra.mxu3 %vm867_vm1, %v1787_v62 }
 0x8c6   : > { %2481 = vmatmul.msk.f32.gmra.mxu2 %vm867_vm1, %v3118_v49 }
 0x8ce   : > { %2482 = vmatmul.msk.f32.gmra.mxu2 %vm867_vm1, %v3124_v48 }
 0x8d6   : > { %2483 = vmatmul.msk.f32.gmra.mxu2 %vm867_vm1, %v3132_v52 }
 0x92d   : > { %v1829_v6 = vpop.f32.mrf.mxu3 }
 0x92e   : > { %v1841_v7 = vmul.f32 0.35355338, %v1829_v6 }
 0x930   : > { %v1845_v9 = vsel %vm917_vm2, %v1841_v7, -inf }
 0x931   : > { %1846 = vmax.xlane.f32.xlu1 %v1845_v9 }
 0x935   : > { %v1832_v10 = vpop.f32.mrf.mxu3 }
 0x936   : > { %v1842_v18 = vmul.f32 0.35355338, %v1832_v10 }
 0x938   : > { %v1848_v23 = vsel %vm917_vm2, %v1842_v18, -inf }
 0x93d   : > { %v1835_v11 = vpop.f32.mrf.mxu3 }
 0x93e   : > { %v1843_v25 = vmul.f32 0.35355338, %v1835_v11 }
 0x940   : > { %v1851_v28 = vsel %vm917_vm2, %v1843_v25, -inf }
 0x941   : > { %v1666_v12 = vpop.f32.mrf.mxu2 }
 0x942   : > { %v1678_v14 = vmul.f32 0.35355338, %v1666_v12 }
 0x944   : > { %v1682_v15 = vsel %vm917_vm2, %v1678_v14, -inf }
 0x945   : > { %v1838_v16 = vpop.f32.mrf.mxu3  ;;  %1683 = vmax.xlane.f32.xlu0 %v1682_v15 }
 0x946   : > { %v1844_v17 = vmul.f32 0.35355338, %v1838_v16 }
 0x948   : > { %v1854_v19 = vsel %vm927_vm3, %v1844_v17, -inf }
 0x949   : > { %1855 = vmax.xlane.f32.xlu1 %v1854_v19  ;;  %v1669_v20 = vpop.f32.mrf.mxu2 }
 0x94a   : > { %v1679_v22 = vmul.f32 0.35355338, %v1669_v20 }
 0x94c   : > { %v1685_v24 = vsel %vm917_vm2, %v1679_v22, -inf }
 0x94d   : > { %1849 = vmax.xlane.f32.xlu0 %v1848_v23  ;;  %1686 = vmax.xlane.f32.xlu2 %v1685_v24 }
 0x951   : > { %v1672_v26 = vpop.f32.mrf.mxu2 }
 0x952   : > { %v3175_v27 = vmul.f32 0.35355338, %v1672_v26 }
 0x954   : > { %v1688_v13 = vsel %vm917_vm2, %v3175_v27, -inf }
 0x955   : > { %1852 = vmax.xlane.f32.xlu2 %v1851_v28  ;;  %1689 = vmax.xlane.f32.xlu0 %v1688_v13 }
 0x959   : > { %v1675_v31 = vpop.f32.mrf.mxu2 }
 0x95a   : > { %v3187_v32 = vmul.f32 0.35355338, %v1675_v31 }
 0x95c   : > { %v1691_v34 = vsel %vm927_vm3, %v3187_v32, -inf }
 0x962   : > { %2544 = vrot.lane.b32.xlu1 %v2543_v29, %s3443_s7 }
 0x969   : > { %1889 = vrot.lane.b32.xlu0 %v3122_v5, %s3443_s7 }
 0x96d   : > { %1895 = vrot.lane.b32.xlu2 %v3132_v52, %s3443_s7 }
 0x996   : > { %1692 = vmax.xlane.f32.xlu2 %v1691_v34 }
 0x9a4   : > { %v1847_v35 = vpop.xlane.xlu1 %1846 }
 0x9a5   : > { %v1857_v36 = vsub.f32 %v1841_v7, %v1847_v35 }
 0x9a7   : > { %v1861_v37 = vmul.f32 1.442695, %v1857_v36 }
 0x9a9   : > { %2619 = vpow2.f32 %v1861_v37 }
 0x9af   : > { %v3191_v38 = vpop.eup %2619 }
 0x9b0   : > { %v1869_v39 = vsel %vm917_vm2, %v3191_v38, 0.0 }
 0x9b1   : > { %1870 = vadd.xlane.f32.xlu1 %v1869_v39 }
 0x9b8   : > { %v1684_v40 = vpop.xlane.xlu0 %1683 }
 0x9b9   : > { %v1694_v41 = vsub.f32 %v1678_v14, %v1684_v40 }
 0x9bb   : > { %v1698_v2 = vmul.f32 1.442695, %v1694_v41 }
 0x9bc   : > { %v1856_v50 = vpop.xlane.xlu1 %1855 }
 0x9bd   : > { %2621 = vpow2.f32 %v1698_v2  ;;  %v1860_v54 = vsub.f32 %v1844_v17, %v1856_v50 }
 0x9bf   : > { %v1867_v57 = vmul.f32 1.442695, %v1860_v54 }
 0x9c0   : > { %v1850_v42 = vpop.xlane.xlu0 %1849  ;;  %v1687_v8 = vpop.xlane.xlu2 %1686 }
 0x9c1   : > { %v1858_v3 = vsub.f32 %v1842_v18, %v1850_v42  ;;  %v1695_v46 = vsub.f32 %v1679_v22, %v1687_v8 }
 0x9c3   : > { %v3195_v43 = vpop.eup %2621  ;;  %v1863_v45 = vmul.f32 1.442695, %v1858_v3  ;;  %v1700_v49 = vmul.f32 1.442695, %v1695_v46 }
 0x9c4   : > { %v1706_v47 = vsel %vm917_vm2, %v3195_v43, 0.0 }
 0x9c5   : > { %2623 = vpow2.f32 %v1863_v45  ;;  %1707 = vadd.xlane.f32.xlu2 %v1706_v47 }
 0x9c6   : > { %2625 = vpow2.f32 %v1700_v49 }
 0x9c8   : > { %v1853_v48 = vpop.xlane.xlu2 %1852  ;;  %v1690_v62 = vpop.xlane.xlu0 %1689 }
 0x9c9   : > { %v1859_v51 = vsub.f32 %v1843_v25, %v1853_v48  ;;  %v1696_v12 = vsub.f32 %v3175_v27, %v1690_v62 }
 0x9cb   : > { %v3199_v53 = vpop.eup %2623  ;;  %v1865_v55 = vmul.f32 1.442695, %v1859_v51  ;;  %v1702_v14 = vmul.f32 1.442695, %v1696_v12  ;;  %v2562_v12 = vld [vmem:[%s3396_s16] ss:$0 sm:$0xff] }
 0x9cc   : > { %v1872_v56 = vsel %vm917_vm2, %v3199_v53, 0.0  ;;  %v3203_v60 = vpop.eup %2625 }
 0x9cd   : > { %2627 = vpow2.f32 %v1865_v55  ;;  %1873 = vadd.xlane.f32.xlu0 %v1872_v56  ;;  %v1709_v0 = vsel %vm917_vm2, %v3203_v60, 0.0  ;;  %v1964_v56 = vld [vmem:[%s3395_s15 + $0x8] sm:$0xff] }
 0x9ce   : > { %2629 = vpow2.f32 %v1867_v57  ;;  %1995 = vmatpush.msrb.mxu2 %v1964_v56  ;;  %v1963_v57 = vld [vmem:[%s3395_s15] sm:$0xff] }
 0x9cf   : > { %2631 = vpow2.f32 %v1702_v14 }
 0x9d0   : > { %v1896_v58 = vpop.permute.xlu2 %1895  ;;  %1996 = vmatpush.msrb.mxu2 %v1963_v57 }
 0x9d1   : > { %2497 = vmatpush.msk.msrb.mxu0 %vm986_vm4, %v1896_v58 }
 0x9d3   : > { %v2628_v61 = vpop.eup %2627 }
 0x9d4   : > { %v2545_v63 = vpop.permute.xlu1 %2544  ;;  %v1875_v1 = vsel %vm917_vm2, %v2628_v61, 0.0  ;;  %v2630_v9 = vpop.eup %2629 }
 0x9d5   : > { %v2546_v6 = vunpack.i.l.bf16 %v2545_v63  ;;  %1876 = vadd.xlane.f32.xlu1 %v1875_v1  ;;  %1710 = vadd.xlane.f32.xlu0 %v1709_v0  ;;  %v2547_v7 = vunpack.i.h.bf16 %v2545_v63  ;;  %v1878_v11 = vsel %vm927_vm3, %v2630_v9, 0.0  ;;  %v2632_v15 = vpop.eup %2631 }
 0x9d6   : > { %v1712_v16 = vsel %vm917_vm2, %v2632_v15, 0.0 }
 0x9d7   : > { %1927 = vmatpush.msrb.mxu0 %v2546_v6 }
 0x9d9   : > { %1928 = vmatpush.msrb.mxu0 %v2547_v7 }
 0x9db   : > { %v1890_v10 = vpop.permute.xlu0 %1889 }
 0x9dc   : > { %1929 = vmatpush.msrb.mxu0 %v1890_v10 }
 0x9dd   : > { %1879 = vadd.xlane.f32.xlu0 %v1878_v11  ;;  %1732 = vrot.lane.b32.xlu2 %v3132_v52, %s3444_s28 }
 0x9ee   : > { %2549 = vrot.lane.b32.xlu1 %v2543_v29, %s3444_s28 }
 0x9f1   : > { %1726 = vrot.lane.b32.xlu0 %v3122_v5, %s3444_s28 }
 0xa06   : > { %1713 = vadd.xlane.f32.xlu2 %v1712_v16 }
 0xa09   : > { %v1693_v17 = vpop.xlane.xlu2 %1692 }
 0xa0a   : > { %v1697_v18 = vsub.f32 %v3187_v32, %v1693_v17 }
 0xa0c   : > { %v1704_v19 = vmul.f32 1.442695, %v1697_v18 }
 0xa0e   : > { %2633 = vpow2.f32 %v1704_v19 }
 0xa14   : > { %v2634_v52 = vpop.eup %2633 }
 0xa15   : > { %v1715_v20 = vsel %vm927_vm3, %v2634_v52, 0.0  ;;  %vm2332_vm3 = vcmask 214016  }
 0xa18   : > { %1716 = vadd.xlane.f32.xlu1 %v1715_v20 }
 0xa24   : > { %v1871_v22 = vpop.xlane.xlu1 %1870 }
 0xa25   : > { %2635 = vrcp.f32 %v1871_v22 }
 0xa2b   : > { %v2636_v5 = vpop.eup %2635 }
 0xa2c   : > { %v1885_v23 = vmul.f32 %v2636_v5, %v3191_v38 }
 0xa2e   : > { %2498 = vmatmul.msk.f32.vlgmr.msrb.gmra.mxu0 %vm917_vm2, %v1885_v23  ;;  %v2324_v26 = vrot.slane %v1885_v23, 7 }
 0xa38   : > { %v1708_v24 = vpop.xlane.xlu2 %1707 }
 0xa39   : > { %2637 = vrcp.f32 %v1708_v24 }
 0xa3f   : > { %v2638_v25 = vpop.eup %2637 }
 0xa40   : > { %v1722_v27 = vmul.f32 %v2638_v25, %v3195_v43  ;;  %v1874_v28 = vpop.xlane.xlu0 %1873  ;;  %v1733_v13 = vpop.permute.xlu2 %1732 }
 0xa41   : > { %2639 = vrcp.f32 %v1874_v28  ;;  %2484 = vmatpush.msk.msra.mxu1 %vm986_vm4, %v1733_v13 }
 0xa42   : > { %v2326_v29 = vsel %vm1572_vm5, %v1722_v27, %v2324_v26 }
 0xa43   : > { %v2331_v31 = vmul.f32 %v2326_v29, %v2967_v59 }
 0xa45   : > { %2333 = vst.msk [vmem:[%s802_s30] sm:$0x3] %vm2332_vm3, %v2331_v31 }
 0xa47   : > { %v2640_v32 = vpop.eup %2639 }
 0xa48   : > { %v1877_v34 = vpop.xlane.xlu1 %1876  ;;  %v1711_v35 = vpop.xlane.xlu0 %1710  ;;  %v1886_v36 = vmul.f32 %v2640_v32, %v3199_v53 }
 0xa49   : > { %2641 = vrcp.f32 %v1877_v34 }
 0xa4a   : > { %2499 = vmatmul.msk.f32.gmra.mxu0 %vm917_vm2, %v1886_v36 }
 0xa4f   : > { %v2642_v37 = vpop.eup %2641 }
 0xa50   : > { %v1880_v38 = vpop.xlane.xlu0 %1879  ;;  %v1887_v39 = vmul.f32 %v2642_v37, %v2628_v61 }
 0xa51   : > { %2643 = vrcp.f32 %v1880_v38 }
 0xa52   : > { %2500 = vmatmul.msk.f32.gmra.mxu0 %vm917_vm2, %v1887_v39  ;;  %2645 = vrcp.f32 %v1711_v35 }
 0xa57   : > { %v2644_v40 = vpop.eup %2643 }
 0xa58   : > { %v1888_v41 = vmul.f32 %v2644_v40, %v2630_v9  ;;  %v2646_v3 = vpop.eup %2645 }
 0xa59   : > { %v1723_v43 = vmul.f32 %v2646_v3, %v3203_v60  ;;  %v2119_v3 = vld [vmem:[%s3399_s19 + $0x8] sm:$0xff] }
 0xa5a   : > { %2501 = vmatmul.msk.f32.gmra.mxu0 %vm917_vm2, %v1888_v41 }
 0xa60   : > { %v2550_v59 = vpop.permute.xlu1 %2549 }
 0xa61   : > { %v2551_v2 = vunpack.i.l.bf16 %v2550_v59  ;;  %v2552_v42 = vunpack.i.h.bf16 %v2550_v59 }
 0xa63   : > { %1764 = vmatpush.msra.mxu1 %v2551_v2  ;;  %v1727_v8 = vpop.permute.xlu0 %1726 }
 0xa65   : > { %1765 = vmatpush.msra.mxu1 %v2552_v42 }
 0xa67   : > { %1766 = vmatpush.msra.mxu1 %v1727_v8 }
 0xa68   : > { %2485 = vmatmul.msk.f32.vlgmr.msra.gmra.mxu1 %vm917_vm2, %v1722_v27 }
 0xa69   : > { %2150 = vmatpush.msrb.mxu1 %v2119_v3 }
 0xa70   : > { %2486 = vmatmul.msk.f32.gmra.mxu1 %vm917_vm2, %v1723_v43  ;;  %v2118_v43 = vld [vmem:[%s3399_s19] sm:$0xff] }
 0xa71   : > { %2151 = vmatpush.msrb.mxu1 %v2118_v43 }
 0xa79   : > { %v1714_v45 = vpop.xlane.xlu2 %1713 }
 0xa7a   : > { %2647 = vrcp.f32 %v1714_v45 }
 0xa80   : > { %v2648_v46 = vpop.eup %2647 }
 0xa81   : > { %v1724_v47 = vmul.f32 %v2648_v46, %v2632_v15 }
 0xa83   : > { %2487 = vmatmul.msk.f32.gmra.mxu1 %vm917_vm2, %v1724_v47 }
 0xa8b   : > { %v1717_v49 = vpop.xlane.xlu1 %1716 }
 0xa8c   : > { %2649 = vrcp.f32 %v1717_v49 }
 0xa92   : > { %v2650_v50 = vpop.eup %2649 }
 0xa93   : > { %v1725_v48 = vmul.f32 %v2650_v50, %v2634_v52 }
 0xa95   : > { %2488 = vmatmul.msk.f32.gmra.mxu1 %vm917_vm2, %v1725_v48 }
 0xaab   : > { %v1931_v51 = vpop.f32.mrf.mxu0 }
 0xaac   : > { %1947 = vrot.lane.b32.xlu0 %v1931_v51, %s3445_s1 }
 0xac7   : > { %v1934_v53 = vpop.f32.mrf.mxu0 }
 0xac8   : > { %1949 = vrot.lane.b32.xlu0 %v1934_v53, %s3445_s1 }
 0xacf   : > { %v1937_v54 = vpop.f32.mrf.mxu0 }
 0xad0   : > { %1951 = vrot.lane.b32.xlu0 %v1937_v54, %s3445_s1 }
 0xad7   : > { %v1940_v55 = vpop.f32.mrf.mxu0 }
 0xad8   : > { %1953 = vrot.lane.b32.xlu0 %v1940_v55, %s3445_s1  ;;  %v2563_v55 = vld [vmem:[%s3397_s17] ss:$0 sm:$0xff]  ;;  %s3446_s1 = sshll.u32 %s3448_s3, 5 }
 0xad9   : > { %s3362_s7 = scalar_lea.vmem %s3405_s25, %s3446_s1 }
 0xae5   : > { %v1768_v58 = vpop.f32.mrf.mxu1 }
 0xaed   : > { %v1771_v62 = vpop.f32.mrf.mxu1 }
 0xb00   : > { %v1774_v0 = vpop.f32.mrf.mxu1 }
 0xb12   : > { %v1777_v9 = vpop.f32.mrf.mxu1 }
 0xb1e   : > { %v1948_v60 = vpop.permute.xlu0 %1947 }
 0xb1f   : > { %v1959_v61 = vsel %vm867_vm1, %v1768_v58, %v1948_v60  ;;  %v2564_v58 = vld [vmem:[%s3398_s18] ss:$0 sm:$0xff] }
 0xb20   : > { %2502 = vmatmul.msk.f32.vlgmr.msrb.gmra.mxu2 %vm813_vm0, %v1959_v61 }
 0xb3a   : > { %v1950_v63 = vpop.permute.xlu0 %1949 }
 0xb3b   : > { %v1960_v1 = vsel %vm867_vm1, %v1771_v62, %v1950_v63 }
 0xb3c   : > { %2503 = vmatmul.msk.f32.gmra.mxu2 %vm813_vm0, %v1960_v1 }
 0xb42   : > { %v1952_v6 = vpop.permute.xlu0 %1951 }
 0xb43   : > { %v1961_v7 = vsel %vm867_vm1, %v1774_v0, %v1952_v6 }
 0xb44   : > { %2504 = vmatmul.msk.f32.gmra.mxu2 %vm813_vm0, %v1961_v7 }
 0xb4a   : > { %v1954_v10 = vpop.permute.xlu0 %1953 }
 0xb4b   : > { %v1962_v11 = vsel %vm867_vm1, %v1777_v9, %v1954_v10 }
 0xb4c   : > { %2505 = vmatmul.msk.f32.gmra.mxu2 %vm813_vm0, %v1962_v11 }
 0xba3   : > { %v1998_v14 = vpop.f32.mrf.mxu2 }
 0xba4   : > { %v1999_v15 = vadd.f32 %v2562_v12, %v1998_v14 }
 0xba6   : > { %v2010_v16 = vadd.f32 %v1999_v15, %v3096_v21 }
 0xba8   : > { %v2014_v17 = vsel %vm813_vm0, %v2010_v16, 0.0 }
 0xba9   : > { %2015 = vadd.xlane.f32.xlu0 %v2014_v17 }
 0xbbf   : > { %v2001_v18 = vpop.f32.mrf.mxu2 }
 0xbc0   : > { %v2002_v19 = vadd.f32 %v2562_v12, %v2001_v18 }
 0xbc2   : > { %v2011_v52 = vadd.f32 %v2002_v19, %v3100_v30 }
 0xbc4   : > { %v2017_v20 = vsel %vm813_vm0, %v2011_v52, 0.0 }
 0xbc5   : > { %2018 = vadd.xlane.f32.xlu2 %v2017_v20 }
 0xbc7   : > { %v2004_v22 = vpop.f32.mrf.mxu2 }
 0xbc8   : > { %v2005_v5 = vadd.f32 %v2562_v12, %v2004_v22 }
 0xbca   : > { %v2012_v23 = vadd.f32 %v2005_v5, %v3105_v33 }
 0xbcc   : > { %v2020_v24 = vsel %vm813_vm0, %v2012_v23, 0.0 }
 0xbcd   : > { %2021 = vadd.xlane.f32.xlu1 %v2020_v24 }
 0xbcf   : > { %v2007_v25 = vpop.f32.mrf.mxu2 }
 0xbd0   : > { %v2008_v26 = vadd.f32 %v2562_v12, %v2007_v25 }
 0xbd2   : > { %v2013_v21 = vadd.f32 %v2008_v26, %v3111_v44 }
 0xbd4   : > { %v2023_v27 = vsel %vm1261_vm6, %v2013_v21, 0.0 }
 0xbd5   : > { %2024 = vadd.xlane.f32.xlu2 %v2023_v27 }
 0xc1c   : > { %v2016_v28 = vpop.xlane.xlu0 %2015 }
 0xc1d   : > { %v2026_v30 = vmul.f32 %v2016_v28, %v3001_v4 }
 0xc1f   : > { %v2030_v13 = vsub.f32 %v2010_v16, %v2026_v30 }
 0xc21   : > { %v2034_v29 = vmul.f32 %v2030_v13, %v2030_v13 }
 0xc23   : > { %v2038_v31 = vsel %vm813_vm0, %v2034_v29, 0.0 }
 0xc24   : > { %2039 = vadd.xlane.f32.xlu1 %v2038_v31 }
 0xc38   : > { %v2019_v32 = vpop.xlane.xlu2 %2018 }
 0xc39   : > { %v2027_v33 = vmul.f32 %v2019_v32, %v3001_v4 }
 0xc3b   : > { %v3270_v34 = vsub.f32 %v2011_v52, %v2027_v33 }
 0xc3d   : > { %v2035_v35 = vmul.f32 %v3270_v34, %v3270_v34 }
 0xc3f   : > { %v2041_v44 = vsel %vm813_vm0, %v2035_v35, 0.0 }
 0xc40   : > { %v2022_v36 = vpop.xlane.xlu1 %2021  ;;  %2042 = vadd.xlane.f32.xlu2 %v2041_v44 }
 0xc41   : > { %v2028_v37 = vmul.f32 %v2022_v36, %v3001_v4 }
 0xc43   : > { %v3276_v38 = vsub.f32 %v2012_v23, %v2028_v37 }
 0xc45   : > { %v2036_v39 = vmul.f32 %v3276_v38, %v3276_v38 }
 0xc47   : > { %v2044_v40 = vsel %vm813_vm0, %v2036_v39, 0.0 }
 0xc48   : > { %2045 = vadd.xlane.f32.xlu1 %v2044_v40  ;;  %v2025_v41 = vpop.xlane.xlu2 %2024  ;;  %v2169_v40 = vld [vmem:[%s3401_s21] sm:$0xff] }
 0xc49   : > { %v2029_v59 = vmul.f32 %v2025_v41, %v3001_v4  ;;  %v2565_v41 = vld [vmem:[%s3400_s20] ss:$0 sm:$0xff] }
 0xc4b   : > { %v3282_v2 = vsub.f32 %v2013_v21, %v2029_v59 }
 0xc4d   : > { %v2037_v42 = vmul.f32 %v3282_v2, %v3282_v2 }
 0xc4f   : > { %v2047_v8 = vsel %vm1261_vm6, %v2037_v42, 0.0 }
 0xc50   : > { %2048 = vadd.xlane.f32.xlu2 %v2047_v8 }
 0xc97   : > { %v2040_v45 = vpop.xlane.xlu1 %2039 }
 0xc98   : > { %v2050_v46 = vmul.f32 %v2040_v45, %v3001_v4 }
 0xc9a   : > { %v2054_v47 = vadd.f32 1e-12, %v2050_v46 }
 0xc9c   : > { %2651 = vrsqrt.f32 %v2054_v47  ;;  %vm2064_vm2 = vweird.f32 %v2054_v47 }
 0xca2   : > { %v2652_v49 = vpop.eup %2651 }
 0xca3   : > { %v2059_v50 = vmul.f32 %v2652_v49, %v2054_v47  ;;  %vm2065_vm1 = vweird.f32 %v2652_v49 }
 0xca4   : > { %vm2066_vm4 = vmor %vm2064_vm2, %vm2065_vm1 }
 0xca5   : > { %v2060_v48 = vmul.f32 %v2652_v49, %v2059_v50 }
 0xca7   : > { %v2061_v51 = vmul.f32 0.5, %v2060_v48 }
 0xca9   : > { %v2062_v53 = vsub.f32 1.5, %v2061_v51  ;;  %v2566_v51 = vld [vmem:[%s3402_s22] ss:$0 sm:$0xff] }
 0xcab   : > { %v2063_v54 = vmul.f32 %v2652_v49, %v2062_v53 }
 0xcad   : > { %v2067_v56 = vsel %vm2066_vm4, %v2652_v49, %v2063_v54 }
 0xcae   : > { %v2098_v57 = vmul.f32 %v2067_v56, %v2030_v13 }
 0xcb0   : > { %v2106_v60 = vmul.f32 %v2563_v55, %v2098_v57 }
 0xcb2   : > { %v3300_v61 = vadd.f32 %v2564_v58, %v2106_v60 }
 0xcb3   : > { %v2043_v62 = vpop.xlane.xlu2 %2042 }
 0xcb4   : > { %v2051_v63 = vmul.f32 %v2043_v62, %v3001_v4  ;;  %2506 = vmatmul.msk.f32.vlgmr.msrb.gmra.mxu1 %vm813_vm0, %v3300_v61 }
 0xcb6   : > { %v2055_v1 = vadd.f32 1e-12, %v2051_v63 }
 0xcb8   : > { %2653 = vrsqrt.f32 %v2055_v1  ;;  %vm2074_vm14 = vweird.f32 %v2055_v1 }
 0xcbb   : > { %v2046_v0 = vpop.xlane.xlu1 %2045 }
 0xcbc   : > { %v2052_v6 = vmul.f32 %v2046_v0, %v3001_v4 }
 0xcbe   : > { %v2654_v7 = vpop.eup %2653  ;;  %v2056_v9 = vadd.f32 1e-12, %v2052_v6 }
 0xcbf   : > { %v2069_v10 = vmul.f32 %v2654_v7, %v2055_v1  ;;  %vm2075_vm5 = vweird.f32 %v2654_v7 }
 0xcc0   : > { %2655 = vrsqrt.f32 %v2056_v9  ;;  %vm2076_vm15 = vmor %vm2074_vm14, %vm2075_vm5  ;;  %vm2084_vm8 = vweird.f32 %v2056_v9 }
 0xcc1   : > { %v2070_v11 = vmul.f32 %v2654_v7, %v2069_v10 }
 0xcc3   : > { %v2071_v12 = vmul.f32 0.5, %v2070_v11  ;;  %v2049_v14 = vpop.xlane.xlu2 %2048 }
 0xcc4   : > { %v2053_v15 = vmul.f32 %v2049_v14, %v3001_v4 }
 0xcc5   : > { %v2072_v16 = vsub.f32 1.5, %v2071_v12 }
 0xcc6   : > { %v2656_v17 = vpop.eup %2655  ;;  %v2057_v18 = vadd.f32 1e-12, %v2053_v15 }
 0xcc7   : > { %v2073_v19 = vmul.f32 %v2654_v7, %v2072_v16  ;;  %v2079_v52 = vmul.f32 %v2656_v17, %v2056_v9  ;;  %vm2085_vm7 = vweird.f32 %v2656_v17 }
 0xcc8   : > { %2657 = vrsqrt.f32 %v2057_v18  ;;  %vm2086_vm9 = vmor %vm2084_vm8, %vm2085_vm7  ;;  %vm2094_vm11 = vweird.f32 %v2057_v18 }
 0xcc9   : > { %v2077_v20 = vsel %vm2076_vm15, %v2654_v7, %v2073_v19  ;;  %v2080_v22 = vmul.f32 %v2656_v17, %v2079_v52 }
 0xcca   : > { %v2099_v5 = vmul.f32 %v2077_v20, %v3270_v34 }
 0xccb   : > { %v2081_v23 = vmul.f32 0.5, %v2080_v22 }
 0xccc   : > { %v2107_v24 = vmul.f32 %v2563_v55, %v2099_v5 }
 0xccd   : > { %v2082_v25 = vsub.f32 1.5, %v2081_v23 }
 0xcce   : > { %v2658_v26 = vpop.eup %2657  ;;  %v2115_v21 = vadd.f32 %v2564_v58, %v2107_v24 }
 0xccf   : > { %v2083_v27 = vmul.f32 %v2656_v17, %v2082_v25  ;;  %v2089_v28 = vmul.f32 %v2658_v26, %v2057_v18  ;;  %vm2095_vm10 = vweird.f32 %v2658_v26 }
 0xcd0   : > { %2507 = vmatmul.msk.f32.gmra.mxu1 %vm813_vm0, %v2115_v21  ;;  %vm2096_vm12 = vmor %vm2094_vm11, %vm2095_vm10 }
 0xcd1   : > { %v2087_v30 = vsel %vm2086_vm9, %v2656_v17, %v2083_v27  ;;  %v2090_v13 = vmul.f32 %v2658_v26, %v2089_v28 }
 0xcd2   : > { %v2100_v29 = vmul.f32 %v2087_v30, %v3276_v38  ;;  %v2170_v38 = vld [vmem:[%s3401_s21 + $0x8] sm:$0xff] }
 0xcd3   : > { %v2091_v31 = vmul.f32 0.5, %v2090_v13  ;;  %2201 = vmatpush.msrb.mxu3 %v2170_v38  ;;  %v2568_v38 = vld [vmem:[%s3404_s24] ss:$0 sm:$0xff] }
 0xcd4   : > { %v2108_v32 = vmul.f32 %v2563_v55, %v2100_v29 }
 0xcd5   : > { %v2092_v33 = vsub.f32 1.5, %v2091_v31  ;;  %2202 = vmatpush.msrb.mxu3 %v2169_v40 }
 0xcd6   : > { %v2116_v34 = vadd.f32 %v2564_v58, %v2108_v32 }
 0xcd7   : > { %v2093_v35 = vmul.f32 %v2658_v26, %v2092_v33 }
 0xcd8   : > { %2508 = vmatmul.msk.f32.gmra.mxu1 %vm813_vm0, %v2116_v34 }
 0xcd9   : > { %v2097_v44 = vsel %vm2096_vm12, %v2658_v26, %v2093_v35 }
 0xcda   : > { %v2101_v36 = vmul.f32 %v2097_v44, %v3282_v2 }
 0xcdc   : > { %v2109_v37 = vmul.f32 %v2563_v55, %v2101_v36 }
 0xcde   : > { %v2117_v39 = vadd.f32 %v2564_v58, %v2109_v37  ;;  %v2567_v37 = vld [vmem:[%s3403_s23] ss:$0 sm:$0xff] }
 0xce0   : > { %2509 = vmatmul.msk.f32.gmra.mxu1 %vm813_vm0, %v2117_v39 }
 0xd31   : > { %v2153_v59 = vpop.f32.mrf.mxu1 }
 0xd32   : > { %v2154_v2 = vadd.f32 %v2565_v41, %v2153_v59 }
 0xd34   : > { %v2165_v42 = vmax.f32 %v2154_v2, 0.0 }
 0xd36   : > { %2510 = vmatmul.msk.f32.vlgmr.msrb.gmra.mxu3 %vm813_vm0, %v2165_v42 }
 0xd4d   : > { %v2156_v8 = vpop.f32.mrf.mxu1 }
 0xd4e   : > { %v2157_v3 = vadd.f32 %v2565_v41, %v2156_v8 }
 0xd50   : > { %v2166_v43 = vmax.f32 %v2157_v3, 0.0 }
 0xd52   : > { %2511 = vmatmul.msk.f32.gmra.mxu3 %vm813_vm0, %v2166_v43 }
 0xd55   : > { %v2159_v45 = vpop.f32.mrf.mxu1 }
 0xd56   : > { %v2160_v46 = vadd.f32 %v2565_v41, %v2159_v45 }
 0xd58   : > { %v2167_v47 = vmax.f32 %v2160_v46, 0.0 }
 0xd5a   : > { %2512 = vmatmul.msk.f32.gmra.mxu3 %vm813_vm0, %v2167_v47 }
 0xd5d   : > { %v2162_v49 = vpop.f32.mrf.mxu1 }
 0xd5e   : > { %v2163_v50 = vadd.f32 %v2565_v41, %v2162_v49 }
 0xd60   : > { %v2168_v48 = vmax.f32 %v2163_v50, 0.0 }
 0xd62   : > { %2513 = vmatmul.msk.f32.gmra.mxu3 %vm813_vm0, %v2168_v48 }
 0xdb9   : > { %v2204_v53 = vpop.f32.mrf.mxu3 }
 0xdba   : > { %v2205_v54 = vadd.f32 %v2566_v51, %v2204_v53 }
 0xdbc   : > { %v2216_v55 = vadd.f32 %v2205_v54, %v3300_v61 }
 0xdbe   : > { %v2220_v56 = vsel %vm813_vm0, %v2216_v55, 0.0 }
 0xdbf   : > { %2221 = vadd.xlane.f32.xlu1 %v2220_v56 }
 0xdd5   : > { %v2207_v57 = vpop.f32.mrf.mxu3 }
 0xdd6   : > { %v2208_v58 = vadd.f32 %v2566_v51, %v2207_v57 }
 0xdd8   : > { %v2217_v60 = vadd.f32 %v2208_v58, %v2115_v21 }
 0xdda   : > { %v2223_v62 = vsel %vm813_vm0, %v2217_v60, 0.0 }
 0xddb   : > { %2224 = vadd.xlane.f32.xlu2 %v2223_v62 }
 0xddd   : > { %v2210_v63 = vpop.f32.mrf.mxu3 }
 0xdde   : > { %v2211_v1 = vadd.f32 %v2566_v51, %v2210_v63 }
 0xde0   : > { %v2218_v0 = vadd.f32 %v2211_v1, %v2116_v34 }
 0xde2   : > { %v2226_v6 = vsel %vm813_vm0, %v2218_v0, 0.0 }
 0xde3   : > { %2227 = vadd.xlane.f32.xlu1 %v2226_v6 }
 0xde5   : > { %v2213_v7 = vpop.f32.mrf.mxu3 }
 0xde6   : > { %v2214_v9 = vadd.f32 %v2566_v51, %v2213_v7 }
 0xde8   : > { %v2219_v10 = vadd.f32 %v2214_v9, %v2117_v39 }
 0xdea   : > { %v2229_v61 = vsel %vm1261_vm6, %v2219_v10, 0.0 }
 0xdeb   : > { %2230 = vadd.xlane.f32.xlu2 %v2229_v61 }
 0xe32   : > { %v2222_v11 = vpop.xlane.xlu1 %2221 }
 0xe33   : > { %v2232_v12 = vmul.f32 %v2222_v11, %v3001_v4 }
 0xe35   : > { %v2236_v14 = vsub.f32 %v2216_v55, %v2232_v12 }
 0xe37   : > { %v2240_v15 = vmul.f32 %v2236_v14, %v2236_v14 }
 0xe39   : > { %v2244_v16 = vsel %vm813_vm0, %v2240_v15, 0.0 }
 0xe3a   : > { %2245 = vadd.xlane.f32.xlu0 %v2244_v16 }
 0xe4e   : > { %v2225_v17 = vpop.xlane.xlu2 %2224 }
 0xe4f   : > { %v2233_v18 = vmul.f32 %v2225_v17, %v3001_v4 }
 0xe51   : > { %v2237_v19 = vsub.f32 %v2217_v60, %v2233_v18 }
 0xe53   : > { %v2241_v52 = vmul.f32 %v2237_v19, %v2237_v19 }
 0xe55   : > { %v2247_v20 = vsel %vm813_vm0, %v2241_v52, 0.0 }
 0xe56   : > { %v2228_v22 = vpop.xlane.xlu1 %2227  ;;  %2248 = vadd.xlane.f32.xlu1 %v2247_v20 }
 0xe57   : > { %v2234_v5 = vmul.f32 %v2228_v22, %v3001_v4 }
 0xe59   : > { %v3339_v23 = vsub.f32 %v2218_v0, %v2234_v5 }
 0xe5b   : > { %v2242_v24 = vmul.f32 %v3339_v23, %v3339_v23 }
 0xe5d   : > { %v2250_v25 = vsel %vm813_vm0, %v2242_v24, 0.0 }
 0xe5e   : > { %2251 = vadd.xlane.f32.xlu2 %v2250_v25  ;;  %v2231_v26 = vpop.xlane.xlu2 %2230 }
 0xe5f   : > { %v2235_v21 = vmul.f32 %v2231_v26, %v3001_v4 }
 0xe61   : > { %v3345_v27 = vsub.f32 %v2219_v10, %v2235_v21 }
 0xe63   : > { %v2243_v28 = vmul.f32 %v3345_v27, %v3345_v27 }
 0xe65   : > { %v2253_v30 = vsel %vm1261_vm6, %v2243_v28, 0.0 }
 0xe66   : > { %2254 = vadd.xlane.f32.xlu0 %v2253_v30 }
 0xead   : > { %v2246_v13 = vpop.xlane.xlu0 %2245 }
 0xeae   : > { %v2256_v29 = vmul.f32 %v2246_v13, %v3001_v4 }
 0xeb0   : > { %v2260_v31 = vadd.f32 1e-12, %v2256_v29 }
 0xeb2   : > { %2659 = vrsqrt.f32 %v2260_v31  ;;  %vm2270_vm3 = vweird.f32 %v2260_v31 }
 0xeb8   : > { %v2660_v32 = vpop.eup %2659 }
 0xeb9   : > { %v2265_v33 = vmul.f32 %v2660_v32, %v2260_v31  ;;  %vm2271_vm13 = vweird.f32 %v2660_v32 }
 0xeba   : > { %vm2272_vm1 = vmor %vm2270_vm3, %vm2271_vm13 }
 0xebb   : > { %v2266_v34 = vmul.f32 %v2660_v32, %v2265_v33 }
 0xebd   : > { %v2267_v35 = vmul.f32 0.5, %v2266_v34 }
 0xebf   : > { %v2268_v44 = vsub.f32 1.5, %v2267_v35 }
 0xec1   : > { %v2269_v36 = vmul.f32 %v2660_v32, %v2268_v44 }
 0xec3   : > { %v2273_v39 = vsel %vm2272_vm1, %v2660_v32, %v2269_v36 }
 0xec4   : > { %v2304_v40 = vmul.f32 %v2273_v39, %v2236_v14 }
 0xec6   : > { %v2312_v41 = vmul.f32 %v2567_v37, %v2304_v40 }
 0xec8   : > { %v2320_v59 = vadd.f32 %v2568_v38, %v2312_v41 }
 0xec9   : > { %v2249_v2 = vpop.xlane.xlu1 %2248 }
 0xeca   : > { %2327 = vst.msk [vmem:[%s3362_s7] sm:$0xff] %vm813_vm0, %v2320_v59  ;;  %v2257_v42 = vmul.f32 %v2249_v2, %v3001_v4 }
 0xecc   : > { %v2261_v8 = vadd.f32 1e-12, %v2257_v42 }
 0xece   : > { %2661 = vrsqrt.f32 %v2261_v8  ;;  %vm2280_vm4 = vweird.f32 %v2261_v8 }
 0xed1   : > { %v2252_v3 = vpop.xlane.xlu2 %2251 }
 0xed2   : > { %v2258_v43 = vmul.f32 %v2252_v3, %v3001_v4 }
 0xed4   : > { %v2662_v45 = vpop.eup %2661  ;;  %v2262_v46 = vadd.f32 1e-12, %v2258_v43 }
 0xed5   : > { %v2275_v47 = vmul.f32 %v2662_v45, %v2261_v8  ;;  %vm2281_vm2 = vweird.f32 %v2662_v45 }
 0xed6   : > { %2663 = vrsqrt.f32 %v2262_v46  ;;  %vm2282_vm5 = vmor %vm2280_vm4, %vm2281_vm2  ;;  %vm2290_vm15 = vweird.f32 %v2262_v46 }
 0xed7   : > { %v2276_v49 = vmul.f32 %v2662_v45, %v2275_v47 }
 0xed9   : > { %v2277_v50 = vmul.f32 0.5, %v2276_v49  ;;  %v2255_v48 = vpop.xlane.xlu0 %2254 }
 0xeda   : > { %v2259_v51 = vmul.f32 %v2255_v48, %v3001_v4 }
 0xedb   : > { %v2278_v53 = vsub.f32 1.5, %v2277_v50 }
 0xedc   : > { %v2664_v54 = vpop.eup %2663  ;;  %v2263_v55 = vadd.f32 1e-12, %v2259_v51 }
 0xedd   : > { %v2279_v56 = vmul.f32 %v2662_v45, %v2278_v53  ;;  %v2285_v57 = vmul.f32 %v2664_v54, %v2262_v46  ;;  %vm2291_vm14 = vweird.f32 %v2664_v54 }
 0xede   : > { %2665 = vrsqrt.f32 %v2263_v55  ;;  %vm2292_vm7 = vmor %vm2290_vm15, %vm2291_vm14  ;;  %vm2300_vm9 = vweird.f32 %v2263_v55 }
 0xedf   : > { %v2283_v58 = vsel %vm2282_vm5, %v2662_v45, %v2279_v56  ;;  %v2286_v60 = vmul.f32 %v2664_v54, %v2285_v57 }
 0xee0   : > { %v2305_v62 = vmul.f32 %v2283_v58, %v2237_v19 }
 0xee1   : > { %v2287_v63 = vmul.f32 0.5, %v2286_v60 }
 0xee2   : > { %v2313_v1 = vmul.f32 %v2567_v37, %v2305_v62 }
 0xee3   : > { %v2288_v0 = vsub.f32 1.5, %v2287_v63 }
 0xee4   : > { %v2666_v6 = vpop.eup %2665  ;;  %v2321_v7 = vadd.f32 %v2568_v38, %v2313_v1 }
 0xee5   : > { %v2289_v4 = vmul.f32 %v2664_v54, %v2288_v0  ;;  %v2295_v9 = vmul.f32 %v2666_v6, %v2263_v55  ;;  %vm2301_vm8 = vweird.f32 %v2666_v6 }
 0xee6   : > { %2328 = vst.msk [vmem:[%s3362_s7 + $0x8] sm:$0xff] %vm813_vm0, %v2321_v7  ;;  %vm2302_vm10 = vmor %vm2300_vm9, %vm2301_vm8 }
 0xee7   : > { %v2293_v10 = vsel %vm2292_vm7, %v2664_v54, %v2289_v4  ;;  %v2296_v61 = vmul.f32 %v2666_v6, %v2295_v9 }
 0xee8   : > { %v2306_v11 = vmul.f32 %v2293_v10, %v3339_v23 }
 0xee9   : > { %v2297_v12 = vmul.f32 0.5, %v2296_v61 }
 0xeea   : > { %v2314_v14 = vmul.f32 %v2567_v37, %v2306_v11 }
 0xeeb   : > { %v2298_v15 = vsub.f32 1.5, %v2297_v12 }
 0xeec   : > { %v2322_v16 = vadd.f32 %v2568_v38, %v2314_v14 }
 0xeed   : > { %v2299_v17 = vmul.f32 %v2666_v6, %v2298_v15 }
 0xeee   : > { %2329 = vst.msk [vmem:[%s3362_s7 + $0x10] sm:$0xff] %vm813_vm0, %v2322_v16 }
 0xeef   : > { %v2303_v18 = vsel %vm2302_vm10, %v2666_v6, %v2299_v17 }
 0xef0   : > { %v2307_v19 = vmul.f32 %v2303_v18, %v3345_v27 }
 0xef2   : > { %v2315_v52 = vmul.f32 %v2567_v37, %v2307_v19 }
 0xef4   : > { %v2323_v20 = vadd.f32 %v2568_v38, %v2315_v52 }
 0xef6   : > { %2330 = vst.msk [vmem:[%s3362_s7 + $0x18] sm:$0x7] %vm1261_vm6, %v2323_v20 }
 0xef7 PF: > { %s37_s27 = sadd.s32 1, %s2673_s27  }
 0xef8   : > { %p34_p4 = scmp.ge.s32.totalorder %s37_s27, 4  }
 0xefa   :  { %36 = sbr.rel (!%p34_p4) target bundleno = 12 (0xc), region = 162 }

// kernel: model_select_forward.7
= control target key start
LH: loop header
LB: loop body
LE: loop exit
PB: predicated region body
PF: predicated region fallthrough
CT: control target
= control target key end

     0   :  { %s968_s25 = smov 0   ;;  %s1062_s0 = inlined_call_operand.vmem [shape: f32[2,5,16], index: 0, kind: input, shape index: {}]   ;;  %s1063_s1 = inlined_call_operand.vmem [shape: f32[16,48], index: 1, kind: input, shape index: {}]   ;;  %s1064_s2 = inlined_call_operand.vmem [shape: f32[1,48], index: 2, kind: input, shape index: {}]   ;;  %s1065_s3 = inlined_call_operand.vmem [shape: f32[16,16], index: 3, kind: input, shape index: {}]   ;;  %s1066_s4 = inlined_call_operand.vmem [shape: f32[1,16], index: 4, kind: input, shape index: {}]   ;;  %s1067_s5 = inlined_call_operand.vmem [shape: f32[1,16], index: 5, kind: input, shape index: {}]   ;;  %s1068_s6 = inlined_call_operand.vmem [shape: f32[1,16], index: 6, kind: input, shape index: {}]   ;;  %s1069_s7 = inlined_call_operand.vmem [shape: f32[16,16], index: 7, kind: input, shape index: {}]   ;;  %s1070_s8 = inlined_call_operand.vmem [shape: f32[1,16], index: 8, kind: input, shape index: {}]   ;;  %s1071_s9 = inlined_call_operand.vmem [shape: f32[16,16], index: 9, kind: input, shape index: {}]   ;;  %s1072_s10 = inlined_call_operand.vmem [shape: f32[1,16], index: 10, kind: input, shape index: {}]   ;;  %s1073_s11 = inlined_call_operand.vmem [shape: f32[1,16], index: 11, kind: input, shape index: {}]   ;;  %s1074_s12 = inlined_call_operand.vmem [shape: f32[1,16], index: 12, kind: input, shape index: {}]   ;;  %s1075_s13 = inlined_call_operand.vmem [shape: f32[2,5,16], index: 13, kind: output, shape index: {}]  }
   0x1 LB: > { %s825_s26 = sadd.s32 4294967295, %s889_s25   ;;  %p829_p0 = scmp.ge.s32.totalorder %s889_s25, 1  ;;  %s889_s25 = sphi %s968_s25, %s23_s25  }
   0x2   : > { %p386_p1 = scmp.lt.s32.totalorder %s889_s25, 3 }
   0x4   : > { %p387_p2 = pnand %p829_p0, %p386_p1 }
   0x5   : > { %p428_p3 = scmp.lt.s32.totalorder (!%p387_p2), %s825_s26, 1  ;;  %s891_s20 = smov (!%p387_p2), 120  }
   0x6   : > { %390 = sbr.rel (%p387_p2) target bundleno = 1814 (0x716), region = 72  ;;  %s892_s21 = smov (!%p387_p2), 112  }
   0x7   : > { %s893_s22 = smov (!%p387_p2), 104   ;;  %s894_s23 = smov (!%p387_p2), 96  }
   0x8   : > { %s895_s24 = smov (!%p387_p2), 88   ;;  %s896_s15 = smov (!%p387_p2), 8  }
   0xb   : > { %v438_v0 = vld [vmem:[%s1063_s1 + $0x8] sm:$0xff]  ;;  %v437_v1 = vld [vmem:[%s1063_s1] sm:$0xff]  ;;  %s1077_s26 = smov (!%p428_p3, %s825_s26), 1  ;;  %vm443_vm0 = vcmask 130048   ;;  %vm470_vm1 = vcmask 64512   ;;  %vm496_vm2 = vcmask 36864  }
   0xc   : > { %461 = vmatpush.msra.mxu0 %v438_v0  ;;  %s830_s14 = sshll.u32 %s1077_s26, 3  ;;  %v861_v3 = vld [vmem:[%s1064_s2] ss:$0 sm:$0xff]  ;;  %vm514_vm3 = vcmask 1044480   ;;  %vm510_vm4 = vcmask 39936   ;;  %v610_v33 = vld [vmem:[%s1065_s3 + $0x8] sm:$0xff] }
   0xd   : > { %s431_s17 = scalar_lea.vmem %s1062_s0, %s830_s14  ;;  %v609_v34 = vld [vmem:[%s1065_s3] sm:$0xff]  ;;  %vm639_vm5 = vcmask 126976   ;;  %v897_v44 = vmov 16.0   ;;  %v680_v56 = vld [vmem:[%s1069_s7 + $0x8] sm:$0xff]  ;;  %s435_s28 = scalar_lea.vmem %s1075_s13, %s830_s14 }
   0xe   : > { %462 = vmatpush.msra.mxu0 %v437_v1  ;;  %v990_v2 = vld [vmem:[%s431_s17] sm:$0x1f]  ;;  %v710_v58 = vld [vmem:[%s1071_s9 + $0x8] sm:$0xff] }
   0xf   : > { %832 = vmatmul.msk.f32.vlgmr.msra.gmra.mxu0 %vm443_vm0, %v990_v2  ;;  %v862_v39 = vld [vmem:[%s1066_s4] ss:$0 sm:$0xff] }
  0x10   : > { %632 = vmatpush.msrb.mxu0 %v610_v33  ;;  %v679_v57 = vld [vmem:[%s1069_s7] sm:$0xff] }
  0x12   : > { %633 = vmatpush.msrb.mxu0 %v609_v34  ;;  %v867_v34 = vld [vmem:[%s1073_s11] ss:$0 sm:$0xff] }
  0x8c   : > { %v464_v4 = vpop.f32.mrf.mxu0 }
  0x8d   : > { %v465_v5 = vadd.f32 %v861_v3, %v464_v4  ;;  %v863_v4 = vld [vmem:[%s1067_s5] ss:$0 sm:$0xff] }
  0x8f   : > { %537 = vrot.lane.b32.xlu1 %v465_v5, %s891_s20  ;;  %468 = vrot.lane.b32.xlu0 %v465_v5, %s892_s21 }
  0x97   : > { %539 = vrot.lane.b32.xlu0 %v465_v5, %s893_s22 }
 0x101   : > { %v469_v6 = vpop.permute.xlu0 %468  ;;  %v538_v8 = vpop.permute.xlu1 %537 }
 0x102   : > { %833 = vmatpush.xpose.msk.msra.mxu1 %vm470_vm1, %v469_v6 }
 0x105   : > { %834 = vmatmul.msk.f32.vlgmr.msra.gmra.mxu1 %vm470_vm1, %v465_v5 }
 0x106   : > { %702 = vmatpush.msrb.mxu1 %v680_v56 }
 0x108   : > { %703 = vmatpush.msrb.mxu1 %v679_v57 }
 0x109   : > { %v540_v7 = vpop.permute.xlu0 %539 }
 0x10a   : > { %837 = vmatpush.xpose.msk.msra.mxu3 %vm470_vm1, %v540_v7  ;;  %v864_v7 = vld [vmem:[%s1068_s6] ss:$0 sm:$0xff] }
 0x10d   : > { %838 = vmatmul.msk.f32.vlgmr.msra.gmra.mxu3 %vm470_vm1, %v538_v8 }
 0x10e   : > { %732 = vmatpush.msrb.mxu3 %v710_v58 }
 0x182   : > { %v492_v9 = vpop.f32.mrf.mxu1 }
 0x183   : > { %v495_v10 = vmul.f32 0.35355338, %v492_v9 }
 0x185   : > { %v497_v11 = vsel %vm496_vm2, %v495_v10, -inf }
 0x186   : > { %498 = vmax.xlane.f32.xlu1 %v497_v11  ;;  %v865_v11 = vld [vmem:[%s1070_s8] ss:$0 sm:$0xff] }
 0x190   : > { %v562_v12 = vpop.f32.mrf.mxu3 }
 0x191   : > { %v565_v13 = vmul.f32 0.35355338, %v562_v12 }
 0x193   : > { %v566_v14 = vsel %vm496_vm2, %v565_v13, -inf }
 0x194   : > { %567 = vmax.xlane.f32.xlu2 %v566_v14 }
 0x1f9   : > { %v499_v15 = vpop.xlane.xlu1 %498 }
 0x1fa   : > { %v500_v16 = vsub.f32 %v495_v10, %v499_v15  ;;  %v709_v10 = vld [vmem:[%s1071_s9] sm:$0xff] }
 0x1fb   : > { %733 = vmatpush.msrb.mxu3 %v709_v10  ;;  %v866_v15 = vld [vmem:[%s1072_s10] ss:$0 sm:$0xff] }
 0x1fc   : > { %v501_v17 = vmul.f32 1.442695, %v500_v16 }
 0x1fe   : > { %869 = vpow2.f32 %v501_v17 }
 0x204   : > { %v870_v18 = vpop.eup %869 }
 0x205   : > { %v503_v19 = vsel %vm496_vm2, %v870_v18, 0.0 }
 0x206   : > { %504 = vadd.xlane.f32.xlu2 %v503_v19 }
 0x207   : > { %v568_v20 = vpop.xlane.xlu2 %567 }
 0x208   : > { %v569_v21 = vsub.f32 %v565_v13, %v568_v20 }
 0x20a   : > { %v570_v22 = vmul.f32 1.442695, %v569_v21 }
 0x20c   : > { %871 = vpow2.f32 %v570_v22 }
 0x212   : > { %v872_v23 = vpop.eup %871 }
 0x213   : > { %v572_v24 = vsel %vm496_vm2, %v872_v23, 0.0 }
 0x214   : > { %573 = vadd.xlane.f32.xlu0 %v572_v24 }
 0x21e   : > { %508 = vrot.lane.b32.xlu2 %v465_v5, %s894_s23 }
 0x226   : > { %577 = vrot.lane.b32.xlu2 %v465_v5, %s895_s24 }
 0x279   : > { %v505_v25 = vpop.xlane.xlu2 %504 }
 0x27a   : > { %873 = vrcp.f32 %v505_v25 }
 0x280   : > { %v874_v26 = vpop.eup %873 }
 0x281   : > { %v509_v27 = vpop.permute.xlu2 %508  ;;  %v507_v28 = vmul.f32 %v874_v26, %v870_v18 }
 0x282   : > { %835 = vmatpush.msk.msra.mxu2 %vm514_vm3, %v509_v27 }
 0x283   : > { %836 = vmatmul.msk.f32.vlgmr.msra.gmra.mxu2 %vm510_vm4, %v507_v28 }
 0x287   : > { %v574_v29 = vpop.xlane.xlu0 %573 }
 0x288   : > { %875 = vrcp.f32 %v574_v29 }
 0x289   : > { %v578_v30 = vpop.permute.xlu2 %577  ;;  %877 = vrcp.f32 %v897_v44 }
 0x28a   : > { %839 = vmatpush.msk.msrb.mxu2 %vm514_vm3, %v578_v30 }
 0x28e   : > { %v876_v31 = vpop.eup %875 }
 0x28f   : > { %v576_v32 = vmul.f32 %v876_v31, %v872_v23  ;;  %v878_v45 = vpop.eup %877 }
 0x290   : > { %v644_v46 = vmul.f32 16.0, %v878_v45  ;;  %vm648_vm6 = vweird.f32 %v878_v45 }
 0x291   : > { %840 = vmatmul.msk.f32.vlgmr.msrb.gmra.mxu2 %vm510_vm4, %v576_v32 }
 0x292   : > { %v645_v47 = vsub.f32 1.0, %v644_v46 }
 0x294   : > { %v646_v48 = vmul.f32 %v878_v45, %v645_v47 }
 0x296   : > { %v647_v49 = vadd.f32 %v878_v45, %v646_v48 }
 0x298   : > { %v649_v50 = vsel %vm648_vm6, %v878_v45, %v647_v49 }
 0x306   : > { %v534_v35 = vpop.f32.mrf.mxu2 }
 0x314   : > { %v601_v36 = vpop.f32.mrf.mxu2 }
 0x315   : > { %605 = vrot.lane.b32.xlu2 %v601_v36, %s896_s15  ;;  %v868_v36 = vld [vmem:[%s1074_s12] ss:$0 sm:$0xff] }
 0x36f   : > { %v606_v37 = vpop.permute.xlu2 %605 }
 0x370   : > { %v608_v38 = vsel %vm470_vm1, %v534_v35, %v606_v37 }
 0x371   : > { %841 = vmatmul.msk.f32.vlgmr.msrb.gmra.mxu0 %vm443_vm0, %v608_v38 }
 0x3ee   : > { %v635_v40 = vpop.f32.mrf.mxu0 }
 0x3ef   : > { %v636_v41 = vadd.f32 %v862_v39, %v635_v40 }
 0x3f1   : > { %v638_v42 = vadd.f32 %v636_v41, %v990_v2 }
 0x3f3   : > { %v640_v43 = vsel %vm639_vm5, %v638_v42, 0.0 }
 0x3f4   : > { %641 = vadd.xlane.f32.xlu1 %v640_v43 }
 0x467   : > { %v642_v51 = vpop.xlane.xlu1 %641 }
 0x468   : > { %v650_v52 = vmul.f32 %v649_v50, %v642_v51 }
 0x46a   : > { %v651_v53 = vsub.f32 %v638_v42, %v650_v52 }
 0x46c   : > { %v652_v54 = vmul.f32 %v651_v53, %v651_v53 }
 0x46e   : > { %v653_v55 = vsel %vm639_vm5, %v652_v54, 0.0 }
 0x46f   : > { %654 = vadd.xlane.f32.xlu2 %v653_v55 }
 0x4e2   : > { %v655_v59 = vpop.xlane.xlu2 %654 }
 0x4e3   : > { %v656_v60 = vmul.f32 %v655_v59, %v649_v50 }
 0x4e5   : > { %v657_v61 = vadd.f32 1e-12, %v656_v60 }
 0x4e7   : > { %879 = vrsqrt.f32 %v657_v61  ;;  %vm664_vm8 = vweird.f32 %v657_v61 }
 0x4ed   : > { %v880_v62 = vpop.eup %879 }
 0x4ee   : > { %v659_v63 = vmul.f32 %v880_v62, %v657_v61  ;;  %vm665_vm7 = vweird.f32 %v880_v62 }
 0x4ef   : > { %vm666_vm9 = vmor %vm664_vm8, %vm665_vm7 }
 0x4f0   : > { %v660_v0 = vmul.f32 %v880_v62, %v659_v63 }
 0x4f2   : > { %v661_v1 = vmul.f32 0.5, %v660_v0 }
 0x4f4   : > { %v662_v2 = vsub.f32 1.5, %v661_v1 }
 0x4f6   : > { %v663_v3 = vmul.f32 %v880_v62, %v662_v2 }
 0x4f8   : > { %v667_v5 = vsel %vm666_vm9, %v880_v62, %v663_v3 }
 0x4f9   : > { %v668_v6 = vmul.f32 %v667_v5, %v651_v53 }
 0x4fb   : > { %v673_v8 = vmul.f32 %v863_v4, %v668_v6 }
 0x4fd   : > { %v678_v9 = vadd.f32 %v864_v7, %v673_v8 }
 0x4ff   : > { %842 = vmatmul.msk.f32.vlgmr.msrb.gmra.mxu1 %vm443_vm0, %v678_v9 }
 0x57c   : > { %v705_v12 = vpop.f32.mrf.mxu1 }
 0x57d   : > { %v706_v13 = vadd.f32 %v865_v11, %v705_v12 }
 0x57f   : > { %v708_v14 = vmax.f32 %v706_v13, 0.0 }
 0x581   : > { %843 = vmatmul.msk.f32.vlgmr.msrb.gmra.mxu3 %vm443_vm0, %v708_v14 }
 0x604   : > { %v735_v16 = vpop.f32.mrf.mxu3 }
 0x605   : > { %v736_v17 = vadd.f32 %v866_v15, %v735_v16 }
 0x607   : > { %v738_v18 = vadd.f32 %v736_v17, %v678_v9 }
 0x609   : > { %v739_v19 = vsel %vm639_vm5, %v738_v18, 0.0 }
 0x60a   : > { %740 = vadd.xlane.f32.xlu0 %v739_v19 }
 0x67d   : > { %v741_v20 = vpop.xlane.xlu0 %740 }
 0x67e   : > { %v742_v21 = vmul.f32 %v741_v20, %v649_v50 }
 0x680   : > { %v743_v22 = vsub.f32 %v738_v18, %v742_v21 }
 0x682   : > { %v744_v23 = vmul.f32 %v743_v22, %v743_v22 }
 0x684   : > { %v745_v24 = vsel %vm639_vm5, %v744_v23, 0.0 }
 0x685   : > { %746 = vadd.xlane.f32.xlu1 %v745_v24 }
 0x6f8   : > { %v747_v25 = vpop.xlane.xlu1 %746 }
 0x6f9   : > { %v748_v26 = vmul.f32 %v747_v25, %v649_v50 }
 0x6fb   : > { %v749_v27 = vadd.f32 1e-12, %v748_v26 }
 0x6fd   : > { %881 = vrsqrt.f32 %v749_v27  ;;  %vm756_vm11 = vweird.f32 %v749_v27 }
 0x703   : > { %v882_v28 = vpop.eup %881 }
 0x704   : > { %v751_v29 = vmul.f32 %v882_v28, %v749_v27  ;;  %vm757_vm10 = vweird.f32 %v882_v28 }
 0x705   : > { %vm758_vm12 = vmor %vm756_vm11, %vm757_vm10 }
 0x706   : > { %v752_v30 = vmul.f32 %v882_v28, %v751_v29 }
 0x708   : > { %v753_v31 = vmul.f32 0.5, %v752_v30 }
 0x70a   : > { %v754_v32 = vsub.f32 1.5, %v753_v31 }
 0x70c   : > { %v755_v33 = vmul.f32 %v882_v28, %v754_v32 }
 0x70e   : > { %v759_v35 = vsel %vm758_vm12, %v882_v28, %v755_v33 }
 0x70f   : > { %v760_v37 = vmul.f32 %v759_v35, %v743_v22 }
 0x711   : > { %v765_v38 = vmul.f32 %v867_v34, %v760_v37 }
 0x713   : > { %v770_v39 = vadd.f32 %v868_v36, %v765_v38 }
 0x715   : > { %771 = vst.msk [vmem:[%s435_s28] sm:$0x1f] %vm639_vm5, %v770_v39 }
 0x716 PF: > { %s23_s25 = sadd.s32 1, %s889_s25  }
 0x717   : > { %p20_p4 = scmp.ge.s32.totalorder %s23_s25, 4  }
 0x719   :  { %22 = sbr.rel (!%p20_p4) target bundleno = 1 (0x1), region = 102 }

</bundles_post_ra>
